<compile_context>
chip_gen: v7x
topology: tpu7x:2x2x1
jax: 0.10.0
libtpu: 0.0.40
codegen_flags: <defaults>
</compile_context>

<pallas_src>
import jax
import jax.numpy as jnp
import numpy as np
from jax.experimental import pallas as pl
from jax.experimental.pallas import tpu as pltpu


def _round_up(x, m):
    return (x + m - 1) // m * m


# --------------------------------------------------------------------------
# Pallas kernel: whole backbone + classifier for one (tb, *) batch tile.
# --------------------------------------------------------------------------
def backbone_kernel(
    xp_ref, mu_ref,                                  # activation tiles (batch-blocked)
    w1_ref, b1_ref, w2_ref, b2_ref,                  # x_params_backbone layers 1-2
    w3c_ref, wc1mu_ref, bc1_ref,                     # classifier L1 (w3 folded in)
    wc2_ref, bc2_ref, wc3_ref, bc3_ref,              # classifier L2-L3 (lane-padded)
    out_ref,
):
    f32 = jnp.float32
    bf16 = jnp.bfloat16

    # x_params_backbone: Linear(P,512) -> ReLU -> Linear(512,256) -> ReLU
    h = jnp.dot(xp_ref[...], w1_ref[...], preferred_element_type=f32) + b1_ref[...]
    h = jnp.maximum(h, 0.0).astype(bf16)
    h = jnp.dot(h, w2_ref[...], preferred_element_type=f32) + b2_ref[...]
    h = jnp.maximum(h, 0.0).astype(bf16)

    # Backbone Linear(256,128) folded into classifier layer 1:
    #   relu(cat([h@w3 + b3, mu]) @ wc1 + bc1)
    #   == relu(h @ (w3 @ wc1_p) + mu @ wc1_mu + (bc1 + b3 @ wc1_p))
    c = (
        jnp.dot(h, w3c_ref[...], preferred_element_type=f32)
        + jnp.dot(mu_ref[...], wc1mu_ref[...], preferred_element_type=f32)
        + bc1_ref[...]
    )
    c = jnp.maximum(c, 0.0).astype(bf16)
    # Dropout(0.5) -> identity (eval mode)

    # classifier layer 2 (padded 128 -> 128): Linear -> ReLU -> Dropout(identity)
    c = jnp.dot(c, wc2_ref[...], preferred_element_type=f32) + bc2_ref[...]
    c = jnp.maximum(c, 0.0).astype(bf16)

    # classifier layer 3 (padded 128 -> 128 lanes; real output is column 0)
    out_ref[...] = jnp.dot(c, wc3_ref[...], preferred_element_type=f32) + bc3_ref[...]


def _choose_batch_tile(batch, batch_tile, quantum=256):
    """Large tile to amortize per-step overhead, bounded padding waste, and a
    guaranteed >=2-step grid when the batch is big enough (v7x megacore)."""
    tb = min(batch_tile, _round_up(batch, quantum))
    tb = _round_up(tb, 8)
    b_pad = _round_up(batch, tb)
    if b_pad // tb < 2 and batch > quantum:
        tb = _round_up(pl.cdiv(b_pad, 2), quantum)
        b_pad = _round_up(batch, tb)
    return tb, b_pad


def multimodal_backbone_forward(x_params, mu_list, params, *, batch_tile=1024):
    """Eval-mode forward. mu_list entries with >2 dims are flattened like
    mu.view(B, -1); concat order is [x_params_backbone(x), mu_0, mu_1, ...]."""
    f32 = jnp.float32
    bf16 = jnp.bfloat16

    # Flatten + merge the (frozen-encoder) latents once in the wrapper.
    mus = []
    for m in mu_list:
        if m.ndim > 2:
            m = m.reshape(m.shape[0], -1)
        mus.append(m)
    mu = jnp.concatenate(mus, axis=1)

    B, P = x_params.shape
    Lmu = mu.shape[1]

    tb, b_pad = _choose_batch_tile(B, batch_tile)

    # Lane-dense padding of sub-128 K dims (zero activation columns / weight rows).
    P_pad = _round_up(P, 128)
    Lmu_pad = _round_up(Lmu, 128)

    xp = jnp.pad(x_params, ((0, b_pad - B), (0, P_pad - P))).astype(bf16)
    mu = jnp.pad(mu, ((0, b_pad - B), (0, Lmu_pad - Lmu))).astype(bf16)

    # ---- fold backbone Linear(256,128) into classifier layer 1 (f32 precompute) ----
    wc1 = params["wc1"].astype(f32)
    wc1_p = wc1[:128]                               # rows matching backbone output
    wc1_mu = wc1[128:]                              # rows matching merged latents
    w3c_f32 = params["w3"].astype(f32) @ wc1_p      # (256, 128)
    bc1_f32 = params["bc1"].astype(f32) + params["b3"].astype(f32) @ wc1_p

    # ---- weights -> bf16 (MXU), biases -> f32, zero-padded to 128-lane blocks ----
    w1 = jnp.pad(params["w1"], ((0, P_pad - P), (0, 0))).astype(bf16)
    b1 = params["b1"].astype(f32)
    w2 = params["w2"].astype(bf16)
    b2 = params["b2"].astype(f32)
    w3c = w3c_f32.astype(bf16)
    wc1mu = jnp.pad(wc1_mu, ((0, Lmu_pad - Lmu), (0, 0))).astype(bf16)
    bc1 = bc1_f32.astype(f32)
    wc2 = jnp.pad(params["wc2"], ((0, 0), (0, 128 - params["wc2"].shape[1]))).astype(bf16)
    bc2 = jnp.pad(params["bc2"], ((0, 0), (0, 128 - params["bc2"].shape[1]))).astype(f32)
    wc3 = jnp.pad(
        params["wc3"],
        ((0, 128 - params["wc3"].shape[0]), (0, 128 - params["wc3"].shape[1])),
    ).astype(bf16)
    bc3 = jnp.pad(params["bc3"], ((0, 0), (0, 128 - params["bc3"].shape[1]))).astype(f32)

    args = (xp, mu, w1, b1, w2, b2, w3c, wc1mu, bc1, wc2, bc2, wc3, bc3)

    def act_spec(feat):
        return pl.BlockSpec((tb, feat), lambda i: (i, 0))

    def const_spec(shape):
        # Constant index_map -> block stays VMEM-resident across grid steps.
        return pl.BlockSpec(shape, lambda i: (0, 0))

    in_specs = [
        act_spec(P_pad), act_spec(Lmu_pad),
        const_spec(w1.shape), const_spec(b1.shape),
        const_spec(w2.shape), const_spec(b2.shape),
        const_spec(w3c.shape), const_spec(wc1mu.shape), const_spec(bc1.shape),
        const_spec(wc2.shape), const_spec(bc2.shape),
        const_spec(wc3.shape), const_spec(bc3.shape),
    ]

    flops = 2 * b_pad * (
        P_pad * 512 + 512 * 256 + 256 * 128 + Lmu_pad * 128 + 128 * 128 + 128 * 128
    )
    bytes_accessed = (
        sum(int(a.size) * a.dtype.itemsize for a in args) + b_pad * 128 * 4
    )

    out_full = pl.pallas_call(
        backbone_kernel,
        out_shape=jax.ShapeDtypeStruct((b_pad, 128), f32),
        grid=(b_pad // tb,),
        in_specs=in_specs,
        out_specs=pl.BlockSpec((tb, 128), lambda i: (i, 0)),
        compiler_params=pltpu.CompilerParams(
            dimension_semantics=("parallel",),
        ),
        cost_estimate=pl.CostEstimate(
            flops=flops, transcendentals=0, bytes_accessed=bytes_accessed
        ),
    )(*args)

    return out_full[:B, :1]


# --------------------------------------------------------------------------
# Deterministic synthetic parameters (PyTorch Linear shapes, stored transposed
# as (in, out)).
# --------------------------------------------------------------------------
def make_params(key, clinical_params_size, latent_dim_sizes):
    concat_len = 128 + sum(latent_dim_sizes)

    def lin(k, fan_in, fan_out):
        kw, kb = jax.random.split(k)
        bound = 1.0 / np.sqrt(fan_in)
        w = jax.random.uniform(kw, (fan_in, fan_out), jnp.float32, -bound, bound)
        b = jax.random.uniform(kb, (1, fan_out), jnp.float32, -bound, bound)
        return w, b

    keys = jax.random.split(key, 6)
    w1, b1 = lin(keys[0], clinical_params_size, 512)
    w2, b2 = lin(keys[1], 512, 256)
    w3, b3 = lin(keys[2], 256, 128)
    wc1, bc1 = lin(keys[3], concat_len, 128)
    wc2, bc2 = lin(keys[4], 128, 64)
    wc3, bc3 = lin(keys[5], 64, 1)

    return {
        "w1": w1, "b1": b1, "w2": w2, "b2": b2, "w3": w3, "b3": b3,
        "wc1": wc1, "bc1": bc1, "wc2": wc2, "bc2": bc2, "wc3": wc3, "bc3": bc3,
    }


def reference_forward_bf16(x_params, mu_list, params):
    """Plain-JAX reference mirroring the kernel's folded bf16/f32-accum math."""
    f32, bf16 = jnp.float32, jnp.bfloat16
    mus = [m.reshape(m.shape[0], -1) if m.ndim > 2 else m for m in mu_list]
    mu = jnp.concatenate(mus, axis=1).astype(bf16)
    xp = x_params.astype(bf16)

    def mm(a, w):
        return jnp.dot(a, w.astype(bf16), preferred_element_type=f32)

    wc1 = params["wc1"].astype(f32)
    w3c = params["w3"].astype(f32) @ wc1[:128]
    bc1 = params["bc1"] + params["b3"] @ wc1[:128]

    h = jnp.maximum(mm(xp, params["w1"]) + params["b1"], 0.0).astype(bf16)
    h = jnp.maximum(mm(h, params["w2"]) + params["b2"], 0.0).astype(bf16)
    c = mm(h, w3c) + mm(mu, wc1[128:]) + bc1
    c = jnp.maximum(c, 0.0).astype(bf16)
    c = jnp.maximum(mm(c, params["wc2"]) + params["bc2"], 0.0).astype(bf16)
    return mm(c, params["wc3"]) + params["bc3"]


def reference_forward_f32(x_params, mu_list, params):
    """f32 reference with the original (unfused) PyTorch module structure."""
    mus = [m.reshape(m.shape[0], -1) if m.ndim > 2 else m for m in mu_list]
    mu = jnp.concatenate(mus, axis=1)
    h = jnp.maximum(x_params @ params["w1"] + params["b1"], 0.0)
    h = jnp.maximum(h @ params["w2"] + params["b2"], 0.0)
    p = h @ params["w3"] + params["b3"]
    x = jnp.concatenate([p, mu], axis=1)
    c = jnp.maximum(x @ params["wc1"] + params["bc1"], 0.0)
    c = jnp.maximum(c @ params["wc2"] + params["bc2"], 0.0)
    return c @ params["wc3"] + params["bc3"]


if __name__ == "__main__":
    B = 2
    clinical_params_size = 32
    latent_dim_sizes = (16, 24)

    key = jax.random.PRNGKey(0)
    k_params, k_xp, k_m0, k_m1 = jax.random.split(key, 4)

    params = make_params(k_params, clinical_params_size, latent_dim_sizes)

    # Clinical parameters and (precomputed) frozen-encoder latents `mu`.
    x_params = jax.random.normal(k_xp, (B, clinical_params_size), jnp.float32)
    mu0 = jax.random.normal(k_m0, (B, latent_dim_sizes[0]), jnp.float32)
    # Second modality latent has extra dims -> flattened like mu.view(B, -1).
    mu1 = jax.random.normal(k_m1, (B, 4, 3, 2), jnp.float32)  # 4*3*2 = 24

    out = multimodal_backbone_forward(x_params, [mu0, mu1], params)
    out = jax.block_until_ready(out)
    assert out.shape == (B, 1)

    ref_bf16 = reference_forward_bf16(x_params, [mu0, mu1], params)
    ref_f32 = reference_forward_f32(x_params, [mu0, mu1], params)

    np.testing.assert_allclose(np.asarray(out), np.asarray(ref_bf16), rtol=1e-2, atol=1e-2)
    np.testing.assert_allclose(np.asarray(out), np.asarray(ref_f32), rtol=5e-2, atol=5e-2)

    print("KERNEL_OK")
</pallas_src>

<mosaic_0001>
module attributes {stable_mosaic.version = 11 : i64} {
  func.func @backbone_kernel(%arg0: i32, %arg1: memref<256x128xbf16, #tpu.memory_space<vmem>>, %arg2: memref<256x128xbf16, #tpu.memory_space<vmem>>, %arg3: memref<128x512xbf16, #tpu.memory_space<vmem>>, %arg4: memref<1x512xf32, #tpu.memory_space<vmem>>, %arg5: memref<512x256xbf16, #tpu.memory_space<vmem>>, %arg6: memref<1x256xf32, #tpu.memory_space<vmem>>, %arg7: memref<256x128xbf16, #tpu.memory_space<vmem>>, %arg8: memref<128x128xbf16, #tpu.memory_space<vmem>>, %arg9: memref<1x128xf32, #tpu.memory_space<vmem>>, %arg10: memref<128x128xbf16, #tpu.memory_space<vmem>>, %arg11: memref<1x128xf32, #tpu.memory_space<vmem>>, %arg12: memref<128x128xbf16, #tpu.memory_space<vmem>>, %arg13: memref<1x128xf32, #tpu.memory_space<vmem>>, %arg14: memref<256x128xf32, #tpu.memory_space<vmem>>) attributes {dimension_semantics = [#tpu.dimension_semantics<parallel>], iteration_bounds = array<i64: 1>, scalar_prefetch = 0 : i64, scratch_operands = 0 : i64, tpu.core_type = #tpu.core_type<tc>, window_params = [{transform_indices = @transform_0, window_bounds = array<i64: 256, 128>}, {transform_indices = @transform_1, window_bounds = array<i64: 256, 128>}, {pipeline_mode = #tpu.pipeline_mode<synchronous>, transform_indices = @transform_2, window_bounds = array<i64: 128, 512>}, {pipeline_mode = #tpu.pipeline_mode<synchronous>, transform_indices = @transform_3, window_bounds = array<i64: 1, 512>}, {pipeline_mode = #tpu.pipeline_mode<synchronous>, transform_indices = @transform_4, window_bounds = array<i64: 512, 256>}, {pipeline_mode = #tpu.pipeline_mode<synchronous>, transform_indices = @transform_5, window_bounds = array<i64: 1, 256>}, {pipeline_mode = #tpu.pipeline_mode<synchronous>, transform_indices = @transform_6, window_bounds = array<i64: 256, 128>}, {pipeline_mode = #tpu.pipeline_mode<synchronous>, transform_indices = @transform_7, window_bounds = array<i64: 128, 128>}, {pipeline_mode = #tpu.pipeline_mode<synchronous>, transform_indices = @transform_8, window_bounds = array<i64: 1, 128>}, {pipeline_mode = #tpu.pipeline_mode<synchronous>, transform_indices = @transform_9, window_bounds = array<i64: 128, 128>}, {pipeline_mode = #tpu.pipeline_mode<synchronous>, transform_indices = @transform_10, window_bounds = array<i64: 1, 128>}, {pipeline_mode = #tpu.pipeline_mode<synchronous>, transform_indices = @transform_11, window_bounds = array<i64: 128, 128>}, {pipeline_mode = #tpu.pipeline_mode<synchronous>, transform_indices = @transform_12, window_bounds = array<i64: 1, 128>}, {transform_indices = @transform_13, window_bounds = array<i64: 256, 128>}]} {
    %c0 = arith.constant 0 : index
    %c0_0 = arith.constant 0 : index
    %0 = vector.load %arg1[%c0, %c0_0] : memref<256x128xbf16, #tpu.memory_space<vmem>>, vector<256x128xbf16>
    %c0_1 = arith.constant 0 : index
    %c0_2 = arith.constant 0 : index
    %1 = vector.load %arg3[%c0_1, %c0_2] : memref<128x512xbf16, #tpu.memory_space<vmem>>, vector<128x512xbf16>
    %cst = arith.constant dense<0.000000e+00> : vector<256x512xf32>
    %2 = tpu.matmul %0, %1, %cst {dimension_numbers = #tpu.dot_dimension_numbers<[1], [0], [0], [1], [0, 0, 1, 1], [], []>} : vector<256x128xbf16>, vector<128x512xbf16>, vector<256x512xf32> -> vector<256x512xf32>
    %c0_3 = arith.constant 0 : index
    %c0_4 = arith.constant 0 : index
    %3 = vector.load %arg4[%c0_3, %c0_4] : memref<1x512xf32, #tpu.memory_space<vmem>>, vector<1x512xf32>
    %4 = vector.broadcast %3 : vector<1x512xf32> to vector<256x512xf32>
    %5 = arith.addf %2, %4 : vector<256x512xf32>
    %cst_5 = arith.constant 0.000000e+00 : f32
    %6 = vector.broadcast %cst_5 : f32 to vector<256x512xf32>
    %7 = arith.maximumf %5, %6 : vector<256x512xf32>
    %8 = arith.truncf %7 : vector<256x512xf32> to vector<256x512xbf16>
    %c0_6 = arith.constant 0 : index
    %c0_7 = arith.constant 0 : index
    %9 = vector.load %arg5[%c0_6, %c0_7] : memref<512x256xbf16, #tpu.memory_space<vmem>>, vector<512x256xbf16>
    %cst_8 = arith.constant dense<0.000000e+00> : vector<256x256xf32>
    %10 = tpu.matmul %8, %9, %cst_8 {dimension_numbers = #tpu.dot_dimension_numbers<[1], [0], [0], [1], [0, 0, 1, 1], [], []>} : vector<256x512xbf16>, vector<512x256xbf16>, vector<256x256xf32> -> vector<256x256xf32>
    %c0_9 = arith.constant 0 : index
    %c0_10 = arith.constant 0 : index
    %11 = vector.load %arg6[%c0_9, %c0_10] : memref<1x256xf32, #tpu.memory_space<vmem>>, vector<1x256xf32>
    %12 = vector.broadcast %11 : vector<1x256xf32> to vector<256x256xf32>
    %13 = arith.addf %10, %12 : vector<256x256xf32>
    %cst_11 = arith.constant 0.000000e+00 : f32
    %14 = vector.broadcast %cst_11 : f32 to vector<256x256xf32>
    %15 = arith.maximumf %13, %14 : vector<256x256xf32>
    %16 = arith.truncf %15 : vector<256x256xf32> to vector<256x256xbf16>
    %c0_12 = arith.constant 0 : index
    %c0_13 = arith.constant 0 : index
    %17 = vector.load %arg7[%c0_12, %c0_13] : memref<256x128xbf16, #tpu.memory_space<vmem>>, vector<256x128xbf16>
    %cst_14 = arith.constant dense<0.000000e+00> : vector<256x128xf32>
    %18 = tpu.matmul %16, %17, %cst_14 {dimension_numbers = #tpu.dot_dimension_numbers<[1], [0], [0], [1], [0, 0, 1, 1], [], []>} : vector<256x256xbf16>, vector<256x128xbf16>, vector<256x128xf32> -> vector<256x128xf32>
    %c0_15 = arith.constant 0 : index
    %c0_16 = arith.constant 0 : index
    %19 = vector.load %arg2[%c0_15, %c0_16] : memref<256x128xbf16, #tpu.memory_space<vmem>>, vector<256x128xbf16>
    %c0_17 = arith.constant 0 : index
    %c0_18 = arith.constant 0 : index
    %20 = vector.load %arg8[%c0_17, %c0_18] : memref<128x128xbf16, #tpu.memory_space<vmem>>, vector<128x128xbf16>
    %cst_19 = arith.constant dense<0.000000e+00> : vector<256x128xf32>
    %21 = tpu.matmul %19, %20, %cst_19 {dimension_numbers = #tpu.dot_dimension_numbers<[1], [0], [0], [1], [0, 0, 1, 1], [], []>} : vector<256x128xbf16>, vector<128x128xbf16>, vector<256x128xf32> -> vector<256x128xf32>
    %22 = arith.addf %18, %21 : vector<256x128xf32>
    %c0_20 = arith.constant 0 : index
    %c0_21 = arith.constant 0 : index
    %23 = vector.load %arg9[%c0_20, %c0_21] : memref<1x128xf32, #tpu.memory_space<vmem>>, vector<1x128xf32>
    %24 = vector.broadcast %23 : vector<1x128xf32> to vector<256x128xf32>
    %25 = arith.addf %22, %24 : vector<256x128xf32>
    %cst_22 = arith.constant 0.000000e+00 : f32
    %26 = vector.broadcast %cst_22 : f32 to vector<256x128xf32>
    %27 = arith.maximumf %25, %26 : vector<256x128xf32>
    %28 = arith.truncf %27 : vector<256x128xf32> to vector<256x128xbf16>
    %c0_23 = arith.constant 0 : index
    %c0_24 = arith.constant 0 : index
    %29 = vector.load %arg10[%c0_23, %c0_24] : memref<128x128xbf16, #tpu.memory_space<vmem>>, vector<128x128xbf16>
    %cst_25 = arith.constant dense<0.000000e+00> : vector<256x128xf32>
    %30 = tpu.matmul %28, %29, %cst_25 {dimension_numbers = #tpu.dot_dimension_numbers<[1], [0], [0], [1], [0, 0, 1, 1], [], []>} : vector<256x128xbf16>, vector<128x128xbf16>, vector<256x128xf32> -> vector<256x128xf32>
    %c0_26 = arith.constant 0 : index
    %c0_27 = arith.constant 0 : index
    %31 = vector.load %arg11[%c0_26, %c0_27] : memref<1x128xf32, #tpu.memory_space<vmem>>, vector<1x128xf32>
    %32 = vector.broadcast %31 : vector<1x128xf32> to vector<256x128xf32>
    %33 = arith.addf %30, %32 : vector<256x128xf32>
    %cst_28 = arith.constant 0.000000e+00 : f32
    %34 = vector.broadcast %cst_28 : f32 to vector<256x128xf32>
    %35 = arith.maximumf %33, %34 : vector<256x128xf32>
    %36 = arith.truncf %35 : vector<256x128xf32> to vector<256x128xbf16>
    %c0_29 = arith.constant 0 : index
    %c0_30 = arith.constant 0 : index
    %37 = vector.load %arg12[%c0_29, %c0_30] : memref<128x128xbf16, #tpu.memory_space<vmem>>, vector<128x128xbf16>
    %cst_31 = arith.constant dense<0.000000e+00> : vector<256x128xf32>
    %38 = tpu.matmul %36, %37, %cst_31 {dimension_numbers = #tpu.dot_dimension_numbers<[1], [0], [0], [1], [0, 0, 1, 1], [], []>} : vector<256x128xbf16>, vector<128x128xbf16>, vector<256x128xf32> -> vector<256x128xf32>
    %c0_32 = arith.constant 0 : index
    %c0_33 = arith.constant 0 : index
    %39 = vector.load %arg13[%c0_32, %c0_33] : memref<1x128xf32, #tpu.memory_space<vmem>>, vector<1x128xf32>
    %40 = vector.broadcast %39 : vector<1x128xf32> to vector<256x128xf32>
    %41 = arith.addf %38, %40 : vector<256x128xf32>
    %c0_34 = arith.constant 0 : index
    %c0_35 = arith.constant 0 : index
    %42 = vector.load %arg14[%c0_34, %c0_35] : memref<256x128xf32, #tpu.memory_space<vmem>>, vector<256x128xf32>
    tpu.vector_store %arg14[%c0_34, %c0_35], %41 {strides = array<i32>} : memref<256x128xf32, #tpu.memory_space<vmem>>, vector<256x128xf32>,
    return
  }
  func.func @transform_0(%arg0: i32) -> (i32, i32) {
    %c0_i32 = arith.constant 0 : i32
    %c0_i32_0 = arith.constant 0 : i32
    return %arg0, %c0_i32 : i32, i32
  }
  func.func @transform_1(%arg0: i32) -> (i32, i32) {
    %c0_i32 = arith.constant 0 : i32
    %c0_i32_0 = arith.constant 0 : i32
    return %arg0, %c0_i32 : i32, i32
  }
  func.func @transform_2(%arg0: i32) -> (i32, i32) {
    %c0_i32 = arith.constant 0 : i32
    %c0_i32_0 = arith.constant 0 : i32
    %c0_i32_1 = arith.constant 0 : i32
    return %c0_i32, %c0_i32_0 : i32, i32
  }
  func.func @transform_3(%arg0: i32) -> (i32, i32) {
    %c0_i32 = arith.constant 0 : i32
    %c0_i32_0 = arith.constant 0 : i32
    %c0_i32_1 = arith.constant 0 : i32
    return %c0_i32, %c0_i32_0 : i32, i32
  }
  func.func @transform_4(%arg0: i32) -> (i32, i32) {
    %c0_i32 = arith.constant 0 : i32
    %c0_i32_0 = arith.constant 0 : i32
    %c0_i32_1 = arith.constant 0 : i32
    return %c0_i32, %c0_i32_0 : i32, i32
  }
  func.func @transform_5(%arg0: i32) -> (i32, i32) {
    %c0_i32 = arith.constant 0 : i32
    %c0_i32_0 = arith.constant 0 : i32
    %c0_i32_1 = arith.constant 0 : i32
    return %c0_i32, %c0_i32_0 : i32, i32
  }
  func.func @transform_6(%arg0: i32) -> (i32, i32) {
    %c0_i32 = arith.constant 0 : i32
    %c0_i32_0 = arith.constant 0 : i32
    %c0_i32_1 = arith.constant 0 : i32
    return %c0_i32, %c0_i32_0 : i32, i32
  }
  func.func @transform_7(%arg0: i32) -> (i32, i32) {
    %c0_i32 = arith.constant 0 : i32
    %c0_i32_0 = arith.constant 0 : i32
    %c0_i32_1 = arith.constant 0 : i32
    return %c0_i32, %c0_i32_0 : i32, i32
  }
  func.func @transform_8(%arg0: i32) -> (i32, i32) {
    %c0_i32 = arith.constant 0 : i32
    %c0_i32_0 = arith.constant 0 : i32
    %c0_i32_1 = arith.constant 0 : i32
    return %c0_i32, %c0_i32_0 : i32, i32
  }
  func.func @transform_9(%arg0: i32) -> (i32, i32) {
    %c0_i32 = arith.constant 0 : i32
    %c0_i32_0 = arith.constant 0 : i32
    %c0_i32_1 = arith.constant 0 : i32
    return %c0_i32, %c0_i32_0 : i32, i32
  }
  func.func @transform_10(%arg0: i32) -> (i32, i32) {
    %c0_i32 = arith.constant 0 : i32
    %c0_i32_0 = arith.constant 0 : i32
    %c0_i32_1 = arith.constant 0 : i32
    return %c0_i32, %c0_i32_0 : i32, i32
  }
  func.func @transform_11(%arg0: i32) -> (i32, i32) {
    %c0_i32 = arith.constant 0 : i32
    %c0_i32_0 = arith.constant 0 : i32
    %c0_i32_1 = arith.constant 0 : i32
    return %c0_i32, %c0_i32_0 : i32, i32
  }
  func.func @transform_12(%arg0: i32) -> (i32, i32) {
    %c0_i32 = arith.constant 0 : i32
    %c0_i32_0 = arith.constant 0 : i32
    %c0_i32_1 = arith.constant 0 : i32
    return %c0_i32, %c0_i32_0 : i32, i32
  }
  func.func @transform_13(%arg0: i32) -> (i32, i32) {
    %c0_i32 = arith.constant 0 : i32
    %c0_i32_0 = arith.constant 0 : i32
    return %arg0, %c0_i32 : i32, i32
  }
}

</mosaic_0001>

<bundles_post_ra>
// kernel: tpu_custom_call.1
= control target key start
LH: loop header
LB: loop body
LE: loop exit
PB: predicated region body
PF: predicated region fallthrough
CT: control target
= control target key end

     0   :  { %18 = vsyncpa [#allocation3], 0  ;;  %s5179_s0 = inlined_call_operand.hbm [shape: bf16[256,128], index: 0, kind: input, shape index: {}]   ;;  %s5180_s1 = inlined_call_operand.hbm [shape: bf16[256,128], index: 1, kind: input, shape index: {}]   ;;  %s5181_s2 = inlined_call_operand.hbm [shape: bf16[128,512], index: 2, kind: input, shape index: {}]   ;;  %s5182_s3 = inlined_call_operand.vmem [shape: f32[1,512], index: 3, kind: input, shape index: {}]   ;;  %s5183_s4 = inlined_call_operand.hbm [shape: bf16[512,256], index: 4, kind: input, shape index: {}]   ;;  %s5184_s5 = inlined_call_operand.vmem [shape: f32[1,256], index: 5, kind: input, shape index: {}]   ;;  %s5185_s6 = inlined_call_operand.hbm [shape: bf16[256,128], index: 6, kind: input, shape index: {}]   ;;  %s5186_s7 = inlined_call_operand.hbm [shape: bf16[128,128], index: 7, kind: input, shape index: {}]   ;;  %s5187_s8 = inlined_call_operand.vmem [shape: f32[1,128], index: 8, kind: input, shape index: {}]   ;;  %s5188_s9 = inlined_call_operand.hbm [shape: bf16[128,128], index: 9, kind: input, shape index: {}]   ;;  %s5189_s10 = inlined_call_operand.vmem [shape: f32[1,128], index: 10, kind: input, shape index: {}]   ;;  %s5190_s11 = inlined_call_operand.hbm [shape: bf16[128,128], index: 11, kind: input, shape index: {}]   ;;  %s5191_s12 = inlined_call_operand.vmem [shape: f32[1,128], index: 12, kind: input, shape index: {}]   ;;  %s5192_s13 = inlined_call_operand.hbm [shape: f32[256,128], index: 13, kind: output, shape index: {}]  }
   0x1   :  { %19 = vsyncpa [#allocation6], 0 }
   0x2   :  { %20 = vsyncpa [#allocation9], 0 }
   0x3   :  { %21 = vsyncpa [#allocation12], 0 }
   0x4   :  { %22 = vsyncpa [#allocation15], 0 }
   0x5   :  { %23 = vsyncpa [#allocation4], 0  ;;  %s4332_s25 = smov [#allocation5]   ;;  %s4333_s27 = smov [#allocation8]  }
   0x6   :  { %s41_s26 = sshll.u32 %s4332_s25, 4  ;;  %s67_s28 = sshll.u32 %s4333_s27, 4  ;;  %s42_s26 = int_to_ptr.vmem [resolvable:$true] %s41_s26  ;;  %s4418_s28 = int_to_ptr.vmem [resolvable:$true] %s67_s28 }
   0x7   :  { %s4122_s14 = scalar_lea.hbm %s5180_s1, 2048 }
   0x8   :  { %p4123_p0 = scmp.ne.s32.totalorder %s5180_s1, %s4122_s14  ;;  %p4126_p1 = scmp.lt.u32.totalorder %s4122_s14, %s5180_s1 }
   0xa   :  { %p4128_p2 = pnand %p4126_p1, %p4123_p0 }
   0xc   :  { %4131 = shalt.err (!%p4128_p2)
}
   0xd   :  { %s4132_s19 = scalar_lea.vmem %s42_s26, 2048  ;;  %p4137_p4 = scmp.lt.s32.totalorder %s42_s26, %s42_s26 }
   0xe   :  { %p4133_p3 = scmp.ne.s32.totalorder %s42_s26, %s4132_s19  ;;  %p4138_p5 = scmp.lt.s32.totalorder %s4132_s19, %s4132_s19 }
  0x10   :  { %p4139_p6 = por %p4138_p5, %p4137_p4 }
  0x12   :  { %p4140_p7 = pnand %p4139_p6, %p4133_p3 }
  0x14   :  { %4143 = shalt.err (!%p4140_p7)
}
  0x15   :  { %s4334_s20 = smov 64   ;;  %s4335_s21 = smov 4  }
  0x16   :  { %47 = dma.hbm_to_vmem [thread:$0]  %s5180_s1, 2048, %s42_s26, [#allocation6], %s4334_s20, %s4334_s20, %s4335_s21  }
  0x17   :  { %s4144_s27 = scalar_lea.hbm %s5183_s4, 8192 }
  0x18   :  { %p4145_p8 = scmp.ne.s32.totalorder %s5183_s4, %s4144_s27  ;;  %p4148_p9 = scmp.lt.u32.totalorder %s4144_s27, %s5183_s4 }
  0x1a   :  { %p4150_p10 = pnand %p4148_p9, %p4145_p8 }
  0x1c   :  { %4153 = shalt.err (!%p4150_p10)
}
  0x1d   :  { %s4154_s16 = scalar_lea.vmem %s4418_s28, 8192  ;;  %p4159_p12 = scmp.lt.s32.totalorder %s4418_s28, %s4418_s28 }
  0x1e   :  { %p4155_p11 = scmp.ne.s32.totalorder %s4418_s28, %s4154_s16  ;;  %p4160_p13 = scmp.lt.s32.totalorder %s4154_s16, %s4154_s16 }
  0x20   :  { %p4161_p0 = por %p4160_p13, %p4159_p12 }
  0x22   :  { %p4162_p1 = pnand %p4161_p0, %p4155_p11 }
  0x24   :  { %4165 = shalt.err (!%p4162_p1)
}
  0x25   :  { %s4336_s1 = smov 128   ;;  %s4337_s26 = smov 8  }
  0x26   :  { %73 = dma.hbm_to_vmem [thread:$0]  %s5183_s4, 8192, %s4418_s28, [#allocation9], %s4336_s1, %s4336_s1, %s4337_s26  }
  0x27   :  { %s4338_s19 = smov [#allocation11]   ;;  %s4339_s23 = smov [#allocation2]  }
  0x28   :  { %s93_s22 = sshll.u32 %s4338_s19, 4  ;;  %s29_s24 = sshll.u32 %s4339_s23, 4  ;;  %s94_s22 = int_to_ptr.vmem [resolvable:$true] %s93_s22  ;;  %s4455_s24 = int_to_ptr.vmem [resolvable:$true] %s29_s24 }
  0x29   :  { %s4166_s29 = scalar_lea.hbm %s5186_s7, 1024 }
  0x2a   :  { %p4167_p2 = scmp.ne.s32.totalorder %s5186_s7, %s4166_s29  ;;  %p4170_p3 = scmp.lt.u32.totalorder %s4166_s29, %s5186_s7 }
  0x2c   :  { %p4172_p4 = pnand %p4170_p3, %p4167_p2 }
  0x2e   :  { %4175 = shalt.err (!%p4172_p4)
}
  0x2f   :  { %s4176_s4 = scalar_lea.vmem %s94_s22, 1024  ;;  %p4181_p6 = scmp.lt.s32.totalorder %s94_s22, %s94_s22 }
  0x30   :  { %p4177_p5 = scmp.ne.s32.totalorder %s94_s22, %s4176_s4  ;;  %p4182_p7 = scmp.lt.s32.totalorder %s4176_s4, %s4176_s4 }
  0x32   :  { %p4183_p8 = por %p4182_p7, %p4181_p6 }
  0x34   :  { %p4184_p9 = pnand %p4183_p8, %p4177_p5 }
  0x36   :  { %4187 = shalt.err (!%p4184_p9)
}
  0x37   :  { %99 = dma.hbm_to_vmem [thread:$0]  %s5186_s7, 1024, %s94_s22, [#allocation12], %s4334_s20, %s4334_s20, %s4335_s21  }
  0x38   :  { %s4188_s23 = scalar_lea.hbm %s5179_s0, 2048 }
  0x39   :  { %p4189_p10 = scmp.ne.s32.totalorder %s5179_s0, %s4188_s23  ;;  %p4192_p11 = scmp.lt.u32.totalorder %s4188_s23, %s5179_s0 }
  0x3b   :  { %p4194_p12 = pnand %p4192_p11, %p4189_p10 }
  0x3d   :  { %4197 = shalt.err (!%p4194_p12)
}
  0x3e   :  { %s4198_s14 = scalar_lea.vmem %s4455_s24, 2048  ;;  %p4203_p0 = scmp.lt.s32.totalorder %s4455_s24, %s4455_s24 }
  0x3f   :  { %p4199_p13 = scmp.ne.s32.totalorder %s4455_s24, %s4198_s14  ;;  %p4204_p1 = scmp.lt.s32.totalorder %s4198_s14, %s4198_s14 }
  0x41   :  { %p4205_p2 = por %p4204_p1, %p4203_p0 }
  0x43   :  { %p4206_p3 = pnand %p4205_p2, %p4199_p13 }
  0x45   :  { %4209 = shalt.err (!%p4206_p3)
}
  0x46   :  { %35 = dma.hbm_to_vmem [thread:$0]  %s5179_s0, 2048, %s4455_s24, [#allocation3], %s4334_s20, %s4334_s20, %s4335_s21  }
  0x47   :  { %s4340_s15 = smov [#allocation7]   ;;  %s4210_s17 = scalar_lea.hbm %s5181_s2, 4096 }
  0x48   :  { %s53_s16 = sshll.u32 %s4340_s15, 4  ;;  %p4211_p4 = scmp.ne.s32.totalorder %s5181_s2, %s4210_s17  ;;  %s54_s16 = int_to_ptr.vmem [resolvable:$true] %s53_s16 }
  0x49   :  { %p4214_p5 = scmp.lt.u32.totalorder %s4210_s17, %s5181_s2 }
  0x4b   :  { %p4216_p6 = pnand %p4214_p5, %p4211_p4 }
  0x4d   :  { %4219 = shalt.err (!%p4216_p6)
}
  0x4e   :  { %s4220_s27 = scalar_lea.vmem %s54_s16, 4096  ;;  %p4225_p8 = scmp.lt.s32.totalorder %s54_s16, %s54_s16 }
  0x4f   :  { %p4221_p7 = scmp.ne.s32.totalorder %s54_s16, %s4220_s27  ;;  %p4226_p9 = scmp.lt.s32.totalorder %s4220_s27, %s4220_s27 }
  0x51   :  { %p4227_p10 = por %p4226_p9, %p4225_p8 }
  0x53   :  { %p4228_p11 = pnand %p4227_p10, %p4221_p7 }
  0x55   :  { %4231 = shalt.err (!%p4228_p11)
}
  0x56   :  { %s4341_s0 = smov 256   ;;  %s4342_s24 = smov 16  }
  0x57   :  { %59 = dma.hbm_to_vmem [thread:$0]  %s5181_s2, 4096, %s54_s16, [#allocation6], %s4341_s0, %s4341_s0, %s4342_s24  }
  0x58   :  { %s4343_s14 = smov [#allocation10]   ;;  %s4344_s22 = smov [#allocation13]  }
  0x59   :  { %s81_s7 = sshll.u32 %s4343_s14, 4  ;;  %s107_s15 = sshll.u32 %s4344_s22, 4  ;;  %s82_s7 = int_to_ptr.vmem [resolvable:$true] %s81_s7  ;;  %s108_s15 = int_to_ptr.vmem [resolvable:$true] %s107_s15 }
  0x5a   :  { %s4232_s17 = scalar_lea.hbm %s5185_s6, 2048 }
  0x5b   :  { %p4233_p12 = scmp.ne.s32.totalorder %s5185_s6, %s4232_s17  ;;  %p4236_p13 = scmp.lt.u32.totalorder %s4232_s17, %s5185_s6 }
  0x5d   :  { %p4238_p0 = pnand %p4236_p13, %p4233_p12 }
  0x5f   :  { %4241 = shalt.err (!%p4238_p0)
}
  0x60   :  { %s4242_s2 = scalar_lea.vmem %s82_s7, 2048  ;;  %p4247_p2 = scmp.lt.s32.totalorder %s82_s7, %s82_s7 }
  0x61   :  { %p4243_p1 = scmp.ne.s32.totalorder %s82_s7, %s4242_s2  ;;  %p4248_p3 = scmp.lt.s32.totalorder %s4242_s2, %s4242_s2 }
  0x63   :  { %p4249_p4 = por %p4248_p3, %p4247_p2 }
  0x65   :  { %p4250_p5 = pnand %p4249_p4, %p4243_p1 }
  0x67   :  { %4253 = shalt.err (!%p4250_p5)
}
  0x68   :  { %87 = dma.hbm_to_vmem [thread:$0]  %s5185_s6, 2048, %s82_s7, [#allocation9], %s4334_s20, %s4334_s20, %s4335_s21  }
  0x69   :  { %s4254_s29 = scalar_lea.hbm %s5188_s9, 1024 }
  0x6a   :  { %p4255_p6 = scmp.ne.s32.totalorder %s5188_s9, %s4254_s29  ;;  %p4258_p7 = scmp.lt.u32.totalorder %s4254_s29, %s5188_s9 }
  0x6c   :  { %p4260_p8 = pnand %p4258_p7, %p4255_p6 }
  0x6e   :  { %4263 = shalt.err (!%p4260_p8)
}
  0x6f   :  { %s4264_s28 = scalar_lea.vmem %s108_s15, 1024  ;;  %p4269_p10 = scmp.lt.s32.totalorder %s108_s15, %s108_s15 }
  0x70   :  { %p4265_p9 = scmp.ne.s32.totalorder %s108_s15, %s4264_s28  ;;  %p4270_p11 = scmp.lt.s32.totalorder %s4264_s28, %s4264_s28 }
  0x72   :  { %p4271_p12 = por %p4270_p11, %p4269_p10 }
  0x74   :  { %p4272_p13 = pnand %p4271_p12, %p4265_p9 }
  0x76   :  { %4275 = shalt.err (!%p4272_p13)
}
  0x77   :  { %113 = dma.hbm_to_vmem [thread:$0]  %s5188_s9, 1024, %s108_s15, [#allocation12], %s4334_s20, %s4334_s20, %s4335_s21  }
  0x78   :  { %s4345_s17 = smov [#allocation14]   ;;  %s4276_s25 = scalar_lea.hbm %s5190_s11, 1024 }
  0x79   :  { %s121_s18 = sshll.u32 %s4345_s17, 4  ;;  %p4277_p0 = scmp.ne.s32.totalorder %s5190_s11, %s4276_s25  ;;  %s122_s18 = int_to_ptr.vmem [resolvable:$true] %s121_s18 }
  0x7a   :  { %p4280_p1 = scmp.lt.u32.totalorder %s4276_s25, %s5190_s11 }
  0x7c   :  { %p4282_p2 = pnand %p4280_p1, %p4277_p0 }
  0x7e   :  { %4285 = shalt.err (!%p4282_p2)
}
  0x7f   :  { %s4286_s24 = scalar_lea.vmem %s122_s18, 1024  ;;  %p4291_p4 = scmp.lt.s32.totalorder %s122_s18, %s122_s18 }
  0x80   :  { %p4287_p3 = scmp.ne.s32.totalorder %s122_s18, %s4286_s24  ;;  %p4292_p5 = scmp.lt.s32.totalorder %s4286_s24, %s4286_s24 }
  0x82   :  { %p4293_p6 = por %p4292_p5, %p4291_p4 }
  0x84   :  { %p4294_p7 = pnand %p4293_p6, %p4287_p3 }
  0x86   :  { %4297 = shalt.err (!%p4294_p7)
}
  0x87   :  { %127 = dma.hbm_to_vmem [thread:$0]  %s5190_s11, 1024, %s122_s18, [#allocation15], %s4334_s20, %s4334_s20, %s4335_s21  }
  0x88   :  { %4320 = dma.done.wait [#allocation3], 2048  }
  0x89   :  { %4321 = vsyncadd [#allocation3], 4294965248 }
  0x8a   :  { %4322 = dma.done.wait [#allocation6], 6144  }
  0x8b   :  { %4323 = vsyncadd [#allocation6], 4294961152 }
  0x8c   :  { %4324 = dma.done.wait [#allocation9], 10240  }
  0x8d   :  { %4325 = vsyncadd [#allocation9], 4294957056 }
  0x8e   :  { %4326 = dma.done.wait [#allocation12], 2048  }
  0x8f   :  { %4327 = vsyncadd [#allocation12], 4294965248 }
  0x90   :  { %4328 = dma.done.wait [#allocation15], 1024  }
  0x91   :  { %4329 = vsyncadd [#allocation15], 4294966272  ;;  %v4346_v0 = vmov 0   ;;  %v3906_v1 = vld [vmem:[#allocation7 + $0x4] ss:$16 sps:$4 sm:$0xff]   ;;  %v4558_v23 = vld [vmem:[#allocation2 + $0x8] sm:$0xff]  }
  0x92   :  { %529 = vmatprep.mubr.bf16.mxu0 %v4346_v0  ;;  %649 = vmatprep.mubr.bf16.mxu1 %v4346_v0  ;;  %v3908_v2 = vld [vmem:[#allocation7] ss:$16 sps:$4 sm:$0xff]   ;;  %v3909_v3 = vld [vmem:[#allocation7 + $0x24] ss:$16 sps:$4 sm:$0xff]   ;;  %v3945_v17 = vld [vmem:[#allocation7 + $0xc] ss:$16 sps:$4 sm:$0xff]  }
  0x93   :  { %497 = vmatprep.subr.bf16.mxu0 %v3906_v1  ;;  %3746 = vmatprep.subr.bf16.mxu1 %v3906_v1  ;;  %v3911_v4 = vld [vmem:[#allocation7 + $0x20] ss:$16 sps:$4 sm:$0xff]   ;;  %v3912_v5 = vld [vmem:[#allocation7 + $0x44] ss:$16 sps:$4 sm:$0xff]   ;;  %v3943_v20 = vld [vmem:[#allocation7 + $0x8] ss:$16 sps:$4 sm:$0xff]  }
  0x94   :  { %498 = vmatpush1.bf16.msra.mxu0 %v3908_v2  ;;  %3754 = vmatpush1.bf16.msra.mxu1 %v3908_v2  ;;  %v3914_v6 = vld [vmem:[#allocation7 + $0x40] ss:$16 sps:$4 sm:$0xff]   ;;  %v3915_v7 = vld [vmem:[#allocation7 + $0x64] ss:$16 sps:$4 sm:$0xff]   ;;  %v3948_v21 = vld [vmem:[#allocation7 + $0x2c] ss:$16 sps:$4 sm:$0xff]  }
  0x95   :  { %499 = vmatprep.subr.bf16.mxu0 %v3909_v3  ;;  %3747 = vmatprep.subr.bf16.mxu1 %v3909_v3  ;;  %v3917_v8 = vld [vmem:[#allocation7 + $0x60] ss:$16 sps:$4 sm:$0xff]   ;;  %v3918_v9 = vld [vmem:[#allocation7 + $0x84] ss:$16 sps:$4 sm:$0xff]   ;;  %v3946_v22 = vld [vmem:[#allocation7 + $0x28] ss:$16 sps:$4 sm:$0xff]  }
  0x96   :  { %v3920_v10 = vld [vmem:[#allocation7 + $0x80] ss:$16 sps:$4 sm:$0xff]   ;;  %v3921_v11 = vld [vmem:[#allocation7 + $0xa4] ss:$16 sps:$4 sm:$0xff]   ;;  %v3952_v24 = vld [vmem:[#allocation7 + $0x4c] ss:$16 sps:$4 sm:$0xff]  }
  0x97   :  { %v3923_v12 = vld [vmem:[#allocation7 + $0xa0] ss:$16 sps:$4 sm:$0xff]   ;;  %v3924_v13 = vld [vmem:[#allocation7 + $0xc4] ss:$16 sps:$4 sm:$0xff]   ;;  %v4561_v25 = vld [vmem:[#allocation2 + $0x68] sm:$0xff]  }
  0x98   :  { %500 = vmatpush1.bf16.msra.mxu0 %v3911_v4  ;;  %3755 = vmatpush1.bf16.msra.mxu1 %v3911_v4  ;;  %v3926_v14 = vld [vmem:[#allocation7 + $0xc0] ss:$16 sps:$4 sm:$0xff]   ;;  %v3927_v15 = vld [vmem:[#allocation7 + $0xe4] ss:$16 sps:$4 sm:$0xff]   ;;  %v3950_v28 = vld [vmem:[#allocation7 + $0x48] ss:$16 sps:$4 sm:$0xff]  }
  0x99   :  { %501 = vmatprep.subr.bf16.mxu0 %v3912_v5  ;;  %3748 = vmatprep.subr.bf16.mxu1 %v3912_v5  ;;  %v3929_v16 = vld [vmem:[#allocation7 + $0xe0] ss:$16 sps:$4 sm:$0xff]   ;;  %v3972_v27 = vld [vmem:[#allocation8 + $0x4] ss:$8 sps:$4 sm:$0xff]   ;;  %v3975_v30 = vld [vmem:[#allocation8 + $0x14] ss:$8 sps:$4 sm:$0xff]  }
  0x9a   :  { %v4551_v18 = vld [vmem:[#allocation2] sm:$0xff]   ;;  %v3955_v29 = vld [vmem:[#allocation7 + $0x6c] ss:$16 sps:$4 sm:$0xff]   ;;  %v3973_v31 = vld [vmem:[#allocation8 + $0x10] ss:$8 sps:$4 sm:$0xff]  }
  0x9b   :  { %v4553_v19 = vld [vmem:[#allocation2 + $0x60] sm:$0xff]   ;;  %v3953_v32 = vld [vmem:[#allocation7 + $0x68] ss:$16 sps:$4 sm:$0xff]   ;;  %v3959_v34 = vld [vmem:[#allocation7 + $0x8c] ss:$16 sps:$4 sm:$0xff]  }
  0x9c   :  { %502 = vmatpush1.bf16.msra.mxu0 %v3914_v6  ;;  %3756 = vmatpush1.bf16.msra.mxu1 %v3914_v6  ;;  %v3970_v26 = vld [vmem:[#allocation8] ss:$8 sps:$4 sm:$0xff]   ;;  %v3978_v33 = vld [vmem:[#allocation8 + $0x24] ss:$8 sps:$4 sm:$0xff]   ;;  %v4567_v35 = vld [vmem:[#allocation2 + $0x10] sm:$0xff]  }
  0x9d   :  { %503 = vmatprep.subr.bf16.mxu0 %v3915_v7  ;;  %3749 = vmatprep.subr.bf16.mxu1 %v3915_v7  ;;  %v4569_v36 = vld [vmem:[#allocation2 + $0x70] sm:$0xff]   ;;  %v3957_v37 = vld [vmem:[#allocation7 + $0x88] ss:$16 sps:$4 sm:$0xff]   ;;  %v3962_v38 = vld [vmem:[#allocation7 + $0xac] ss:$16 sps:$4 sm:$0xff]  }
  0x9e   :  { %v3976_v39 = vld [vmem:[#allocation8 + $0x20] ss:$8 sps:$4 sm:$0xff]   ;;  %v3981_v40 = vld [vmem:[#allocation8 + $0x34] ss:$8 sps:$4 sm:$0xff]   ;;  %v3979_v43 = vld [vmem:[#allocation8 + $0x30] ss:$8 sps:$4 sm:$0xff]  }
  0x9f   :  { %v3960_v41 = vld [vmem:[#allocation7 + $0xa8] ss:$16 sps:$4 sm:$0xff]   ;;  %v3966_v42 = vld [vmem:[#allocation7 + $0xcc] ss:$16 sps:$4 sm:$0xff]   ;;  %v3934_v52 = vld [vmem:[#allocation2 + $0x20] sm:$0xff]  }
  0xa0   :  { %504 = vmatpush1.bf16.msra.mxu0 %v3917_v8  ;;  %3757 = vmatpush1.bf16.msra.mxu1 %v3917_v8  ;;  %v4575_v44 = vld [vmem:[#allocation2 + $0x18] sm:$0xff]   ;;  %v3982_v48 = vld [vmem:[#allocation8 + $0x40] ss:$8 sps:$4 sm:$0xff]   ;;  %v3984_v50 = vld [vmem:[#allocation8 + $0x44] ss:$8 sps:$4 sm:$0xff]  }
  0xa1   :  { %505 = vmatprep.subr.bf16.mxu0 %v3918_v9  ;;  %3750 = vmatprep.subr.bf16.mxu1 %v3918_v9  ;;  %v4577_v45 = vld [vmem:[#allocation2 + $0x78] sm:$0xff]   ;;  %v3990_v54 = vld [vmem:[#allocation8 + $0x64] ss:$8 sps:$4 sm:$0xff]   ;;  %v3988_v55 = vld [vmem:[#allocation8 + $0x60] ss:$8 sps:$4 sm:$0xff]  }
  0xa2   :  { %v3964_v46 = vld [vmem:[#allocation7 + $0xc8] ss:$16 sps:$4 sm:$0xff]   ;;  %v3969_v47 = vld [vmem:[#allocation7 + $0xec] ss:$16 sps:$4 sm:$0xff]   ;;  %v3936_v62 = vld [vmem:[#allocation2 + $0x30] sm:$0xff]  }
  0xa3   :  { %v3967_v49 = vld [vmem:[#allocation7 + $0xe8] ss:$16 sps:$4 sm:$0xff]   ;;  %v3987_v51 = vld [vmem:[#allocation8 + $0x54] ss:$8 sps:$4 sm:$0xff]   ;;  %v3996_v59 = vld [vmem:[#allocation8 + $0x84] ss:$8 sps:$4 sm:$0xff]  }
  0xa4   :  { %506 = vmatpush1.bf16.msra.mxu0 %v3920_v10  ;;  %3758 = vmatpush1.bf16.msra.mxu1 %v3920_v10  ;;  %v3985_v53 = vld [vmem:[#allocation8 + $0x50] ss:$8 sps:$4 sm:$0xff]   ;;  %v3993_v56 = vld [vmem:[#allocation8 + $0x74] ss:$8 sps:$4 sm:$0xff]   ;;  %v3935_v57 = vld [vmem:[#allocation2 + $0x28] sm:$0xff]  }
  0xa5   :  { %507 = vmatprep.subr.bf16.mxu0 %v3921_v11  ;;  %3751 = vmatprep.subr.bf16.mxu1 %v3921_v11  ;;  %v3991_v58 = vld [vmem:[#allocation8 + $0x70] ss:$8 sps:$4 sm:$0xff]   ;;  %v3994_v60 = vld [vmem:[#allocation8 + $0x80] ss:$8 sps:$4 sm:$0xff]   ;;  %v3999_v61 = vld [vmem:[#allocation8 + $0x94] ss:$8 sps:$4 sm:$0xff]  }
  0xa6   :  { %v3997_v63 = vld [vmem:[#allocation8 + $0x90] ss:$8 sps:$4 sm:$0xff]   ;;  %v4002_v1 = vld [vmem:[#allocation8 + $0xa4] ss:$8 sps:$4 sm:$0xff]   ;;  %v4000_v2 = vld [vmem:[#allocation8 + $0xa0] ss:$8 sps:$4 sm:$0xff]  }
  0xa7   :  { %v4005_v3 = vld [vmem:[#allocation8 + $0xb4] ss:$8 sps:$4 sm:$0xff]   ;;  %v4003_v5 = vld [vmem:[#allocation8 + $0xb0] ss:$8 sps:$4 sm:$0xff]   ;;  %v4008_v6 = vld [vmem:[#allocation8 + $0xc4] ss:$8 sps:$4 sm:$0xff]  }
  0xa8   :  { %508 = vmatpush1.bf16.msra.mxu0 %v3923_v12  ;;  %3759 = vmatpush1.bf16.msra.mxu1 %v3923_v12  ;;  %v3937_v4 = vld [vmem:[#allocation2 + $0x38] sm:$0xff]   ;;  %v4006_v7 = vld [vmem:[#allocation8 + $0xc0] ss:$8 sps:$4 sm:$0xff]   ;;  %v4014_v11 = vld [vmem:[#allocation8 + $0xe4] ss:$8 sps:$4 sm:$0xff]  }
  0xa9   :  { %509 = vmatprep.subr.bf16.mxu0 %v3924_v13  ;;  %3752 = vmatprep.subr.bf16.mxu1 %v3924_v13  ;;  %v4011_v8 = vld [vmem:[#allocation8 + $0xd4] ss:$8 sps:$4 sm:$0xff]   ;;  %v3938_v9 = vld [vmem:[#allocation2 + $0x40] sm:$0xff]   ;;  %v4009_v10 = vld [vmem:[#allocation8 + $0xd0] ss:$8 sps:$4 sm:$0xff]  }
  0xaa   :  { %v4012_v12 = vld [vmem:[#allocation8 + $0xe0] ss:$8 sps:$4 sm:$0xff]  }
  0xab   :  { %v3939_v13 = vld [vmem:[#allocation2 + $0x48] sm:$0xff]  }
  0xac   :  { %510 = vmatpush1.bf16.msra.mxu0 %v3926_v14  ;;  %3760 = vmatpush1.bf16.msra.mxu1 %v3926_v14  ;;  %v3940_v14 = vld [vmem:[#allocation2 + $0x50] sm:$0xff]  }
  0xad   :  { %511 = vmatprep.subr.bf16.mxu0 %v3927_v15  ;;  %3753 = vmatprep.subr.bf16.mxu1 %v3927_v15  ;;  %v3941_v15 = vld [vmem:[#allocation2 + $0x58] sm:$0xff]  }
  0xb0   :  { %512 = vmatpush1.bf16.msra.mxu0 %v3929_v16  ;;  %3761 = vmatpush1.bf16.msra.mxu1 %v3929_v16  ;;  %v4017_v16 = vld [vmem:[#allocation8 + $0xf4] ss:$8 sps:$4 sm:$0xff]  }
  0xb1   :  { %690 = vmatprep.subr.bf16.mxu1 %v3945_v17  ;;  %1471 = vmatprep.subr.bf16.mxu0 %v3972_v27  ;;  %v4015_v17 = vld [vmem:[#allocation8 + $0xf0] ss:$8 sps:$4 sm:$0xff]  }
  0xb3   :  { %530 = vmatmul.mubr.bf16.vlgmr.msra.gmra.mrb[0].mxu0 %v4551_v18  ;;  %650 = vmatmul.mubr.bf16.vlgmr.msra.gmra.mrb[0].mxu1 %v4553_v19 }
  0xb4   :  { %539 = vmatprep.mubr.bf16.mxu0 %v4346_v0  ;;  %691 = vmatpush1.bf16.msra.mxu1 %v3943_v20  ;;  %v221_v20 = vlaneseq }
  0xb5   :  { %692 = vmatprep.subr.bf16.mxu1 %v3948_v21  ;;  %659 = vmatprep.mubr.bf16.mxu1 %v4346_v0 }
  0xb6   :  { %1472 = vmatpush1.bf16.msra.mxu0 %v3970_v26  ;;  %v4613_v21 = vshrl.u32 %v221_v20, 7 }
  0xb7   :  { %1473 = vmatprep.subr.bf16.mxu0 %v3975_v30 }
  0xb8   :  { %693 = vmatpush1.bf16.msra.mxu1 %v3946_v22  ;;  %v223_v22 = vsub.s32 0, %v4613_v21 }
  0xb9   :  { %694 = vmatprep.subr.bf16.mxu1 %v3952_v24 }
  0xba   :  { %1474 = vmatpush1.bf16.msra.mxu0 %v3973_v31 }
  0xbb   :  { %540 = vmatmul.mubr.bf16.gmra.mrb[4].mxu0 %v4558_v23  ;;  %660 = vmatmul.mubr.bf16.gmra.mrb[4].mxu1 %v4561_v25 }
  0xbc   :  { %549 = vmatprep.mubr.bf16.mxu0 %v4346_v0  ;;  %695 = vmatpush1.bf16.msra.mxu1 %v3950_v28 }
  0xbd   :  { %696 = vmatprep.subr.bf16.mxu1 %v3955_v29  ;;  %669 = vmatprep.mubr.bf16.mxu1 %v4346_v0 }
  0xbe   :  { %1475 = vmatprep.subr.bf16.mxu0 %v3978_v33 }
  0xbf   :  { %1476 = vmatpush1.bf16.msra.mxu0 %v3976_v39 }
  0xc0   :  { %697 = vmatpush1.bf16.msra.mxu1 %v3953_v32  ;;  %1477 = vmatprep.subr.bf16.mxu0 %v3981_v40 }
  0xc1   :  { %698 = vmatprep.subr.bf16.mxu1 %v3959_v34 }
  0xc3   :  { %550 = vmatmul.mubr.bf16.gmra.mrb[8].mxu0 %v4567_v35  ;;  %670 = vmatmul.mubr.bf16.gmra.mrb[8].mxu1 %v4569_v36 }
  0xc4   :  { %559 = vmatprep.mubr.bf16.mxu0 %v4346_v0  ;;  %699 = vmatpush1.bf16.msra.mxu1 %v3957_v37 }
  0xc5   :  { %700 = vmatprep.subr.bf16.mxu1 %v3962_v38  ;;  %679 = vmatprep.mubr.bf16.mxu1 %v4346_v0 }
  0xc6   :  { %1478 = vmatpush1.bf16.msra.mxu0 %v3979_v43 }
  0xc7   :  { %1479 = vmatprep.subr.bf16.mxu0 %v3984_v50 }
  0xc8   :  { %701 = vmatpush1.bf16.msra.mxu1 %v3960_v41 }
  0xc9   :  { %702 = vmatprep.subr.bf16.mxu1 %v3966_v42 }
  0xca   :  { %1480 = vmatpush1.bf16.msra.mxu0 %v3982_v48 }
  0xcb   :  { %560 = vmatmul.mubr.bf16.gmra.mrb[12].mxu0 %v4575_v44  ;;  %680 = vmatmul.mubr.bf16.gmra.mrb[12].mxu1 %v4577_v45 }
  0xcc   :  { %569 = vmatprep.mubr.bf16.mxu0 %v4346_v0  ;;  %703 = vmatpush1.bf16.msra.mxu1 %v3964_v46 }
  0xcd   :  { %704 = vmatprep.subr.bf16.mxu1 %v3969_v47  ;;  %722 = vmatprep.mubr.bf16.mxu1 %v4346_v0 }
  0xce   :  { %1481 = vmatprep.subr.bf16.mxu0 %v3987_v51 }
  0xcf   :  { %1482 = vmatpush1.bf16.msra.mxu0 %v3985_v53  ;;  %v4018_v53 = vld [vmem:[#allocation8 + $0x100] ss:$8 sps:$4 sm:$0xff]  }
  0xd0   :  { %705 = vmatpush1.bf16.msra.mxu1 %v3967_v49  ;;  %1483 = vmatprep.subr.bf16.mxu0 %v3990_v54 }
  0xd3   :  { %570 = vmatmul.mubr.bf16.gmra.mrb[16].mxu0 %v3934_v52  ;;  %723 = vmatmul.mubr.bf16.vlgmr.msra.gmra.mrb[16].mxu1 %v4551_v18  ;;  %v4020_v18 = vld [vmem:[#allocation8 + $0x104] ss:$8 sps:$4 sm:$0xff]  }
  0xd4   :  { %579 = vmatprep.mubr.bf16.mxu0 %v4346_v0  ;;  %732 = vmatprep.mubr.bf16.mxu1 %v4346_v0 }
  0xd5   :  { %1484 = vmatpush1.bf16.msra.mxu0 %v3988_v55 }
  0xd6   :  { %1485 = vmatprep.subr.bf16.mxu0 %v3993_v56 }
  0xd9   :  { %1486 = vmatpush1.bf16.msra.mxu0 %v3991_v58  ;;  %v4023_v58 = vld [vmem:[#allocation8 + $0x114] ss:$8 sps:$4 sm:$0xff]  }
  0xda   :  { %1487 = vmatprep.subr.bf16.mxu0 %v3996_v59 }
  0xdb   :  { %580 = vmatmul.mubr.bf16.gmra.mrb[20].mxu0 %v3935_v57  ;;  %733 = vmatmul.mubr.bf16.gmra.mrb[20].mxu1 %v4558_v23  ;;  %v227_v23 = vsub.s32 1, %v4613_v21 }
  0xdc   :  { %589 = vmatprep.mubr.bf16.mxu0 %v4346_v0  ;;  %742 = vmatprep.mubr.bf16.mxu1 %v4346_v0 }
  0xdd   :  { %1488 = vmatpush1.bf16.msra.mxu0 %v3994_v60 }
  0xde   :  { %1489 = vmatprep.subr.bf16.mxu0 %v3999_v61 }
  0xe1   :  { %1490 = vmatpush1.bf16.msra.mxu0 %v3997_v63 }
  0xe2   :  { %1491 = vmatprep.subr.bf16.mxu0 %v4002_v1 }
  0xe3   :  { %590 = vmatmul.mubr.bf16.gmra.mrb[24].mxu0 %v3936_v62  ;;  %743 = vmatmul.mubr.bf16.gmra.mrb[24].mxu1 %v4567_v35 }
  0xe4   :  { %599 = vmatprep.mubr.bf16.mxu0 %v4346_v0  ;;  %752 = vmatprep.mubr.bf16.mxu1 %v4346_v0 }
  0xe5   :  { %1492 = vmatpush1.bf16.msra.mxu0 %v4000_v2 }
  0xe6   :  { %1493 = vmatprep.subr.bf16.mxu0 %v4005_v3 }
  0xe9   :  { %1494 = vmatpush1.bf16.msra.mxu0 %v4003_v5 }
  0xea   :  { %1495 = vmatprep.subr.bf16.mxu0 %v4008_v6 }
  0xeb   :  { %600 = vmatmul.mubr.bf16.gmra.mrb[28].mxu0 %v3937_v4  ;;  %753 = vmatmul.mubr.bf16.gmra.mrb[28].mxu1 %v4575_v44 }
  0xec   :  { %609 = vmatprep.mubr.bf16.mxu0 %v4346_v0  ;;  %762 = vmatprep.mubr.bf16.mxu1 %v4346_v0 }
  0xed   :  { %1496 = vmatpush1.bf16.msra.mxu0 %v4006_v7 }
  0xee   :  { %1497 = vmatprep.subr.bf16.mxu0 %v4011_v8  ;;  %v4021_v8 = vld [vmem:[#allocation8 + $0x110] ss:$8 sps:$4 sm:$0xff]  }
  0xf1   :  { %1498 = vmatpush1.bf16.msra.mxu0 %v4009_v10 }
  0xf2   :  { %1499 = vmatprep.subr.bf16.mxu0 %v4014_v11 }
  0xf3   :  { %610 = vmatmul.mubr.bf16.gmra.mrb[32].mxu0 %v3938_v9  ;;  %763 = vmatmul.mubr.bf16.gmra.mrb[32].mxu1 %v3934_v52 }
  0xf4   :  { %619 = vmatprep.mubr.bf16.mxu0 %v4346_v0  ;;  %772 = vmatprep.mubr.bf16.mxu1 %v4346_v0 }
  0xf5   :  { %1500 = vmatpush1.bf16.msra.mxu0 %v4012_v12 }
  0xf6   :  { %1501 = vmatprep.subr.bf16.mxu0 %v4017_v16 }
  0xf9   :  { %1502 = vmatpush1.bf16.msra.mxu0 %v4015_v17 }
  0xfa   :  { %1664 = vmatprep.subr.bf16.mxu0 %v4020_v18 }
  0xfb   :  { %620 = vmatmul.mubr.bf16.gmra.mrb[36].mxu0 %v3939_v13  ;;  %773 = vmatmul.mubr.bf16.gmra.mrb[36].mxu1 %v3935_v57 }
  0xfc   :  { %629 = vmatprep.mubr.bf16.mxu0 %v4346_v0  ;;  %782 = vmatprep.mubr.bf16.mxu1 %v4346_v0 }
 0x103   :  { %630 = vmatmul.mubr.bf16.gmra.mrb[40].mxu0 %v3940_v14  ;;  %783 = vmatmul.mubr.bf16.gmra.mrb[40].mxu1 %v3936_v62 }
 0x104   :  { %639 = vmatprep.mubr.bf16.mxu0 %v4346_v0  ;;  %792 = vmatprep.mubr.bf16.mxu1 %v4346_v0 }
 0x10b   :  { %640 = vmatmul.mubr.bf16.gmra.mrb[44].mxu0 %v3941_v15  ;;  %793 = vmatmul.mubr.bf16.gmra.mrb[44].mxu1 %v3937_v4 }
 0x10c   :  { %802 = vmatprep.mubr.bf16.mxu1 %v4346_v0 }
 0x113   :  { %803 = vmatmul.mubr.bf16.gmra.mrb[48].mxu1 %v3938_v9 }
 0x114   :  { %812 = vmatprep.mubr.bf16.mxu1 %v4346_v0 }
 0x11b   :  { %813 = vmatmul.mubr.bf16.gmra.mrb[52].mxu1 %v3939_v13  ;;  %v4026_v13 = vld [vmem:[#allocation8 + $0x124] ss:$8 sps:$4 sm:$0xff]  }
 0x11c   :  { %822 = vmatprep.mubr.bf16.mxu1 %v4346_v0 }
 0x123   :  { %823 = vmatmul.mubr.bf16.gmra.mrb[56].mxu1 %v3940_v14 }
 0x124   :  { %832 = vmatprep.mubr.bf16.mxu1 %v4346_v0 }
 0x12b   :  { %833 = vmatmul.mubr.bf16.gmra.mrb[60].mxu1 %v3941_v15 }
 0x12c   :  { %842 = vmatprep.mubr.bf16.mxu1 %v4346_v0 }
 0x133   :  { %843 = vmatmul.mubr.bf16.gmra.mrb[64].mxu1 %v4553_v19  ;;  %v4619_v19 = vld [vmem:[%s5182_s3] sm:$0xf] }
 0x134   :  { %852 = vmatprep.mubr.bf16.mxu1 %v4346_v0  ;;  %v4625_v24 = vrot.slane %v4619_v19, %v223_v22 }
 0x13b   :  { %853 = vmatmul.mubr.bf16.gmra.mrb[68].mxu1 %v4561_v25 }
 0x13c   :  { %862 = vmatprep.mubr.bf16.mxu1 %v4346_v0 }
 0x143   :  { %863 = vmatmul.mubr.bf16.gmra.mrb[72].mxu1 %v4569_v36 }
 0x144   :  { %872 = vmatprep.mubr.bf16.mxu1 %v4346_v0  ;;  %v4630_v0 = vrot.slane %v4619_v19, %v227_v23 }
 0x14b   :  { %873 = vmatmul.mubr.bf16.gmra.mrb[76].mxu1 %v4577_v45 }
 0x186   :  { %v531_v25 = vpop.f32.mrb[0].mxu0  ;;  %v651_v26 = vpop.f32.mrb[0].mxu1 }
 0x187   :  { %v532_v27 = vadd.f32 %v531_v25, %v4625_v24  ;;  %v533_v28 = vpop.f32.mrb[1].mxu0  ;;  %v652_v29 = vadd.f32 %v651_v26, %v4625_v24  ;;  %v653_v30 = vpop.f32.mrb[1].mxu1 }
 0x188   :  { %v534_v31 = vadd.f32 %v533_v28, %v4630_v0  ;;  %v535_v32 = vpop.f32.mrb[2].mxu0  ;;  %v654_v33 = vadd.f32 %v653_v30, %v4630_v0  ;;  %v655_v34 = vpop.f32.mrb[2].mxu1 }
 0x189   :  { %v536_v35 = vadd.f32 %v535_v32, %v4625_v24  ;;  %v537_v36 = vpop.f32.mrb[3].mxu0  ;;  %v979_v37 = vmax.f32 %v652_v29, 0.0  ;;  %v656_v38 = vadd.f32 %v655_v34, %v4625_v24  ;;  %v657_v39 = vpop.f32.mrb[3].mxu1  ;;  %v883_v43 = vmax.f32 %v532_v27, 0.0  ;;  %v4024_v27 = vld [vmem:[#allocation8 + $0x120] ss:$8 sps:$4 sm:$0xff]  }
 0x18a   :  { %v538_v40 = vadd.f32 %v537_v36, %v4630_v0  ;;  %v980_v41 = vmax.f32 %v654_v33, 0.0  ;;  %v658_v42 = vadd.f32 %v657_v39, %v4630_v0  ;;  %v884_v46 = vmax.f32 %v534_v31, 0.0  ;;  %v4029_v32 = vld [vmem:[#allocation8 + $0x134] ss:$8 sps:$4 sm:$0xff]  }
 0x18b   :  { %v887_v44 = vmax.f32 %v536_v35, 0.0  ;;  %v983_v45 = vmax.f32 %v656_v38, 0.0 }
 0x18c   :  { %v888_v47 = vmax.f32 %v538_v40, 0.0  ;;  %v984_v48 = vmax.f32 %v658_v42, 0.0 }
 0x18d   :  { %v1011_v49 = vpack.c.bf16 %v887_v44, %v883_v43  ;;  %v4640_v50 = vpack.c.bf16 %v983_v45, %v979_v37  ;;  %v4027_v45 = vld [vmem:[#allocation8 + $0x130] ss:$8 sps:$4 sm:$0xff]  }
 0x18e   :  { %v1012_v51 = vpack.c.bf16 %v888_v47, %v884_v46  ;;  %v541_v52 = vpop.f32.mrb[4].mxu0  ;;  %v4642_v54 = vpack.c.bf16 %v984_v48, %v980_v41  ;;  %v661_v55 = vpop.f32.mrb[4].mxu1 }
 0x18f   :  { %v542_v56 = vadd.f32 %v541_v52, %v4625_v24  ;;  %v543_v57 = vpop.f32.mrb[5].mxu0  ;;  %v662_v59 = vadd.f32 %v661_v55, %v4625_v24  ;;  %v663_v60 = vpop.f32.mrb[5].mxu1 }
 0x190   :  { %v544_v61 = vadd.f32 %v543_v57, %v4630_v0  ;;  %v545_v62 = vpop.f32.mrb[6].mxu0  ;;  %1503 = vmatprep.mubr.bf16.mxu0 %v1012_v51  ;;  %v664_v63 = vadd.f32 %v663_v60, %v4630_v0  ;;  %v665_v1 = vpop.f32.mrb[6].mxu1  ;;  %v4032_v51 = vld [vmem:[#allocation8 + $0x144] ss:$8 sps:$4 sm:$0xff]  }
 0x191   :  { %v546_v2 = vadd.f32 %v545_v62, %v4625_v24  ;;  %v547_v3 = vpop.f32.mrb[7].mxu0  ;;  %1504 = vmatmul.mubr.bf16.vlgmr.msra.gmra.mrb[48].mxu0 %v1011_v49  ;;  %v987_v4 = vmax.f32 %v662_v59, 0.0  ;;  %v666_v5 = vadd.f32 %v665_v1, %v4625_v24  ;;  %v667_v6 = vpop.f32.mrb[7].mxu1  ;;  %v891_v11 = vmax.f32 %v542_v56, 0.0 }
 0x192   :  { %v548_v7 = vadd.f32 %v547_v3, %v4630_v0  ;;  %1665 = vmatpush1.bf16.msra.mxu0 %v4018_v53  ;;  %v988_v9 = vmax.f32 %v664_v63, 0.0  ;;  %v668_v10 = vadd.f32 %v667_v6, %v4630_v0  ;;  %v892_v15 = vmax.f32 %v544_v61, 0.0  ;;  %v4030_v61 = vld [vmem:[#allocation8 + $0x140] ss:$8 sps:$4 sm:$0xff]   ;;  %v4035_v3 = vld [vmem:[#allocation8 + $0x154] ss:$8 sps:$4 sm:$0xff]  }
 0x193   :  { %v895_v12 = vmax.f32 %v546_v2, 0.0  ;;  %1666 = vmatprep.subr.bf16.mxu0 %v4023_v58  ;;  %v991_v14 = vmax.f32 %v666_v5, 0.0  ;;  %v231_v6 = vsub.s32 2, %v4613_v21 }
 0x194   :  { %v896_v16 = vmax.f32 %v548_v7, 0.0  ;;  %v992_v17 = vmax.f32 %v668_v10, 0.0 }
 0x195   :  { %v1015_v18 = vpack.c.bf16 %v895_v12, %v891_v11  ;;  %v4652_v20 = vpack.c.bf16 %v991_v14, %v987_v4  ;;  %v235_v11 = vsub.s32 3, %v4613_v21 }
 0x196   :  { %v1016_v25 = vpack.c.bf16 %v896_v16, %v892_v15  ;;  %v551_v26 = vpop.f32.mrb[8].mxu0  ;;  %1667 = vmatpush1.bf16.msra.mxu0 %v4021_v8  ;;  %v4654_v28 = vpack.c.bf16 %v992_v17, %v988_v9  ;;  %v671_v29 = vpop.f32.mrb[8].mxu1 }
 0x197   :  { %v552_v30 = vadd.f32 %v551_v26, %v4625_v24  ;;  %v553_v31 = vpop.f32.mrb[9].mxu0  ;;  %1668 = vmatprep.subr.bf16.mxu0 %v4026_v13  ;;  %v672_v33 = vadd.f32 %v671_v29, %v4625_v24  ;;  %v673_v34 = vpop.f32.mrb[9].mxu1 }
 0x198   :  { %v554_v35 = vadd.f32 %v553_v31, %v4630_v0  ;;  %v555_v36 = vpop.f32.mrb[10].mxu0  ;;  %1513 = vmatprep.mubr.bf16.mxu0 %v1016_v25  ;;  %v674_v37 = vadd.f32 %v673_v34, %v4630_v0  ;;  %v675_v38 = vpop.f32.mrb[10].mxu1 }
 0x199   :  { %v556_v39 = vadd.f32 %v555_v36, %v4625_v24  ;;  %v557_v40 = vpop.f32.mrb[11].mxu0  ;;  %1514 = vmatmul.mubr.bf16.gmra.mrb[52].mxu0 %v1015_v18  ;;  %v995_v41 = vmax.f32 %v672_v33, 0.0  ;;  %v676_v42 = vadd.f32 %v675_v38, %v4625_v24  ;;  %v677_v43 = vpop.f32.mrb[11].mxu1  ;;  %v899_v48 = vmax.f32 %v552_v30, 0.0  ;;  %v4033_v18 = vld [vmem:[#allocation8 + $0x150] ss:$8 sps:$4 sm:$0xff]  }
 0x19a   :  { %v558_v44 = vadd.f32 %v557_v40, %v4630_v0  ;;  %1669 = vmatpush1.bf16.msra.mxu0 %v4024_v27  ;;  %v996_v46 = vmax.f32 %v674_v37, 0.0  ;;  %v678_v47 = vadd.f32 %v677_v43, %v4630_v0  ;;  %v900_v53 = vmax.f32 %v554_v35, 0.0  ;;  %v4038_v30 = vld [vmem:[#allocation8 + $0x164] ss:$8 sps:$4 sm:$0xff]  }
 0x19b   :  { %v903_v49 = vmax.f32 %v556_v39, 0.0  ;;  %1670 = vmatprep.subr.bf16.mxu0 %v4029_v32  ;;  %v999_v52 = vmax.f32 %v676_v42, 0.0  ;;  %v4679_v32 = vrot.slane %v4619_v19, %v231_v6  ;;  %v4682_v36 = vrot.slane %v4619_v19, %v235_v11 }
 0x19c   :  { %v904_v55 = vmax.f32 %v558_v44, 0.0  ;;  %v1000_v56 = vmax.f32 %v678_v47, 0.0 }
 0x19d   :  { %v1019_v57 = vpack.c.bf16 %v903_v49, %v899_v48  ;;  %v4664_v58 = vpack.c.bf16 %v999_v52, %v995_v41  ;;  %v4036_v41 = vld [vmem:[#allocation8 + $0x160] ss:$8 sps:$4 sm:$0xff]  }
 0x19e   :  { %v1020_v59 = vpack.c.bf16 %v904_v55, %v900_v53  ;;  %v561_v60 = vpop.f32.mrb[12].mxu0  ;;  %1671 = vmatpush1.bf16.msra.mxu0 %v4027_v45  ;;  %v4666_v62 = vpack.c.bf16 %v1000_v56, %v996_v46  ;;  %v681_v63 = vpop.f32.mrb[12].mxu1  ;;  %v4041_v46 = vld [vmem:[#allocation8 + $0x174] ss:$8 sps:$4 sm:$0xff]  }
 0x19f   :  { %v562_v1 = vadd.f32 %v561_v60, %v4625_v24  ;;  %v563_v2 = vpop.f32.mrb[13].mxu0  ;;  %1672 = vmatprep.subr.bf16.mxu0 %v4032_v51  ;;  %v682_v4 = vadd.f32 %v681_v63, %v4625_v24  ;;  %v683_v5 = vpop.f32.mrb[13].mxu1 }
 0x1a0   :  { %v564_v7 = vadd.f32 %v563_v2, %v4630_v0  ;;  %v565_v8 = vpop.f32.mrb[14].mxu0  ;;  %1523 = vmatprep.mubr.bf16.mxu0 %v1020_v59  ;;  %v684_v9 = vadd.f32 %v683_v5, %v4630_v0  ;;  %v685_v10 = vpop.f32.mrb[14].mxu1  ;;  %v4066_v2 = vld [vmem:[#allocation11] sm:$0xff]  }
 0x1a1   :  { %v566_v12 = vadd.f32 %v565_v8, %v4625_v24  ;;  %v567_v13 = vpop.f32.mrb[15].mxu0  ;;  %1524 = vmatmul.mubr.bf16.gmra.mrb[56].mxu0 %v1019_v57  ;;  %v1003_v14 = vmax.f32 %v682_v4, 0.0  ;;  %v686_v15 = vadd.f32 %v685_v10, %v4625_v24  ;;  %v687_v16 = vpop.f32.mrb[15].mxu1  ;;  %v907_v27 = vmax.f32 %v562_v1, 0.0  ;;  %v4044_v5 = vld [vmem:[#allocation8 + $0x184] ss:$8 sps:$4 sm:$0xff]   ;;  %3602 = vmatprep.subr.bf16.mxu1 %v4066_v2 }
 0x1a2   :  { %v568_v17 = vadd.f32 %v567_v13, %v4630_v0  ;;  %1673 = vmatpush1.bf16.msra.mxu0 %v4030_v61  ;;  %v1004_v25 = vmax.f32 %v684_v9, 0.0  ;;  %v688_v26 = vadd.f32 %v687_v16, %v4630_v0  ;;  %v908_v33 = vmax.f32 %v564_v7, 0.0  ;;  %v4039_v61 = vld [vmem:[#allocation8 + $0x170] ss:$8 sps:$4 sm:$0xff]   ;;  %3603 = vmatpush3.bf16.msra.mxu1 %v4066_v2  ;;  %v4053_v2 = vld [vmem:[#allocation8 + $0x1b4] ss:$8 sps:$4 sm:$0xff]  }
 0x1a3   :  { %v911_v29 = vmax.f32 %v566_v12, 0.0  ;;  %1674 = vmatprep.subr.bf16.mxu0 %v4035_v3  ;;  %v1007_v31 = vmax.f32 %v686_v15, 0.0 }
 0x1a4   :  { %v912_v34 = vmax.f32 %v568_v17, 0.0  ;;  %v1008_v35 = vmax.f32 %v688_v26, 0.0 }
 0x1a5   :  { %v1023_v37 = vpack.c.bf16 %v911_v29, %v907_v27  ;;  %v4684_v38 = vpack.c.bf16 %v1007_v31, %v1003_v14  ;;  %v4042_v14 = vld [vmem:[#allocation8 + $0x180] ss:$8 sps:$4 sm:$0xff]  }
 0x1a6   :  { %v1024_v39 = vpack.c.bf16 %v912_v34, %v908_v33  ;;  %v571_v40 = vpop.f32.mrb[16].mxu0  ;;  %1675 = vmatpush1.bf16.msra.mxu0 %v4033_v18  ;;  %v4686_v42 = vpack.c.bf16 %v1008_v35, %v1004_v25  ;;  %v724_v43 = vpop.f32.mrb[16].mxu1  ;;  %v4047_v25 = vld [vmem:[#allocation8 + $0x194] ss:$8 sps:$4 sm:$0xff]  }
 0x1a7   :  { %v572_v44 = vadd.f32 %v571_v40, %v4625_v24  ;;  %v573_v45 = vpop.f32.mrb[17].mxu0  ;;  %1676 = vmatprep.subr.bf16.mxu0 %v4038_v30  ;;  %v725_v47 = vadd.f32 %v724_v43, %v4679_v32  ;;  %v726_v48 = vpop.f32.mrb[17].mxu1  ;;  %v4045_v43 = vld [vmem:[#allocation8 + $0x190] ss:$8 sps:$4 sm:$0xff]  }
 0x1a8   :  { %v574_v19 = vadd.f32 %v573_v45, %v4630_v0  ;;  %v575_v49 = vpop.f32.mrb[18].mxu0  ;;  %1533 = vmatprep.mubr.bf16.mxu0 %v1024_v39  ;;  %v727_v51 = vadd.f32 %v726_v48, %v4682_v36  ;;  %v728_v52 = vpop.f32.mrb[18].mxu1  ;;  %v4050_v48 = vld [vmem:[#allocation8 + $0x1a4] ss:$8 sps:$4 sm:$0xff]  }
 0x1a9   :  { %v576_v53 = vadd.f32 %v575_v49, %v4625_v24  ;;  %v577_v55 = vpop.f32.mrb[19].mxu0  ;;  %1534 = vmatmul.mubr.bf16.gmra.mrb[60].mxu0 %v1023_v37  ;;  %v885_v56 = vmax.f32 %v725_v47, 0.0  ;;  %v729_v57 = vadd.f32 %v728_v52, %v4679_v32  ;;  %v730_v59 = vpop.f32.mrb[19].mxu1  ;;  %v915_v3 = vmax.f32 %v572_v44, 0.0 }
 0x1aa   :  { %v578_v60 = vadd.f32 %v577_v55, %v4630_v0  ;;  %1677 = vmatpush1.bf16.msra.mxu0 %v4036_v41  ;;  %v886_v63 = vmax.f32 %v727_v51, 0.0  ;;  %v731_v1 = vadd.f32 %v730_v59, %v4682_v36  ;;  %v916_v7 = vmax.f32 %v574_v19, 0.0  ;;  %v4048_v59 = vld [vmem:[#allocation8 + $0x1a0] ss:$8 sps:$4 sm:$0xff]  }
 0x1ab   :  { %v919_v4 = vmax.f32 %v576_v53, 0.0  ;;  %1678 = vmatprep.subr.bf16.mxu0 %v4041_v46  ;;  %v889_v6 = vmax.f32 %v729_v57, 0.0 }
 0x1ac   :  { %v920_v8 = vmax.f32 %v578_v60, 0.0  ;;  %v890_v9 = vmax.f32 %v731_v1, 0.0 }
 0x1ad   :  { %v1027_v10 = vpack.c.bf16 %v919_v4, %v915_v3  ;;  %v4696_v11 = vpack.c.bf16 %v889_v6, %v885_v56 }
 0x1ae   :  { %v1028_v12 = vpack.c.bf16 %v920_v8, %v916_v7  ;;  %v581_v13 = vpop.f32.mrb[20].mxu0  ;;  %1679 = vmatpush1.bf16.msra.mxu0 %v4039_v61  ;;  %v4698_v15 = vpack.c.bf16 %v890_v9, %v886_v63  ;;  %v734_v16 = vpop.f32.mrb[20].mxu1 }
 0x1af   :  { %v582_v17 = vadd.f32 %v581_v13, %v4625_v24  ;;  %v583_v18 = vpop.f32.mrb[21].mxu0  ;;  %1680 = vmatprep.subr.bf16.mxu0 %v4044_v5  ;;  %v735_v26 = vadd.f32 %v734_v16, %v4679_v32  ;;  %v736_v27 = vpop.f32.mrb[21].mxu1 }
 0x1b0   :  { %v584_v29 = vadd.f32 %v583_v18, %v4630_v0  ;;  %v585_v30 = vpop.f32.mrb[22].mxu0  ;;  %1543 = vmatprep.mubr.bf16.mxu0 %v1028_v12  ;;  %v737_v31 = vadd.f32 %v736_v27, %v4682_v36  ;;  %v738_v33 = vpop.f32.mrb[22].mxu1 }
 0x1b1   :  { %v586_v34 = vadd.f32 %v585_v30, %v4625_v24  ;;  %v587_v35 = vpop.f32.mrb[23].mxu0  ;;  %1544 = vmatmul.mubr.bf16.gmra.mrb[64].mxu0 %v1027_v10  ;;  %v893_v37 = vmax.f32 %v735_v26, 0.0  ;;  %v739_v39 = vadd.f32 %v738_v33, %v4679_v32  ;;  %v740_v40 = vpop.f32.mrb[23].mxu1  ;;  %v923_v46 = vmax.f32 %v582_v17, 0.0  ;;  %v4051_v17 = vld [vmem:[#allocation8 + $0x1b0] ss:$8 sps:$4 sm:$0xff]  }
 0x1b2   :  { %v588_v41 = vadd.f32 %v587_v35, %v4630_v0  ;;  %1681 = vmatpush1.bf16.msra.mxu0 %v4042_v14  ;;  %v894_v44 = vmax.f32 %v737_v31, 0.0  ;;  %v741_v45 = vadd.f32 %v740_v40, %v4682_v36  ;;  %v924_v49 = vmax.f32 %v584_v29, 0.0  ;;  %v4067_v26 = vld [vmem:[#allocation11 + $0x8] sm:$0xff]  }
 0x1b3   :  { %v927_v47 = vmax.f32 %v586_v34, 0.0  ;;  %1682 = vmatprep.subr.bf16.mxu0 %v4047_v25  ;;  %v897_v19 = vmax.f32 %v739_v39, 0.0  ;;  %v4056_v30 = vld [vmem:[#allocation8 + $0x1c4] ss:$8 sps:$4 sm:$0xff]   ;;  %3604 = vmatprep.subr.bf16.mxu1 %v4067_v26 }
 0x1b4   :  { %v928_v51 = vmax.f32 %v588_v41, 0.0  ;;  %v898_v52 = vmax.f32 %v741_v45, 0.0  ;;  %3605 = vmatpush3.bf16.msra.mxu1 %v4067_v26 }
 0x1b5   :  { %v1031_v53 = vpack.c.bf16 %v927_v47, %v923_v46  ;;  %v4708_v55 = vpack.c.bf16 %v897_v19, %v893_v37 }
 0x1b6   :  { %v1032_v56 = vpack.c.bf16 %v928_v51, %v924_v49  ;;  %v591_v57 = vpop.f32.mrb[24].mxu0  ;;  %1683 = vmatpush1.bf16.msra.mxu0 %v4045_v43  ;;  %v4710_v60 = vpack.c.bf16 %v898_v52, %v894_v44  ;;  %v744_v61 = vpop.f32.mrb[24].mxu1  ;;  %v4054_v43 = vld [vmem:[#allocation8 + $0x1c0] ss:$8 sps:$4 sm:$0xff]  }
 0x1b7   :  { %v592_v63 = vadd.f32 %v591_v57, %v4625_v24  ;;  %v593_v1 = vpop.f32.mrb[25].mxu0  ;;  %1684 = vmatprep.subr.bf16.mxu0 %v4050_v48  ;;  %v745_v3 = vadd.f32 %v744_v61, %v4679_v32  ;;  %v746_v4 = vpop.f32.mrb[25].mxu1  ;;  %v4059_v48 = vld [vmem:[#allocation8 + $0x1d4] ss:$8 sps:$4 sm:$0xff]  }
 0x1b8   :  { %v594_v5 = vadd.f32 %v593_v1, %v4630_v0  ;;  %v595_v6 = vpop.f32.mrb[26].mxu0  ;;  %1553 = vmatprep.mubr.bf16.mxu0 %v1032_v56  ;;  %v747_v7 = vadd.f32 %v746_v4, %v4682_v36  ;;  %v748_v8 = vpop.f32.mrb[26].mxu1 }
 0x1b9   :  { %v596_v9 = vadd.f32 %v595_v6, %v4625_v24  ;;  %v597_v10 = vpop.f32.mrb[27].mxu0  ;;  %1554 = vmatmul.mubr.bf16.gmra.mrb[68].mxu0 %v1031_v53  ;;  %v901_v12 = vmax.f32 %v745_v3, 0.0  ;;  %v749_v13 = vadd.f32 %v748_v8, %v4679_v32  ;;  %v750_v14 = vpop.f32.mrb[27].mxu1  ;;  %v931_v27 = vmax.f32 %v592_v63, 0.0  ;;  %v4057_v3 = vld [vmem:[#allocation8 + $0x1d0] ss:$8 sps:$4 sm:$0xff]  }
 0x1ba   :  { %v598_v16 = vadd.f32 %v597_v10, %v4630_v0  ;;  %1685 = vmatpush1.bf16.msra.mxu0 %v4048_v59  ;;  %v902_v18 = vmax.f32 %v747_v7, 0.0  ;;  %v751_v25 = vadd.f32 %v750_v14, %v4682_v36  ;;  %v932_v33 = vmax.f32 %v594_v5, 0.0  ;;  %v4062_v8 = vld [vmem:[#allocation8 + $0x1e4] ss:$8 sps:$4 sm:$0xff]  }
 0x1bb   :  { %v935_v29 = vmax.f32 %v596_v9, 0.0  ;;  %1686 = vmatprep.subr.bf16.mxu0 %v4053_v2  ;;  %v905_v31 = vmax.f32 %v749_v13, 0.0 }
 0x1bc   :  { %v936_v34 = vmax.f32 %v598_v16, 0.0  ;;  %v906_v35 = vmax.f32 %v751_v25, 0.0  ;;  %v4060_v25 = vld [vmem:[#allocation8 + $0x1e0] ss:$8 sps:$4 sm:$0xff]  }
 0x1bd   :  { %v1035_v37 = vpack.c.bf16 %v935_v29, %v931_v27  ;;  %v4720_v39 = vpack.c.bf16 %v905_v31, %v901_v12  ;;  %v4065_v31 = vld [vmem:[#allocation8 + $0x1f4] ss:$8 sps:$4 sm:$0xff]  }
 0x1be   :  { %v1036_v40 = vpack.c.bf16 %v936_v34, %v932_v33  ;;  %v601_v41 = vpop.f32.mrb[28].mxu0  ;;  %1687 = vmatpush1.bf16.msra.mxu0 %v4051_v17  ;;  %v4722_v44 = vpack.c.bf16 %v906_v35, %v902_v18  ;;  %v754_v45 = vpop.f32.mrb[28].mxu1 }
 0x1bf   :  { %v602_v46 = vadd.f32 %v601_v41, %v4625_v24  ;;  %v603_v47 = vpop.f32.mrb[29].mxu0  ;;  %1688 = vmatprep.subr.bf16.mxu0 %v4056_v30  ;;  %v755_v19 = vadd.f32 %v754_v45, %v4679_v32  ;;  %v756_v49 = vpop.f32.mrb[29].mxu1 }
 0x1c0   :  { %v604_v51 = vadd.f32 %v603_v47, %v4630_v0  ;;  %v605_v52 = vpop.f32.mrb[30].mxu0  ;;  %1563 = vmatprep.mubr.bf16.mxu0 %v1036_v40  ;;  %v757_v53 = vadd.f32 %v756_v49, %v4682_v36  ;;  %v758_v56 = vpop.f32.mrb[30].mxu1  ;;  %v4063_v49 = vld [vmem:[#allocation8 + $0x1f0] ss:$8 sps:$4 sm:$0xff]  }
 0x1c1   :  { %v606_v57 = vadd.f32 %v605_v52, %v4625_v24  ;;  %v607_v59 = vpop.f32.mrb[31].mxu0  ;;  %1564 = vmatmul.mubr.bf16.gmra.mrb[72].mxu0 %v1035_v37  ;;  %v909_v61 = vmax.f32 %v755_v19, 0.0  ;;  %v759_v63 = vadd.f32 %v758_v56, %v4679_v32  ;;  %v760_v1 = vpop.f32.mrb[31].mxu1  ;;  %v939_v6 = vmax.f32 %v602_v46, 0.0 }
 0x1c2   :  { %v608_v2 = vadd.f32 %v607_v59, %v4630_v0  ;;  %1689 = vmatpush1.bf16.msra.mxu0 %v4054_v43  ;;  %v910_v4 = vmax.f32 %v757_v53, 0.0  ;;  %v761_v5 = vadd.f32 %v760_v1, %v4682_v36  ;;  %v940_v10 = vmax.f32 %v604_v51, 0.0  ;;  %v4068_v53 = vld [vmem:[#allocation11 + $0x10] sm:$0xff]  }
 0x1c3   :  { %v943_v7 = vmax.f32 %v606_v57, 0.0  ;;  %1690 = vmatprep.subr.bf16.mxu0 %v4059_v48  ;;  %v913_v9 = vmax.f32 %v759_v63, 0.0  ;;  %3606 = vmatprep.subr.bf16.mxu1 %v4068_v53 }
 0x1c4   :  { %v944_v12 = vmax.f32 %v608_v2, 0.0  ;;  %v914_v13 = vmax.f32 %v761_v5, 0.0  ;;  %3607 = vmatpush3.bf16.msra.mxu1 %v4068_v53 }
 0x1c5   :  { %v1039_v14 = vpack.c.bf16 %v943_v7, %v939_v6  ;;  %v4732_v16 = vpack.c.bf16 %v913_v9, %v909_v61 }
 0x1c6   :  { %v1040_v17 = vpack.c.bf16 %v944_v12, %v940_v10  ;;  %v611_v18 = vpop.f32.mrb[32].mxu0  ;;  %1691 = vmatpush1.bf16.msra.mxu0 %v4057_v3  ;;  %v4734_v26 = vpack.c.bf16 %v914_v13, %v910_v4  ;;  %v764_v27 = vpop.f32.mrb[32].mxu1 }
 0x1c7   :  { %v612_v29 = vadd.f32 %v611_v18, %v4625_v24  ;;  %v613_v30 = vpop.f32.mrb[33].mxu0  ;;  %1692 = vmatprep.subr.bf16.mxu0 %v4062_v8  ;;  %v765_v33 = vadd.f32 %v764_v27, %v4679_v32  ;;  %v766_v34 = vpop.f32.mrb[33].mxu1 }
 0x1c8   :  { %v614_v35 = vadd.f32 %v613_v30, %v4630_v0  ;;  %v615_v37 = vpop.f32.mrb[34].mxu0  ;;  %1573 = vmatprep.mubr.bf16.mxu0 %v1040_v17  ;;  %v767_v40 = vadd.f32 %v766_v34, %v4682_v36  ;;  %v768_v41 = vpop.f32.mrb[34].mxu1 }
 0x1c9   :  { %v616_v43 = vadd.f32 %v615_v37, %v4625_v24  ;;  %v617_v45 = vpop.f32.mrb[35].mxu0  ;;  %1574 = vmatmul.mubr.bf16.gmra.mrb[76].mxu0 %v1039_v14  ;;  %v917_v46 = vmax.f32 %v765_v33, 0.0  ;;  %v769_v47 = vadd.f32 %v768_v41, %v4679_v32  ;;  %v770_v48 = vpop.f32.mrb[35].mxu1  ;;  %v947_v56 = vmax.f32 %v612_v29, 0.0 }
 0x1ca   :  { %v618_v19 = vadd.f32 %v617_v45, %v4630_v0  ;;  %1693 = vmatpush1.bf16.msra.mxu0 %v4060_v25  ;;  %v918_v51 = vmax.f32 %v767_v40, 0.0  ;;  %v771_v52 = vadd.f32 %v770_v48, %v4682_v36  ;;  %v948_v61 = vmax.f32 %v614_v35, 0.0 }
 0x1cb   :  { %v951_v57 = vmax.f32 %v616_v43, 0.0  ;;  %1694 = vmatprep.subr.bf16.mxu0 %v4065_v31  ;;  %v921_v59 = vmax.f32 %v769_v47, 0.0 }
 0x1cc   :  { %v952_v63 = vmax.f32 %v618_v19, 0.0  ;;  %v922_v1 = vmax.f32 %v771_v52, 0.0 }
 0x1cd   :  { %v1043_v2 = vpack.c.bf16 %v951_v57, %v947_v56  ;;  %v4744_v3 = vpack.c.bf16 %v921_v59, %v917_v46 }
 0x1ce   :  { %v1044_v4 = vpack.c.bf16 %v952_v63, %v948_v61  ;;  %v621_v5 = vpop.f32.mrb[36].mxu0  ;;  %1695 = vmatpush1.bf16.msra.mxu0 %v4063_v49  ;;  %v4746_v6 = vpack.c.bf16 %v922_v1, %v918_v51  ;;  %v774_v7 = vpop.f32.mrb[36].mxu1 }
 0x1cf   :  { %v622_v8 = vadd.f32 %v621_v5, %v4625_v24  ;;  %v623_v9 = vpop.f32.mrb[37].mxu0  ;;  %v775_v10 = vadd.f32 %v774_v7, %v4679_v32  ;;  %v776_v12 = vpop.f32.mrb[37].mxu1 }
 0x1d0   :  { %v624_v13 = vadd.f32 %v623_v9, %v4630_v0  ;;  %v625_v14 = vpop.f32.mrb[38].mxu0  ;;  %1583 = vmatprep.mubr.bf16.mxu0 %v1044_v4  ;;  %v777_v17 = vadd.f32 %v776_v12, %v4682_v36  ;;  %v778_v18 = vpop.f32.mrb[38].mxu1 }
 0x1d1   :  { %v626_v25 = vadd.f32 %v625_v14, %v4625_v24  ;;  %v627_v27 = vpop.f32.mrb[39].mxu0  ;;  %1584 = vmatmul.mubr.bf16.gmra.mrb[80].mxu0 %v1043_v2  ;;  %v925_v29 = vmax.f32 %v775_v10, 0.0  ;;  %v779_v30 = vadd.f32 %v778_v18, %v4679_v32  ;;  %v780_v31 = vpop.f32.mrb[39].mxu1  ;;  %v955_v37 = vmax.f32 %v622_v8, 0.0  ;;  %v4069_v14 = vld [vmem:[#allocation11 + $0x18] sm:$0xff]  }
 0x1d2   :  { %v628_v33 = vadd.f32 %v627_v27, %v4630_v0  ;;  %v926_v34 = vmax.f32 %v777_v17, 0.0  ;;  %v781_v35 = vadd.f32 %v780_v31, %v4682_v36  ;;  %v956_v43 = vmax.f32 %v624_v13, 0.0  ;;  %3608 = vmatprep.subr.bf16.mxu1 %v4069_v14 }
 0x1d3   :  { %v959_v40 = vmax.f32 %v626_v25, 0.0  ;;  %v929_v41 = vmax.f32 %v779_v30, 0.0  ;;  %3609 = vmatpush3.bf16.msra.mxu1 %v4069_v14 }
 0x1d4   :  { %v960_v45 = vmax.f32 %v628_v33, 0.0  ;;  %v930_v46 = vmax.f32 %v781_v35, 0.0 }
 0x1d5   :  { %v1047_v47 = vpack.c.bf16 %v959_v40, %v955_v37  ;;  %v4756_v48 = vpack.c.bf16 %v929_v41, %v925_v29 }
 0x1d6   :  { %v1048_v19 = vpack.c.bf16 %v960_v45, %v956_v43  ;;  %v631_v49 = vpop.f32.mrb[40].mxu0  ;;  %v4758_v51 = vpack.c.bf16 %v930_v46, %v926_v34  ;;  %v784_v52 = vpop.f32.mrb[40].mxu1 }
 0x1d7   :  { %v632_v53 = vadd.f32 %v631_v49, %v4625_v24  ;;  %v633_v56 = vpop.f32.mrb[41].mxu0  ;;  %v785_v57 = vadd.f32 %v784_v52, %v4679_v32  ;;  %v786_v59 = vpop.f32.mrb[41].mxu1 }
 0x1d8   :  { %v634_v61 = vadd.f32 %v633_v56, %v4630_v0  ;;  %v635_v63 = vpop.f32.mrb[42].mxu0  ;;  %1593 = vmatprep.mubr.bf16.mxu0 %v1048_v19  ;;  %v787_v1 = vadd.f32 %v786_v59, %v4682_v36  ;;  %v788_v2 = vpop.f32.mrb[42].mxu1 }
 0x1d9   :  { %v636_v4 = vadd.f32 %v635_v63, %v4625_v24  ;;  %v637_v5 = vpop.f32.mrb[43].mxu0  ;;  %1594 = vmatmul.mubr.bf16.gmra.mrb[84].mxu0 %v1047_v47  ;;  %v933_v7 = vmax.f32 %v785_v57, 0.0  ;;  %v789_v8 = vadd.f32 %v788_v2, %v4679_v32  ;;  %v790_v9 = vpop.f32.mrb[43].mxu1  ;;  %v963_v17 = vmax.f32 %v632_v53, 0.0 }
 0x1da   :  { %v638_v10 = vadd.f32 %v637_v5, %v4630_v0  ;;  %v934_v12 = vmax.f32 %v787_v1, 0.0  ;;  %v791_v13 = vadd.f32 %v790_v9, %v4682_v36  ;;  %v964_v27 = vmax.f32 %v634_v61, 0.0 }
 0x1db   :  { %v967_v18 = vmax.f32 %v636_v4, 0.0  ;;  %v937_v25 = vmax.f32 %v789_v8, 0.0 }
 0x1dc   :  { %v968_v29 = vmax.f32 %v638_v10, 0.0  ;;  %v938_v30 = vmax.f32 %v791_v13, 0.0 }
 0x1dd   :  { %v1051_v31 = vpack.c.bf16 %v967_v18, %v963_v17  ;;  %v4768_v33 = vpack.c.bf16 %v937_v25, %v933_v7 }
 0x1de   :  { %v1052_v34 = vpack.c.bf16 %v968_v29, %v964_v27  ;;  %v641_v35 = vpop.f32.mrb[44].mxu0  ;;  %v4770_v37 = vpack.c.bf16 %v938_v30, %v934_v12  ;;  %v794_v40 = vpop.f32.mrb[44].mxu1 }
 0x1df   :  { %v642_v41 = vadd.f32 %v641_v35, %v4625_v24  ;;  %v643_v43 = vpop.f32.mrb[45].mxu0  ;;  %v795_v45 = vadd.f32 %v794_v40, %v4679_v32  ;;  %v796_v46 = vpop.f32.mrb[45].mxu1  ;;  %v4070_v40 = vld [vmem:[#allocation11 + $0x20] sm:$0xff]  }
 0x1e0   :  { %v644_v47 = vadd.f32 %v643_v43, %v4630_v0  ;;  %v645_v19 = vpop.f32.mrb[46].mxu0  ;;  %1603 = vmatprep.mubr.bf16.mxu0 %v1052_v34  ;;  %v797_v49 = vadd.f32 %v796_v46, %v4682_v36  ;;  %v798_v52 = vpop.f32.mrb[46].mxu1  ;;  %3610 = vmatprep.subr.bf16.mxu1 %v4070_v40 }
 0x1e1   :  { %v646_v53 = vadd.f32 %v645_v19, %v4625_v24  ;;  %v647_v56 = vpop.f32.mrb[47].mxu0  ;;  %1604 = vmatmul.mubr.bf16.gmra.mrb[88].mxu0 %v1051_v31  ;;  %v941_v57 = vmax.f32 %v795_v45, 0.0  ;;  %v799_v59 = vadd.f32 %v798_v52, %v4679_v32  ;;  %v800_v61 = vpop.f32.mrb[47].mxu1  ;;  %v971_v4 = vmax.f32 %v642_v41, 0.0  ;;  %3611 = vmatpush3.bf16.msra.mxu1 %v4070_v40 }
 0x1e2   :  { %v648_v63 = vadd.f32 %v647_v56, %v4630_v0  ;;  %v942_v1 = vmax.f32 %v797_v49, 0.0  ;;  %v801_v2 = vadd.f32 %v800_v61, %v4682_v36  ;;  %v972_v8 = vmax.f32 %v644_v47, 0.0 }
 0x1e3   :  { %v975_v5 = vmax.f32 %v646_v53, 0.0  ;;  %v945_v7 = vmax.f32 %v799_v59, 0.0 }
 0x1e4   :  { %v976_v9 = vmax.f32 %v648_v63, 0.0  ;;  %v946_v10 = vmax.f32 %v801_v2, 0.0 }
 0x1e5   :  { %v1055_v12 = vpack.c.bf16 %v975_v5, %v971_v4  ;;  %v4780_v13 = vpack.c.bf16 %v945_v7, %v941_v57 }
 0x1e6   :  { %v1056_v24 = vpack.c.bf16 %v976_v9, %v972_v8  ;;  %v4782_v14 = vpack.c.bf16 %v946_v10, %v942_v1  ;;  %v804_v17 = vpop.f32.mrb[48].mxu1 }
 0x1e7   :  { %v805_v18 = vadd.f32 %v804_v17, %v4679_v32  ;;  %v806_v25 = vpop.f32.mrb[49].mxu1 }
 0x1e8   :  { %1613 = vmatprep.mubr.bf16.mxu0 %v1056_v24  ;;  %v807_v0 = vadd.f32 %v806_v25, %v4682_v36  ;;  %v808_v27 = vpop.f32.mrb[50].mxu1 }
 0x1e9   :  { %1614 = vmatmul.mubr.bf16.gmra.mrb[92].mxu0 %v1055_v12  ;;  %v949_v29 = vmax.f32 %v805_v18, 0.0  ;;  %v809_v30 = vadd.f32 %v808_v27, %v4679_v32  ;;  %v810_v31 = vpop.f32.mrb[51].mxu1  ;;  %v4071_v18 = vld [vmem:[#allocation11 + $0x28] sm:$0xff]  }
 0x1ea   :  { %1623 = vmatprep.mubr.bf16.mxu0 %v4642_v54  ;;  %v950_v34 = vmax.f32 %v807_v0, 0.0  ;;  %v811_v35 = vadd.f32 %v810_v31, %v4682_v36  ;;  %3612 = vmatprep.subr.bf16.mxu1 %v4071_v18 }
 0x1eb   :  { %v953_v41 = vmax.f32 %v809_v30, 0.0  ;;  %3613 = vmatpush3.bf16.msra.mxu1 %v4071_v18 }
 0x1ec   :  { %v954_v43 = vmax.f32 %v811_v35, 0.0 }
 0x1ed   :  { %v4789_v45 = vpack.c.bf16 %v953_v41, %v949_v29 }
 0x1ee   :  { %v4791_v46 = vpack.c.bf16 %v954_v43, %v950_v34  ;;  %v814_v47 = vpop.f32.mrb[52].mxu1 }
 0x1ef   :  { %v815_v19 = vadd.f32 %v814_v47, %v4679_v32  ;;  %v816_v49 = vpop.f32.mrb[53].mxu1 }
 0x1f0   :  { %v817_v52 = vadd.f32 %v816_v49, %v4682_v36  ;;  %v818_v53 = vpop.f32.mrb[54].mxu1 }
 0x1f1   :  { %1624 = vmatmul.mubr.bf16.gmra.mrb[96].mxu0 %v4640_v50  ;;  %v957_v54 = vmax.f32 %v815_v19, 0.0  ;;  %v819_v56 = vadd.f32 %v818_v53, %v4679_v32  ;;  %v820_v57 = vpop.f32.mrb[55].mxu1 }
 0x1f2   :  { %1633 = vmatprep.mubr.bf16.mxu0 %v4654_v28  ;;  %v958_v59 = vmax.f32 %v817_v52, 0.0  ;;  %v821_v61 = vadd.f32 %v820_v57, %v4682_v36 }
 0x1f3   :  { %v961_v63 = vmax.f32 %v819_v56, 0.0 }
 0x1f4   :  { %v962_v1 = vmax.f32 %v821_v61, 0.0 }
 0x1f5   :  { %v4799_v2 = vpack.c.bf16 %v961_v63, %v957_v54 }
 0x1f6   :  { %v4801_v4 = vpack.c.bf16 %v962_v1, %v958_v59  ;;  %v824_v5 = vpop.f32.mrb[56].mxu1  ;;  %v4072_v1 = vld [vmem:[#allocation11 + $0x30] sm:$0xff]  }
 0x1f7   :  { %v825_v7 = vadd.f32 %v824_v5, %v4679_v32  ;;  %v826_v8 = vpop.f32.mrb[57].mxu1  ;;  %v4073_v5 = vld [vmem:[#allocation11 + $0x38] sm:$0xff]   ;;  %3614 = vmatprep.subr.bf16.mxu1 %v4072_v1 }
 0x1f8   :  { %v827_v50 = vadd.f32 %v826_v8, %v4682_v36  ;;  %v828_v9 = vpop.f32.mrb[58].mxu1  ;;  %3615 = vmatpush3.bf16.msra.mxu1 %v4072_v1 }
 0x1f9   :  { %1634 = vmatmul.mubr.bf16.gmra.mrb[100].mxu0 %v4652_v20  ;;  %v965_v10 = vmax.f32 %v825_v7, 0.0  ;;  %v829_v28 = vadd.f32 %v828_v9, %v4679_v32  ;;  %v830_v12 = vpop.f32.mrb[59].mxu1  ;;  %v4074_v7 = vld [vmem:[#allocation5] sm:$0xff]   ;;  %3616 = vmatprep.subr.bf16.mxu1 %v4073_v5 }
 0x1fa   :  { %1643 = vmatprep.mubr.bf16.mxu0 %v4666_v62  ;;  %v966_v24 = vmax.f32 %v827_v50, 0.0  ;;  %v831_v17 = vadd.f32 %v830_v12, %v4682_v36  ;;  %3618 = vmatprep.mubr.bf16.mxu1 %v4074_v7 }
 0x1fb   :  { %v969_v25 = vmax.f32 %v829_v28, 0.0 }
 0x1fc   :  { %v970_v0 = vmax.f32 %v831_v17, 0.0  ;;  %3617 = vmatpush3.bf16.msra.mxu1 %v4073_v5 }
 0x1fd   :  { %v4809_v27 = vpack.c.bf16 %v969_v25, %v965_v10  ;;  %v4075_v25 = vld [vmem:[#allocation5 + $0x8] sm:$0xff]  }
 0x1fe   :  { %v4811_v29 = vpack.c.bf16 %v970_v0, %v966_v24  ;;  %v834_v30 = vpop.f32.mrb[60].mxu1 }
 0x1ff   :  { %v835_v20 = vadd.f32 %v834_v30, %v4679_v32  ;;  %v836_v31 = vpop.f32.mrb[61].mxu1  ;;  %v4077_v30 = vld [vmem:[#allocation10] sm:$0xff]   ;;  %3619 = vmatmul.mubr.bf16.vlgmr.msra.gmra.mrb[80].mxu1 %v4075_v25 }
 0x200   :  { %v837_v34 = vadd.f32 %v836_v31, %v4682_v36  ;;  %v838_v35 = vpop.f32.mrb[62].mxu1 }
 0x201   :  { %1644 = vmatmul.mubr.bf16.gmra.mrb[104].mxu0 %v4664_v58  ;;  %v973_v62 = vmax.f32 %v835_v20, 0.0  ;;  %v839_v40 = vadd.f32 %v838_v35, %v4679_v32  ;;  %v840_v41 = vpop.f32.mrb[63].mxu1  ;;  %v4078_v20 = vld [vmem:[#allocation5 + $0x10] sm:$0xff]  }
 0x202   :  { %1653 = vmatprep.mubr.bf16.mxu0 %v4686_v42  ;;  %v974_v43 = vmax.f32 %v837_v34, 0.0  ;;  %v841_v47 = vadd.f32 %v840_v41, %v4682_v36  ;;  %3622 = vmatprep.mubr.bf16.mxu1 %v4078_v20 }
 0x203   :  { %v977_v19 = vmax.f32 %v839_v40, 0.0 }
 0x204   :  { %v978_v49 = vmax.f32 %v841_v47, 0.0 }
 0x205   :  { %v4819_v52 = vpack.c.bf16 %v977_v19, %v973_v62  ;;  %v4080_v62 = vld [vmem:[#allocation10 + $0x48] sm:$0xff]  }
 0x206   :  { %v4821_v53 = vpack.c.bf16 %v978_v49, %v974_v43  ;;  %v844_v54 = vpop.f32.mrb[64].mxu1  ;;  %v4081_v19 = vld [vmem:[#allocation10 + $0x8] sm:$0xff]  }
 0x207   :  { %v845_v56 = vadd.f32 %v844_v54, %v4679_v32  ;;  %v846_v57 = vpop.f32.mrb[65].mxu1 }
 0x208   :  { %v847_v58 = vadd.f32 %v846_v57, %v4682_v36  ;;  %v848_v59 = vpop.f32.mrb[66].mxu1 }
 0x209   :  { %1654 = vmatmul.mubr.bf16.gmra.mrb[108].mxu0 %v4684_v38  ;;  %v981_v61 = vmax.f32 %v845_v56, 0.0  ;;  %v849_v42 = vadd.f32 %v848_v59, %v4679_v32  ;;  %v850_v63 = vpop.f32.mrb[67].mxu1  ;;  %v4076_v38 = vld [vmem:[#allocation10 + $0x40] sm:$0xff]  }
 0x20a   :  { %1696 = vmatprep.mubr.bf16.mxu0 %v4698_v15  ;;  %v982_v8 = vmax.f32 %v847_v58, 0.0  ;;  %v851_v50 = vadd.f32 %v850_v63, %v4682_v36  ;;  %3442 = vmatprep.subr.bf16.mxu1 %v4076_v38  ;;  %v4085_v63 = vld [vmem:[#allocation10 + $0x10] sm:$0xff]  }
 0x20b   :  { %v985_v9 = vmax.f32 %v849_v42, 0.0  ;;  %3443 = vmatpush3.bf16.msra.mxu1 %v4077_v30  ;;  %v4082_v42 = vld [vmem:[#allocation5 + $0x20] sm:$0xff]  }
 0x20c   :  { %v986_v10 = vmax.f32 %v851_v50, 0.0  ;;  %3444 = vmatprep.subr.bf16.mxu1 %v4080_v62 }
 0x20d   :  { %v4829_v28 = vpack.c.bf16 %v985_v9, %v981_v61 }
 0x20e   :  { %v4831_v12 = vpack.c.bf16 %v986_v10, %v982_v8  ;;  %v854_v24 = vpop.f32.mrb[68].mxu1  ;;  %v4088_v8 = vld [vmem:[#allocation10 + $0x58] sm:$0xff]  }
 0x20f   :  { %v855_v17 = vadd.f32 %v854_v24, %v4679_v32  ;;  %v856_v18 = vpop.f32.mrb[69].mxu1  ;;  %3445 = vmatpush3.bf16.msra.mxu1 %v4081_v19  ;;  %v4089_v24 = vld [vmem:[#allocation10 + $0x18] sm:$0xff]  }
 0x210   :  { %v857_v15 = vadd.f32 %v856_v18, %v4682_v36  ;;  %v858_v0 = vpop.f32.mrb[70].mxu1 }
 0x211   :  { %1697 = vmatmul.mubr.bf16.vlgmr.msra.gmra.mrb[48].mxu0 %v4696_v11  ;;  %v989_v31 = vmax.f32 %v855_v17, 0.0  ;;  %v859_v34 = vadd.f32 %v858_v0, %v4679_v32  ;;  %v860_v35 = vpop.f32.mrb[71].mxu1  ;;  %v4084_v11 = vld [vmem:[#allocation10 + $0x50] sm:$0xff]  }
 0x212   :  { %1706 = vmatprep.mubr.bf16.mxu0 %v4710_v60  ;;  %v990_v40 = vmax.f32 %v857_v15, 0.0  ;;  %v861_v41 = vadd.f32 %v860_v35, %v4682_v36  ;;  %v4079_v60 = vld [vmem:[#allocation5 + $0x18] sm:$0xff]   ;;  %3446 = vmatprep.subr.bf16.mxu1 %v4084_v11 }
 0x213   :  { %v993_v43 = vmax.f32 %v859_v34, 0.0  ;;  %3623 = vmatmul.mubr.bf16.gmra.mrb[84].mxu1 %v4079_v60  ;;  %v4093_v34 = vld [vmem:[#allocation10 + $0x20] sm:$0xff]   ;;  %v4087_v60 = vld [vmem:[#allocation5 + $0x38] sm:$0xff]  }
 0x214   :  { %v994_v47 = vmax.f32 %v861_v41, 0.0  ;;  %3626 = vmatprep.mubr.bf16.mxu1 %v4082_v42  ;;  %3447 = vmatpush3.bf16.msra.mxu1 %v4085_v63  ;;  %v4096_v41 = vld [vmem:[#allocation10 + $0x68] sm:$0xff]   ;;  %v4098_v42 = vld [vmem:[#allocation5 + $0x60] sm:$0xff]  }
 0x215   :  { %v4839_v49 = vpack.c.bf16 %v993_v43, %v989_v31  ;;  %3448 = vmatprep.subr.bf16.mxu1 %v4088_v8  ;;  %v4086_v31 = vld [vmem:[#allocation5 + $0x30] sm:$0xff]  }
 0x216   :  { %v4841_v54 = vpack.c.bf16 %v994_v47, %v990_v40  ;;  %v864_v56 = vpop.f32.mrb[72].mxu1 }
 0x217   :  { %v865_v57 = vadd.f32 %v864_v56, %v4679_v32  ;;  %v866_v58 = vpop.f32.mrb[73].mxu1  ;;  %v4097_v56 = vld [vmem:[#allocation10 + $0x28] sm:$0xff]  }
 0x218   :  { %v867_v59 = vadd.f32 %v866_v58, %v4682_v36  ;;  %v868_v61 = vpop.f32.mrb[74].mxu1  ;;  %3449 = vmatpush3.bf16.msra.mxu1 %v4089_v24 }
 0x219   :  { %1707 = vmatmul.mubr.bf16.gmra.mrb[52].mxu0 %v4708_v55  ;;  %v997_v1 = vmax.f32 %v865_v57, 0.0  ;;  %v869_v5 = vadd.f32 %v868_v61, %v4679_v32  ;;  %v870_v7 = vpop.f32.mrb[75].mxu1  ;;  %v4092_v55 = vld [vmem:[#allocation10 + $0x60] sm:$0xff]   ;;  %v4095_v61 = vld [vmem:[#allocation5 + $0x58] sm:$0xff]  }
 0x21a   :  { %1716 = vmatprep.mubr.bf16.mxu0 %v4722_v44  ;;  %v998_v50 = vmax.f32 %v867_v59, 0.0  ;;  %v871_v9 = vadd.f32 %v870_v7, %v4682_v36  ;;  %v4083_v44 = vld [vmem:[#allocation5 + $0x28] sm:$0xff]   ;;  %3450 = vmatprep.subr.bf16.mxu1 %v4092_v55  ;;  %v4101_v59 = vld [vmem:[#allocation10 + $0x30] sm:$0xff]  }
 0x21b   :  { %v1001_v10 = vmax.f32 %v869_v5, 0.0  ;;  %3627 = vmatmul.mubr.bf16.gmra.mrb[88].mxu1 %v4083_v44 }
 0x21c   :  { %v1002_v38 = vmax.f32 %v871_v9, 0.0  ;;  %3630 = vmatprep.mubr.bf16.mxu1 %v4086_v31  ;;  %3451 = vmatpush3.bf16.msra.mxu1 %v4093_v34  ;;  %v4107_v9 = vld [vmem:[#allocation13 + $0x8] sm:$0xff]  }
 0x21d   :  { %v4849_v17 = vpack.c.bf16 %v1001_v10, %v997_v1  ;;  %3452 = vmatprep.subr.bf16.mxu1 %v4096_v41 }
 0x21e   :  { %v4851_v18 = vpack.c.bf16 %v1002_v38, %v998_v50  ;;  %v874_v25 = vpop.f32.mrb[76].mxu1 }
 0x21f   :  { %v875_v15 = vadd.f32 %v874_v25, %v4679_v32  ;;  %v876_v0 = vpop.f32.mrb[77].mxu1 }
 0x220   :  { %v877_v30 = vadd.f32 %v876_v0, %v4682_v36  ;;  %v878_v20 = vpop.f32.mrb[78].mxu1  ;;  %3453 = vmatpush3.bf16.msra.mxu1 %v4097_v56 }
 0x221   :  { %1717 = vmatmul.mubr.bf16.gmra.mrb[56].mxu0 %v4720_v39  ;;  %v1005_v35 = vmax.f32 %v875_v15, 0.0  ;;  %v879_v62 = vadd.f32 %v878_v20, %v4679_v32  ;;  %v880_v40 = vpop.f32.mrb[79].mxu1  ;;  %v4100_v39 = vld [vmem:[#allocation10 + $0x70] sm:$0xff]   ;;  %v4090_v32 = vld [vmem:[#allocation5 + $0x40] sm:$0xff]  }
 0x222   :  { %1726 = vmatprep.mubr.bf16.mxu0 %v4734_v26  ;;  %v1006_v43 = vmax.f32 %v877_v30, 0.0  ;;  %v881_v47 = vadd.f32 %v880_v40, %v4682_v36  ;;  %3454 = vmatprep.subr.bf16.mxu1 %v4100_v39  ;;  %v4091_v36 = vld [vmem:[#allocation5 + $0x48] sm:$0xff]   ;;  %v4094_v26 = vld [vmem:[#allocation5 + $0x50] sm:$0xff]  }
 0x223   :  { %v1009_v19 = vmax.f32 %v879_v62, 0.0  ;;  %3631 = vmatmul.mubr.bf16.gmra.mrb[92].mxu1 %v4087_v60  ;;  %v4108_v20 = vld [vmem:[#allocation13 + $0x10] sm:$0xff]  }
 0x224   :  { %v1010_v11 = vmax.f32 %v881_v47, 0.0  ;;  %3634 = vmatprep.mubr.bf16.mxu1 %v4090_v32  ;;  %3455 = vmatpush3.bf16.msra.mxu1 %v4101_v59  ;;  %v4109_v47 = vld [vmem:[#allocation13 + $0x18] sm:$0xff]  }
 0x225   :  { %v1073_v57 = vpack.c.bf16 %v1009_v19, %v1005_v35 }
 0x226   :  { %v1074_v58 = vpack.c.bf16 %v1010_v11, %v1006_v43 }
 0x229   :  { %1727 = vmatmul.mubr.bf16.gmra.mrb[60].mxu0 %v4732_v16  ;;  %v4099_v16 = vld [vmem:[#allocation5 + $0x68] sm:$0xff]  }
 0x22a   :  { %1736 = vmatprep.mubr.bf16.mxu0 %v4746_v6  ;;  %v4102_v6 = vld [vmem:[#allocation5 + $0x70] sm:$0xff]  }
 0x22b   :  { %3635 = vmatmul.mubr.bf16.gmra.mrb[96].mxu1 %v4091_v36 }
 0x22c   :  { %3638 = vmatprep.mubr.bf16.mxu1 %v4094_v26 }
 0x231   :  { %1737 = vmatmul.mubr.bf16.gmra.mrb[64].mxu0 %v4744_v3  ;;  %v4103_v3 = vld [vmem:[#allocation5 + $0x78] sm:$0xff]  }
 0x232   :  { %1746 = vmatprep.mubr.bf16.mxu0 %v4758_v51  ;;  %v4105_v51 = vld [vmem:[#allocation10 + $0x38] sm:$0xff]  }
 0x233   :  { %3639 = vmatmul.mubr.bf16.gmra.mrb[100].mxu1 %v4095_v61 }
 0x234   :  { %3642 = vmatprep.mubr.bf16.mxu1 %v4098_v42 }
 0x239   :  { %1747 = vmatmul.mubr.bf16.gmra.mrb[68].mxu0 %v4756_v48  ;;  %v4104_v48 = vld [vmem:[#allocation10 + $0x78] sm:$0xff]  }
 0x23a   :  { %1756 = vmatprep.mubr.bf16.mxu0 %v4770_v37  ;;  %3456 = vmatprep.subr.bf16.mxu1 %v4104_v48 }
 0x23b   :  { %3643 = vmatmul.mubr.bf16.gmra.mrb[104].mxu1 %v4099_v16 }
 0x23c   :  { %3646 = vmatprep.mubr.bf16.mxu1 %v4102_v6  ;;  %3457 = vmatpush3.bf16.msra.mxu1 %v4105_v51 }
 0x241   :  { %1757 = vmatmul.mubr.bf16.gmra.mrb[72].mxu0 %v4768_v33  ;;  %v1139_v33 = vld [vmem:[%s5184_s5] sm:$0x3] }
 0x242   :  { %1766 = vmatprep.mubr.bf16.mxu0 %v4782_v14  ;;  %v4887_v37 = vrot.slane %v1139_v33, %v223_v22 }
 0x243   :  { %3647 = vmatmul.mubr.bf16.gmra.mrb[108].mxu1 %v4103_v3 }
 0x249   :  { %1767 = vmatmul.mubr.bf16.gmra.mrb[76].mxu0 %v4780_v13  ;;  %v4891_v13 = vrot.slane %v1139_v33, %v227_v23 }
 0x24a   :  { %1776 = vmatprep.mubr.bf16.mxu0 %v4791_v46 }
 0x251   :  { %1777 = vmatmul.mubr.bf16.gmra.mrb[80].mxu0 %v4789_v45 }
 0x252   :  { %1786 = vmatprep.mubr.bf16.mxu0 %v4801_v4 }
 0x259   :  { %1787 = vmatmul.mubr.bf16.gmra.mrb[84].mxu0 %v4799_v2 }
 0x25a   :  { %1796 = vmatprep.mubr.bf16.mxu0 %v4811_v29 }
 0x261   :  { %1797 = vmatmul.mubr.bf16.gmra.mrb[88].mxu0 %v4809_v27 }
 0x262   :  { %1806 = vmatprep.mubr.bf16.mxu0 %v4821_v53  ;;  %v4106_v53 = vld [vmem:[#allocation13] sm:$0xff]  }
 0x263   :  { %3650 = vmatprep.subr.bf16.mxu1 %v4106_v53 }
 0x269   :  { %1807 = vmatmul.mubr.bf16.gmra.mrb[92].mxu0 %v4819_v52 }
 0x26a   :  { %1816 = vmatprep.mubr.bf16.mxu0 %v4831_v12 }
 0x271   :  { %1817 = vmatmul.mubr.bf16.gmra.mrb[96].mxu0 %v4829_v28 }
 0x272   :  { %1826 = vmatprep.mubr.bf16.mxu0 %v4841_v54 }
 0x279   :  { %1827 = vmatmul.mubr.bf16.gmra.mrb[100].mxu0 %v4839_v49 }
 0x27a   :  { %1836 = vmatprep.mubr.bf16.mxu0 %v4851_v18 }
 0x281   :  { %1837 = vmatmul.mubr.bf16.gmra.mrb[104].mxu0 %v4849_v17 }
 0x282   :  { %1846 = vmatprep.mubr.bf16.mxu0 %v1074_v58 }
 0x289   :  { %1847 = vmatmul.mubr.bf16.gmra.mrb[108].mxu0 %v1073_v57 }
 0x2d2   :  { %v4896_v52 = vpop.f32.mrb[80].mxu1 }
 0x2d3   :  { %v4899_v28 = vpop.f32.mrb[81].mxu1 }
 0x2d4   :  { %v4901_v12 = vpop.f32.mrb[82].mxu1 }
 0x2d5   :  { %v4903_v63 = vpop.f32.mrb[83].mxu1 }
 0x2e4   :  { %v1698_v14 = vpop.f32.mrb[48].mxu0 }
 0x2e5   :  { %v3762_v45 = vadd.f32 %v1698_v14, %v4887_v37  ;;  %v1700_v46 = vpop.f32.mrb[49].mxu0 }
 0x2e6   :  { %v3763_v2 = vadd.f32 %v1700_v46, %v4891_v13  ;;  %v1702_v4 = vpop.f32.mrb[50].mxu0  ;;  %v4907_v24 = vpop.f32.mrb[84].mxu1 }
 0x2e7   :  { %v3764_v27 = vadd.f32 %v1702_v4, %v4887_v37  ;;  %v1704_v29 = vpop.f32.mrb[51].mxu0  ;;  %v1857_v21 = vmax.f32 %v3762_v45, 0.0  ;;  %v4910_v18 = vpop.f32.mrb[85].mxu1 }
 0x2e8   :  { %v3765_v22 = vadd.f32 %v1704_v29, %v4891_v13  ;;  %v1858_v49 = vmax.f32 %v3763_v2, 0.0  ;;  %v4913_v15 = vpop.f32.mrb[86].mxu1 }
 0x2e9   :  { %v1859_v23 = vmax.f32 %v3764_v27, 0.0  ;;  %v4915_v30 = vpop.f32.mrb[87].mxu1 }
 0x2ea   :  { %v1860_v54 = vmax.f32 %v3765_v22, 0.0 }
 0x2eb   :  { %v1921_v1 = vpack.c.bf16 %v1859_v23, %v1857_v21 }
 0x2ec   :  { %v1922_v5 = vpack.c.bf16 %v1860_v54, %v1858_v49  ;;  %v1708_v7 = vpop.f32.mrb[52].mxu0 }
 0x2ed   :  { %v3766_v8 = vadd.f32 %v1708_v7, %v4887_v37  ;;  %v1710_v50 = vpop.f32.mrb[53].mxu0 }
 0x2ee   :  { %v3767_v10 = vadd.f32 %v1710_v50, %v4891_v13  ;;  %v1712_v38 = vpop.f32.mrb[54].mxu0  ;;  %2466 = vmatprep.mubr.bf16.mxu1 %v1922_v5  ;;  %v4919_v56 = vpop.f32.mrb[88].mxu1 }
 0x2ef   :  { %v3768_v17 = vadd.f32 %v1712_v38, %v4887_v37  ;;  %v1714_v55 = vpop.f32.mrb[55].mxu0  ;;  %2467 = vmatmul.mubr.bf16.vlgmr.msra.gmra.mrb[112].mxu1 %v1921_v1  ;;  %v1861_v0 = vmax.f32 %v3766_v8, 0.0  ;;  %v4922_v58 = vpop.f32.mrb[89].mxu1 }
 0x2f0   :  { %v3769_v25 = vadd.f32 %v1714_v55, %v4891_v13  ;;  %3651 = vmatpush3.bf16.msra.mxu1 %v4106_v53  ;;  %v1862_v31 = vmax.f32 %v3767_v10, 0.0  ;;  %v4925_v32 = vpop.f32.mrb[90].mxu1 }
 0x2f1   :  { %v1863_v44 = vmax.f32 %v3768_v17, 0.0  ;;  %3652 = vmatprep.subr.bf16.mxu1 %v4107_v9  ;;  %v4927_v26 = vpop.f32.mrb[91].mxu1 }
 0x2f2   :  { %v1864_v34 = vmax.f32 %v3769_v25, 0.0 }
 0x2f3   :  { %v1923_v35 = vpack.c.bf16 %v1863_v44, %v1861_v0 }
 0x2f4   :  { %v1924_v62 = vpack.c.bf16 %v1864_v34, %v1862_v31  ;;  %v1718_v40 = vpop.f32.mrb[56].mxu0  ;;  %3653 = vmatpush3.bf16.msra.mxu1 %v4107_v9 }
 0x2f5   :  { %v3770_v41 = vadd.f32 %v1718_v40, %v4887_v37  ;;  %v1720_v43 = vpop.f32.mrb[57].mxu0  ;;  %3654 = vmatprep.subr.bf16.mxu1 %v4108_v20 }
 0x2f6   :  { %v3771_v19 = vadd.f32 %v1720_v43, %v4891_v13  ;;  %v1722_v11 = vpop.f32.mrb[58].mxu0  ;;  %2474 = vmatprep.mubr.bf16.mxu1 %v1924_v62  ;;  %v4931_v45 = vpop.f32.mrb[92].mxu1 }
 0x2f7   :  { %v3772_v57 = vadd.f32 %v1722_v11, %v4887_v37  ;;  %v1724_v39 = vpop.f32.mrb[59].mxu0  ;;  %2475 = vmatmul.mubr.bf16.gmra.mrb[116].mxu1 %v1923_v35  ;;  %v1865_v59 = vmax.f32 %v3770_v41, 0.0  ;;  %v4934_v4 = vpop.f32.mrb[93].mxu1 }
 0x2f8   :  { %v3773_v60 = vadd.f32 %v1724_v39, %v4891_v13  ;;  %3655 = vmatpush3.bf16.msra.mxu1 %v4108_v20  ;;  %v1866_v61 = vmax.f32 %v3771_v19, 0.0  ;;  %v4937_v29 = vpop.f32.mrb[94].mxu1 }
 0x2f9   :  { %v1867_v36 = vmax.f32 %v3772_v57, 0.0  ;;  %3656 = vmatprep.subr.bf16.mxu1 %v4109_v47  ;;  %v4939_v21 = vpop.f32.mrb[95].mxu1 }
 0x2fa   :  { %v1868_v42 = vmax.f32 %v3773_v60, 0.0 }
 0x2fb   :  { %v1925_v16 = vpack.c.bf16 %v1867_v36, %v1865_v59 }
 0x2fc   :  { %v1926_v6 = vpack.c.bf16 %v1868_v42, %v1866_v61  ;;  %v1728_v3 = vpop.f32.mrb[60].mxu0  ;;  %3657 = vmatpush3.bf16.msra.mxu1 %v4109_v47 }
 0x2fd   :  { %v3774_v48 = vadd.f32 %v1728_v3, %v4887_v37  ;;  %v1730_v51 = vpop.f32.mrb[61].mxu0 }
 0x2fe   :  { %v3775_v33 = vadd.f32 %v1730_v51, %v4891_v13  ;;  %v1732_v14 = vpop.f32.mrb[62].mxu0  ;;  %2482 = vmatprep.mubr.bf16.mxu1 %v1926_v6  ;;  %v4943_v10 = vpop.f32.mrb[96].mxu1 }
 0x2ff   :  { %v3776_v46 = vadd.f32 %v1732_v14, %v4887_v37  ;;  %v1734_v2 = vpop.f32.mrb[63].mxu0  ;;  %2483 = vmatmul.mubr.bf16.gmra.mrb[120].mxu1 %v1925_v16  ;;  %v1869_v53 = vmax.f32 %v3774_v48, 0.0  ;;  %v4946_v55 = vpop.f32.mrb[97].mxu1 }
 0x300   :  { %v3777_v27 = vadd.f32 %v1734_v2, %v4891_v13  ;;  %v1870_v23 = vmax.f32 %v3775_v33, 0.0  ;;  %v4949_v0 = vpop.f32.mrb[98].mxu1 }
 0x301   :  { %v1871_v22 = vmax.f32 %v3776_v46, 0.0  ;;  %v4951_v31 = vpop.f32.mrb[99].mxu1 }
 0x302   :  { %v1872_v49 = vmax.f32 %v3777_v27, 0.0 }
 0x303   :  { %v1927_v54 = vpack.c.bf16 %v1871_v22, %v1869_v53 }
 0x304   :  { %v1928_v1 = vpack.c.bf16 %v1872_v49, %v1870_v23  ;;  %v1738_v5 = vpop.f32.mrb[64].mxu0 }
 0x305   :  { %v3778_v7 = vadd.f32 %v1738_v5, %v4887_v37  ;;  %v1740_v8 = vpop.f32.mrb[65].mxu0 }
 0x306   :  { %v3779_v50 = vadd.f32 %v1740_v8, %v4891_v13  ;;  %v1742_v9 = vpop.f32.mrb[66].mxu0  ;;  %2490 = vmatprep.mubr.bf16.mxu1 %v1928_v1  ;;  %v4955_v57 = vpop.f32.mrb[100].mxu1 }
 0x307   :  { %v3780_v38 = vadd.f32 %v1742_v9, %v4887_v37  ;;  %v1744_v17 = vpop.f32.mrb[67].mxu0  ;;  %2491 = vmatmul.mubr.bf16.gmra.mrb[124].mxu1 %v1927_v54  ;;  %v1873_v44 = vmax.f32 %v3778_v7, 0.0  ;;  %v4958_v59 = vpop.f32.mrb[101].mxu1 }
 0x308   :  { %v3781_v25 = vadd.f32 %v1744_v17, %v4891_v13  ;;  %v1874_v34 = vmax.f32 %v3779_v50, 0.0  ;;  %v4961_v61 = vpop.f32.mrb[102].mxu1 }
 0x309   :  { %v1875_v20 = vmax.f32 %v3780_v38, 0.0  ;;  %v4963_v6 = vpop.f32.mrb[103].mxu1 }
 0x30a   :  { %v1876_v35 = vmax.f32 %v3781_v25, 0.0 }
 0x30b   :  { %v1929_v62 = vpack.c.bf16 %v1875_v20, %v1873_v44 }
 0x30c   :  { %v1930_v40 = vpack.c.bf16 %v1876_v35, %v1874_v34  ;;  %v1748_v41 = vpop.f32.mrb[68].mxu0 }
 0x30d   :  { %v3782_v43 = vadd.f32 %v1748_v41, %v4887_v37  ;;  %v1750_v47 = vpop.f32.mrb[69].mxu0 }
 0x30e   :  { %v3783_v19 = vadd.f32 %v1750_v47, %v4891_v13  ;;  %v1752_v11 = vpop.f32.mrb[70].mxu0  ;;  %2498 = vmatprep.mubr.bf16.mxu1 %v1930_v40  ;;  %v4967_v22 = vpop.f32.mrb[104].mxu1 }
 0x30f   :  { %v3784_v39 = vadd.f32 %v1752_v11, %v4887_v37  ;;  %v1754_v60 = vpop.f32.mrb[71].mxu0  ;;  %2499 = vmatmul.mubr.bf16.gmra.mrb[128].mxu1 %v1929_v62  ;;  %v1877_v42 = vmax.f32 %v3782_v43, 0.0  ;;  %v4970_v54 = vpop.f32.mrb[105].mxu1 }
 0x310   :  { %v3785_v36 = vadd.f32 %v1754_v60, %v4891_v13  ;;  %v1878_v3 = vmax.f32 %v3783_v19, 0.0  ;;  %v4973_v5 = vpop.f32.mrb[106].mxu1 }
 0x311   :  { %v1879_v16 = vmax.f32 %v3784_v39, 0.0  ;;  %v4975_v50 = vpop.f32.mrb[107].mxu1 }
 0x312   :  { %v1880_v48 = vmax.f32 %v3785_v36, 0.0 }
 0x313   :  { %v1931_v51 = vpack.c.bf16 %v1879_v16, %v1877_v42 }
 0x314   :  { %v1932_v33 = vpack.c.bf16 %v1880_v48, %v1878_v3  ;;  %v1758_v14 = vpop.f32.mrb[72].mxu0 }
 0x315   :  { %v3786_v46 = vadd.f32 %v1758_v14, %v4887_v37  ;;  %v1760_v2 = vpop.f32.mrb[73].mxu0 }
 0x316   :  { %v3787_v27 = vadd.f32 %v1760_v2, %v4891_v13  ;;  %v1762_v53 = vpop.f32.mrb[74].mxu0  ;;  %2506 = vmatprep.mubr.bf16.mxu1 %v1932_v33 }
 0x317   :  { %v3788_v23 = vadd.f32 %v1762_v53, %v4887_v37  ;;  %v1764_v49 = vpop.f32.mrb[75].mxu0  ;;  %2507 = vmatmul.mubr.bf16.gmra.mrb[132].mxu1 %v1931_v51  ;;  %v1881_v7 = vmax.f32 %v3786_v46, 0.0 }
 0x318   :  { %v3789_v1 = vadd.f32 %v1764_v49, %v4891_v13  ;;  %v1882_v9 = vmax.f32 %v3787_v27, 0.0 }
 0x319   :  { %v1883_v8 = vmax.f32 %v3788_v23, 0.0 }
 0x31a   :  { %v1884_v38 = vmax.f32 %v3789_v1, 0.0 }
 0x31b   :  { %v1933_v17 = vpack.c.bf16 %v1883_v8, %v1881_v7 }
 0x31c   :  { %v1934_v25 = vpack.c.bf16 %v1884_v38, %v1882_v9  ;;  %v1768_v44 = vpop.f32.mrb[76].mxu0 }
 0x31d   :  { %v3790_v20 = vadd.f32 %v1768_v44, %v4887_v37  ;;  %v1770_v34 = vpop.f32.mrb[77].mxu0 }
 0x31e   :  { %v3791_v35 = vadd.f32 %v1770_v34, %v4891_v13  ;;  %v1772_v62 = vpop.f32.mrb[78].mxu0  ;;  %2514 = vmatprep.mubr.bf16.mxu1 %v1934_v25 }
 0x31f   :  { %v3792_v40 = vadd.f32 %v1772_v62, %v4887_v37  ;;  %v1774_v41 = vpop.f32.mrb[79].mxu0  ;;  %2515 = vmatmul.mubr.bf16.gmra.mrb[136].mxu1 %v1933_v17  ;;  %v1885_v47 = vmax.f32 %v3790_v20, 0.0 }
 0x320   :  { %v3793_v43 = vadd.f32 %v1774_v41, %v4891_v13  ;;  %v1886_v11 = vmax.f32 %v3791_v35, 0.0 }
 0x321   :  { %v1887_v19 = vmax.f32 %v3792_v40, 0.0 }
 0x322   :  { %v1888_v39 = vmax.f32 %v3793_v43, 0.0 }
 0x323   :  { %v1935_v60 = vpack.c.bf16 %v1887_v19, %v1885_v47 }
 0x324   :  { %v1936_v36 = vpack.c.bf16 %v1888_v39, %v1886_v11  ;;  %v1778_v42 = vpop.f32.mrb[80].mxu0 }
 0x325   :  { %v3794_v16 = vadd.f32 %v1778_v42, %v4887_v37  ;;  %v1780_v3 = vpop.f32.mrb[81].mxu0 }
 0x326   :  { %v3795_v48 = vadd.f32 %v1780_v3, %v4891_v13  ;;  %v1782_v51 = vpop.f32.mrb[82].mxu0  ;;  %2522 = vmatprep.mubr.bf16.mxu1 %v1936_v36 }
 0x327   :  { %v3796_v33 = vadd.f32 %v1782_v51, %v4887_v37  ;;  %v1784_v14 = vpop.f32.mrb[83].mxu0  ;;  %2523 = vmatmul.mubr.bf16.gmra.mrb[140].mxu1 %v1935_v60  ;;  %v1889_v2 = vmax.f32 %v3794_v16, 0.0  ;;  %v4992_v16 = vpop.f32.mrb[108].mxu1 }
 0x328   :  { %v3797_v46 = vadd.f32 %v1784_v14, %v4891_v13  ;;  %v1890_v53 = vmax.f32 %v3795_v48, 0.0  ;;  %v4995_v48 = vpop.f32.mrb[109].mxu1 }
 0x329   :  { %v1891_v27 = vmax.f32 %v3796_v33, 0.0  ;;  %v4997_v14 = vpop.f32.mrb[110].mxu1 }
 0x32a   :  { %v1892_v23 = vmax.f32 %v3797_v46, 0.0 }
 0x32b   :  { %v1937_v49 = vpack.c.bf16 %v1891_v27, %v1889_v2  ;;  %v4999_v27 = vpop.f32.mrb[111].mxu1 }
 0x32c   :  { %v1938_v1 = vpack.c.bf16 %v1892_v23, %v1890_v53  ;;  %v1788_v7 = vpop.f32.mrb[84].mxu0 }
 0x32d   :  { %v3798_v8 = vadd.f32 %v1788_v7, %v4887_v37  ;;  %v1790_v9 = vpop.f32.mrb[85].mxu0 }
 0x32e   :  { %v3799_v38 = vadd.f32 %v1790_v9, %v4891_v13  ;;  %v1792_v17 = vpop.f32.mrb[86].mxu0  ;;  %2530 = vmatprep.mubr.bf16.mxu1 %v1938_v1 }
 0x32f   :  { %v3800_v25 = vadd.f32 %v1792_v17, %v4887_v37  ;;  %v1794_v44 = vpop.f32.mrb[87].mxu0  ;;  %2531 = vmatmul.mubr.bf16.gmra.mrb[144].mxu1 %v1937_v49  ;;  %v1893_v34 = vmax.f32 %v3798_v8, 0.0 }
 0x330   :  { %v3801_v20 = vadd.f32 %v1794_v44, %v4891_v13  ;;  %v1894_v62 = vmax.f32 %v3799_v38, 0.0 }
 0x331   :  { %v1895_v35 = vmax.f32 %v3800_v25, 0.0 }
 0x332   :  { %v1896_v40 = vmax.f32 %v3801_v20, 0.0 }
 0x333   :  { %v1939_v41 = vpack.c.bf16 %v1895_v35, %v1893_v34 }
 0x334   :  { %v1940_v43 = vpack.c.bf16 %v1896_v40, %v1894_v62  ;;  %v1798_v47 = vpop.f32.mrb[88].mxu0 }
 0x335   :  { %v3802_v19 = vadd.f32 %v1798_v47, %v4887_v37  ;;  %v1800_v11 = vpop.f32.mrb[89].mxu0 }
 0x336   :  { %v3803_v39 = vadd.f32 %v1800_v11, %v4891_v13  ;;  %v1802_v60 = vpop.f32.mrb[90].mxu0  ;;  %2538 = vmatprep.mubr.bf16.mxu1 %v1940_v43 }
 0x337   :  { %v3804_v36 = vadd.f32 %v1802_v60, %v4887_v37  ;;  %v1804_v42 = vpop.f32.mrb[91].mxu0  ;;  %2539 = vmatmul.mubr.bf16.gmra.mrb[148].mxu1 %v1939_v41  ;;  %v1897_v51 = vmax.f32 %v3802_v19, 0.0 }
 0x338   :  { %v3805_v3 = vadd.f32 %v1804_v42, %v4891_v13  ;;  %v1898_v46 = vmax.f32 %v3803_v39, 0.0  ;;  %v4110_v39 = vld [vmem:[#allocation13 + $0x20] sm:$0xff]  }
 0x339   :  { %v1899_v33 = vmax.f32 %v3804_v36, 0.0  ;;  %3658 = vmatprep.subr.bf16.mxu1 %v4110_v39 }
 0x33a   :  { %v1900_v2 = vmax.f32 %v3805_v3, 0.0  ;;  %3659 = vmatpush3.bf16.msra.mxu1 %v4110_v39 }
 0x33b   :  { %v1941_v53 = vpack.c.bf16 %v1899_v33, %v1897_v51 }
 0x33c   :  { %v1942_v23 = vpack.c.bf16 %v1900_v2, %v1898_v46  ;;  %v1808_v49 = vpop.f32.mrb[92].mxu0  ;;  %v4111_v2 = vld [vmem:[#allocation13 + $0x28] sm:$0xff]  }
 0x33d   :  { %v3806_v1 = vadd.f32 %v1808_v49, %v4887_v37  ;;  %v1810_v7 = vpop.f32.mrb[93].mxu0  ;;  %3660 = vmatprep.subr.bf16.mxu1 %v4111_v2 }
 0x33e   :  { %v3807_v8 = vadd.f32 %v1810_v7, %v4891_v13  ;;  %v1812_v9 = vpop.f32.mrb[94].mxu0  ;;  %2546 = vmatprep.mubr.bf16.mxu1 %v1942_v23  ;;  %3661 = vmatpush3.bf16.msra.mxu1 %v4111_v2 }
 0x33f   :  { %v3808_v38 = vadd.f32 %v1812_v9, %v4887_v37  ;;  %v1814_v17 = vpop.f32.mrb[95].mxu0  ;;  %2547 = vmatmul.mubr.bf16.gmra.mrb[152].mxu1 %v1941_v53  ;;  %v1901_v44 = vmax.f32 %v3806_v1, 0.0 }
 0x340   :  { %v3809_v25 = vadd.f32 %v1814_v17, %v4891_v13  ;;  %v1902_v34 = vmax.f32 %v3807_v8, 0.0 }
 0x341   :  { %v1903_v20 = vmax.f32 %v3808_v38, 0.0  ;;  %v4112_v38 = vld [vmem:[#allocation13 + $0x30] sm:$0xff]  }
 0x342   :  { %v1904_v35 = vmax.f32 %v3809_v25, 0.0  ;;  %3662 = vmatprep.subr.bf16.mxu1 %v4112_v38 }
 0x343   :  { %v1943_v62 = vpack.c.bf16 %v1903_v20, %v1901_v44  ;;  %3663 = vmatpush3.bf16.msra.mxu1 %v4112_v38 }
 0x344   :  { %v1944_v40 = vpack.c.bf16 %v1904_v35, %v1902_v34  ;;  %v1818_v41 = vpop.f32.mrb[96].mxu0 }
 0x345   :  { %v3810_v43 = vadd.f32 %v1818_v41, %v4887_v37  ;;  %v1820_v47 = vpop.f32.mrb[97].mxu0 }
 0x346   :  { %v3811_v19 = vadd.f32 %v1820_v47, %v4891_v13  ;;  %v1822_v11 = vpop.f32.mrb[98].mxu0  ;;  %2554 = vmatprep.mubr.bf16.mxu1 %v1944_v40  ;;  %v4113_v40 = vld [vmem:[#allocation13 + $0x38] sm:$0xff]  }
 0x347   :  { %v3812_v60 = vadd.f32 %v1822_v11, %v4887_v37  ;;  %v1824_v36 = vpop.f32.mrb[99].mxu0  ;;  %2555 = vmatmul.mubr.bf16.gmra.mrb[156].mxu1 %v1943_v62  ;;  %v1905_v3 = vmax.f32 %v3810_v43, 0.0  ;;  %3664 = vmatprep.subr.bf16.mxu1 %v4113_v40 }
 0x348   :  { %v3813_v42 = vadd.f32 %v1824_v36, %v4891_v13  ;;  %v1906_v33 = vmax.f32 %v3811_v19, 0.0  ;;  %3665 = vmatpush3.bf16.msra.mxu1 %v4113_v40 }
 0x349   :  { %v1907_v51 = vmax.f32 %v3812_v60, 0.0 }
 0x34a   :  { %v1908_v46 = vmax.f32 %v3813_v42, 0.0 }
 0x34b   :  { %v1945_v53 = vpack.c.bf16 %v1907_v51, %v1905_v3 }
 0x34c   :  { %v1946_v23 = vpack.c.bf16 %v1908_v46, %v1906_v33  ;;  %v1828_v49 = vpop.f32.mrb[100].mxu0 }
 0x34d   :  { %v3814_v1 = vadd.f32 %v1828_v49, %v4887_v37  ;;  %v1830_v7 = vpop.f32.mrb[101].mxu0 }
 0x34e   :  { %v3815_v8 = vadd.f32 %v1830_v7, %v4891_v13  ;;  %v1832_v9 = vpop.f32.mrb[102].mxu0  ;;  %2562 = vmatprep.mubr.bf16.mxu1 %v1946_v23 }
 0x34f   :  { %v3816_v17 = vadd.f32 %v1832_v9, %v4887_v37  ;;  %v1834_v25 = vpop.f32.mrb[103].mxu0  ;;  %2563 = vmatmul.mubr.bf16.gmra.mrb[160].mxu1 %v1945_v53  ;;  %v1909_v20 = vmax.f32 %v3814_v1, 0.0 }
 0x350   :  { %v3817_v44 = vadd.f32 %v1834_v25, %v4891_v13  ;;  %v1910_v35 = vmax.f32 %v3815_v8, 0.0 }
 0x351   :  { %v1911_v34 = vmax.f32 %v3816_v17, 0.0 }
 0x352   :  { %v1912_v62 = vmax.f32 %v3817_v44, 0.0 }
 0x353   :  { %v1947_v41 = vpack.c.bf16 %v1911_v34, %v1909_v20 }
 0x354   :  { %v1948_v43 = vpack.c.bf16 %v1912_v62, %v1910_v35  ;;  %v1838_v47 = vpop.f32.mrb[104].mxu0 }
 0x355   :  { %v3818_v19 = vadd.f32 %v1838_v47, %v4887_v37  ;;  %v1840_v11 = vpop.f32.mrb[105].mxu0 }
 0x356   :  { %v3819_v39 = vadd.f32 %v1840_v11, %v4891_v13  ;;  %v1842_v60 = vpop.f32.mrb[106].mxu0  ;;  %2570 = vmatprep.mubr.bf16.mxu1 %v1948_v43 }
 0x357   :  { %v3820_v36 = vadd.f32 %v1842_v60, %v4887_v37  ;;  %v1844_v42 = vpop.f32.mrb[107].mxu0  ;;  %2571 = vmatmul.mubr.bf16.gmra.mrb[164].mxu1 %v1947_v41  ;;  %v1913_v51 = vmax.f32 %v3818_v19, 0.0 }
 0x358   :  { %v3821_v3 = vadd.f32 %v1844_v42, %v4891_v13  ;;  %v1914_v46 = vmax.f32 %v3819_v39, 0.0  ;;  %v4114_v42 = vld [vmem:[#allocation14] sm:$0xff]  }
 0x359   :  { %v1915_v33 = vmax.f32 %v3820_v36, 0.0  ;;  %3698 = vmatprep.subr.bf16.mxu0 %v4114_v42 }
 0x35a   :  { %v1916_v2 = vmax.f32 %v3821_v3, 0.0  ;;  %v4115_v3 = vld [vmem:[#allocation14 + $0x8] sm:$0xff]   ;;  %3699 = vmatpush3.bf16.msra.mxu0 %v4114_v42 }
 0x35b   :  { %v1949_v53 = vpack.c.bf16 %v1915_v33, %v1913_v51  ;;  %3700 = vmatprep.subr.bf16.mxu0 %v4115_v3 }
 0x35c   :  { %v1950_v23 = vpack.c.bf16 %v1916_v2, %v1914_v46  ;;  %v1848_v49 = vpop.f32.mrb[108].mxu0 }
 0x35d   :  { %v3822_v1 = vadd.f32 %v1848_v49, %v4887_v37  ;;  %v1850_v7 = vpop.f32.mrb[109].mxu0 }
 0x35e   :  { %v3823_v8 = vadd.f32 %v1850_v7, %v4891_v13  ;;  %v1852_v9 = vpop.f32.mrb[110].mxu0  ;;  %2578 = vmatprep.mubr.bf16.mxu1 %v1950_v23  ;;  %3701 = vmatpush3.bf16.msra.mxu0 %v4115_v3 }
 0x35f   :  { %v3824_v38 = vadd.f32 %v1852_v9, %v4887_v37  ;;  %v1854_v17 = vpop.f32.mrb[111].mxu0  ;;  %2579 = vmatmul.mubr.bf16.gmra.mrb[168].mxu1 %v1949_v53  ;;  %v1917_v44 = vmax.f32 %v3822_v1, 0.0  ;;  %v5024_v37 = vld [vmem:[%s5187_s8] ss:$0 sm:$0xff]  ;;  %v4116_v1 = vld [vmem:[#allocation14 + $0x10] sm:$0xff]  }
 0x360   :  { %v3825_v25 = vadd.f32 %v1854_v17, %v4891_v13  ;;  %v1918_v34 = vmax.f32 %v3823_v8, 0.0  ;;  %3702 = vmatprep.subr.bf16.mxu0 %v4116_v1  ;;  %v4117_v17 = vld [vmem:[#allocation14 + $0x18] sm:$0xff]  }
 0x361   :  { %v1919_v20 = vmax.f32 %v3824_v38, 0.0 }
 0x362   :  { %v1920_v35 = vmax.f32 %v3825_v25, 0.0  ;;  %3703 = vmatpush3.bf16.msra.mxu0 %v4116_v1 }
 0x363   :  { %v1951_v62 = vpack.c.bf16 %v1919_v20, %v1917_v44  ;;  %3704 = vmatprep.subr.bf16.mxu0 %v4117_v17 }
 0x364   :  { %v1952_v40 = vpack.c.bf16 %v1920_v35, %v1918_v34 }
 0x366   :  { %2586 = vmatprep.mubr.bf16.mxu1 %v1952_v40  ;;  %3705 = vmatpush3.bf16.msra.mxu0 %v4117_v17 }
 0x367   :  { %2587 = vmatmul.mubr.bf16.gmra.mrb[172].mxu1 %v1951_v62 }
 0x3c2   :  { %v3458_v41 = vpop.f32.mrb[112].mxu1 }
 0x3c3   :  { %v3459_v43 = vpop.f32.mrb[113].mxu1 }
 0x3c4   :  { %v3460_v47 = vadd.f32 %v3459_v43, %v3458_v41  ;;  %v3461_v19 = vpop.f32.mrb[114].mxu1 }
 0x3c5   :  { %v3462_v11 = vpop.f32.mrb[115].mxu1 }
 0x3c6   :  { %v2469_v13 = vadd.f32 %v3460_v47, %v4899_v28  ;;  %v3463_v39 = vadd.f32 %v3462_v11, %v3461_v19 }
 0x3c8   :  { %v2602_v60 = vadd.f32 %v5024_v37, %v2469_v13  ;;  %v2472_v36 = vadd.f32 %v3463_v39, %v4903_v63  ;;  %v4119_v13 = vld [vmem:[#allocation14 + $0x28] sm:$0xff]  }
 0x3ca   :  { %v2603_v51 = vadd.f32 %v5024_v37, %v2472_v36  ;;  %v3464_v33 = vpop.f32.mrb[116].mxu1  ;;  %v2634_v2 = vmax.f32 %v2602_v60, 0.0 }
 0x3cb   :  { %v3465_v46 = vpop.f32.mrb[117].mxu1 }
 0x3cc   :  { %v2635_v53 = vmax.f32 %v2603_v51, 0.0  ;;  %v3466_v23 = vadd.f32 %v3465_v46, %v3464_v33  ;;  %v3467_v49 = vpop.f32.mrb[118].mxu1 }
 0x3cd   :  { %v3468_v28 = vpop.f32.mrb[119].mxu1 }
 0x3ce   :  { %v2477_v7 = vadd.f32 %v4896_v52, %v3466_v23  ;;  %v3469_v8 = vadd.f32 %v3468_v28, %v3467_v49  ;;  %v2666_v9 = vpack.c.bf16 %v2635_v53, %v2634_v2  ;;  %v4118_v52 = vld [vmem:[#allocation14 + $0x20] sm:$0xff]  }
 0x3cf   :  { %3706 = vmatprep.subr.bf16.mxu0 %v4118_v52 }
 0x3d0   :  { %v2604_v63 = vadd.f32 %v5024_v37, %v2477_v7  ;;  %v2480_v38 = vadd.f32 %v4901_v12, %v3469_v8  ;;  %3666 = vmatprep.mubr.bf16.mxu1 %v2666_v9  ;;  %3707 = vmatpush3.bf16.msra.mxu0 %v4118_v52 }
 0x3d1   :  { %3708 = vmatprep.subr.bf16.mxu0 %v4119_v13 }
 0x3d2   :  { %v2605_v25 = vadd.f32 %v5024_v37, %v2480_v38  ;;  %v3470_v44 = vpop.f32.mrb[120].mxu1  ;;  %v2636_v34 = vmax.f32 %v2604_v63, 0.0 }
 0x3d3   :  { %v3471_v20 = vpop.f32.mrb[121].mxu1 }
 0x3d4   :  { %v2637_v35 = vmax.f32 %v2605_v25, 0.0  ;;  %v3472_v62 = vadd.f32 %v3471_v20, %v3470_v44  ;;  %v3473_v40 = vpop.f32.mrb[122].mxu1  ;;  %3709 = vmatpush3.bf16.msra.mxu0 %v4119_v13 }
 0x3d5   :  { %v3474_v41 = vpop.f32.mrb[123].mxu1 }
 0x3d6   :  { %v2667_v43 = vpack.c.bf16 %v2637_v35, %v2636_v34  ;;  %v2485_v47 = vadd.f32 %v3472_v62, %v4910_v18  ;;  %v3475_v19 = vadd.f32 %v3474_v41, %v3473_v40 }
 0x3d8   :  { %v2606_v12 = vadd.f32 %v5024_v37, %v2485_v47  ;;  %v2488_v11 = vadd.f32 %v3475_v19, %v4915_v30  ;;  %3667 = vmatmul.mubr.bf16.vlgmr.msra.gmra.mrb[176].mxu1 %v2667_v43 }
 0x3da   :  { %v2607_v39 = vadd.f32 %v5024_v37, %v2488_v11  ;;  %v3476_v60 = vpop.f32.mrb[124].mxu1  ;;  %v2638_v42 = vmax.f32 %v2606_v12, 0.0 }
 0x3db   :  { %v3477_v36 = vpop.f32.mrb[125].mxu1 }
 0x3dc   :  { %v2639_v3 = vmax.f32 %v2607_v39, 0.0  ;;  %v3478_v51 = vadd.f32 %v3477_v36, %v3476_v60  ;;  %v3479_v33 = vpop.f32.mrb[126].mxu1 }
 0x3dd   :  { %v3480_v18 = vpop.f32.mrb[127].mxu1 }
 0x3de   :  { %v2493_v46 = vadd.f32 %v4907_v24, %v3478_v51  ;;  %v3481_v2 = vadd.f32 %v3480_v18, %v3479_v33  ;;  %v2668_v53 = vpack.c.bf16 %v2639_v3, %v2638_v42 }
 0x3e0   :  { %v2608_v30 = vadd.f32 %v5024_v37, %v2493_v46  ;;  %v2496_v23 = vadd.f32 %v4913_v15, %v3481_v2  ;;  %3670 = vmatprep.mubr.bf16.mxu1 %v2668_v53 }
 0x3e2   :  { %v2609_v49 = vadd.f32 %v5024_v37, %v2496_v23  ;;  %v3482_v1 = vpop.f32.mrb[128].mxu1  ;;  %v2640_v7 = vmax.f32 %v2608_v30, 0.0 }
 0x3e3   :  { %v3483_v28 = vpop.f32.mrb[129].mxu1 }
 0x3e4   :  { %v2641_v8 = vmax.f32 %v2609_v49, 0.0  ;;  %v3484_v9 = vadd.f32 %v3483_v28, %v3482_v1  ;;  %v3485_v63 = vpop.f32.mrb[130].mxu1 }
 0x3e5   :  { %v3486_v38 = vpop.f32.mrb[131].mxu1 }
 0x3e6   :  { %v2501_v17 = vadd.f32 %v3484_v9, %v4922_v58  ;;  %v3487_v24 = vadd.f32 %v3486_v38, %v3485_v63  ;;  %v2669_v25 = vpack.c.bf16 %v2641_v8, %v2640_v7 }
 0x3e8   :  { %v2610_v44 = vadd.f32 %v5024_v37, %v2501_v17  ;;  %v2504_v20 = vadd.f32 %v3487_v24, %v4927_v26  ;;  %3671 = vmatmul.mubr.bf16.gmra.mrb[180].mxu1 %v2669_v25 }
 0x3ea   :  { %v2611_v15 = vadd.f32 %v5024_v37, %v2504_v20  ;;  %v3488_v34 = vpop.f32.mrb[132].mxu1  ;;  %v2642_v62 = vmax.f32 %v2610_v44, 0.0 }
 0x3eb   :  { %v3489_v35 = vpop.f32.mrb[133].mxu1 }
 0x3ec   :  { %v2643_v40 = vmax.f32 %v2611_v15, 0.0  ;;  %v3490_v52 = vadd.f32 %v3489_v35, %v3488_v34  ;;  %v3491_v41 = vpop.f32.mrb[134].mxu1 }
 0x3ed   :  { %v3492_v43 = vpop.f32.mrb[135].mxu1 }
 0x3ee   :  { %v2509_v47 = vadd.f32 %v4919_v56, %v3490_v52  ;;  %v3493_v19 = vadd.f32 %v3492_v43, %v3491_v41  ;;  %v2670_v58 = vpack.c.bf16 %v2643_v40, %v2642_v62 }
 0x3f0   :  { %v2612_v12 = vadd.f32 %v5024_v37, %v2509_v47  ;;  %v2512_v11 = vadd.f32 %v4925_v32, %v3493_v19  ;;  %3674 = vmatprep.mubr.bf16.mxu1 %v2670_v58 }
 0x3f2   :  { %v2613_v26 = vadd.f32 %v5024_v37, %v2512_v11  ;;  %v3494_v13 = vpop.f32.mrb[136].mxu1  ;;  %v2644_v60 = vmax.f32 %v2612_v12, 0.0 }
 0x3f3   :  { %v3495_v39 = vpop.f32.mrb[137].mxu1 }
 0x3f4   :  { %v2645_v36 = vmax.f32 %v2613_v26, 0.0  ;;  %v3496_v42 = vadd.f32 %v3495_v39, %v3494_v13  ;;  %v3497_v3 = vpop.f32.mrb[138].mxu1 }
 0x3f5   :  { %v3498_v51 = vpop.f32.mrb[139].mxu1 }
 0x3f6   :  { %v2517_v33 = vadd.f32 %v3496_v42, %v4934_v4  ;;  %v3499_v18 = vadd.f32 %v3498_v51, %v3497_v3  ;;  %v2671_v56 = vpack.c.bf16 %v2645_v36, %v2644_v60 }
 0x3f8   :  { %v2614_v46 = vadd.f32 %v5024_v37, %v2517_v33  ;;  %v2520_v2 = vadd.f32 %v3499_v18, %v4939_v21  ;;  %3675 = vmatmul.mubr.bf16.gmra.mrb[184].mxu1 %v2671_v56 }
 0x3fa   :  { %v2615_v32 = vadd.f32 %v5024_v37, %v2520_v2  ;;  %v3500_v53 = vpop.f32.mrb[140].mxu1  ;;  %v2646_v23 = vmax.f32 %v2614_v46, 0.0 }
 0x3fb   :  { %v3501_v30 = vpop.f32.mrb[141].mxu1 }
 0x3fc   :  { %v2647_v49 = vmax.f32 %v2615_v32, 0.0  ;;  %v3502_v1 = vadd.f32 %v3501_v30, %v3500_v53  ;;  %v3503_v28 = vpop.f32.mrb[142].mxu1 }
 0x3fd   :  { %v3504_v7 = vpop.f32.mrb[143].mxu1 }
 0x3fe   :  { %v2525_v8 = vadd.f32 %v4931_v45, %v3502_v1  ;;  %v3505_v9 = vadd.f32 %v3504_v7, %v3503_v28  ;;  %v2672_v4 = vpack.c.bf16 %v2647_v49, %v2646_v23 }
 0x400   :  { %v2616_v63 = vadd.f32 %v5024_v37, %v2525_v8  ;;  %v2528_v38 = vadd.f32 %v4937_v29, %v3505_v9  ;;  %3678 = vmatprep.mubr.bf16.mxu1 %v2672_v4 }
 0x402   :  { %v2617_v21 = vadd.f32 %v5024_v37, %v2528_v38  ;;  %v3506_v17 = vpop.f32.mrb[144].mxu1  ;;  %v2648_v25 = vmax.f32 %v2616_v63, 0.0 }
 0x403   :  { %v3507_v24 = vpop.f32.mrb[145].mxu1 }
 0x404   :  { %v2649_v44 = vmax.f32 %v2617_v21, 0.0  ;;  %v3508_v20 = vadd.f32 %v3507_v24, %v3506_v17  ;;  %v3509_v15 = vpop.f32.mrb[146].mxu1 }
 0x405   :  { %v3510_v34 = vpop.f32.mrb[147].mxu1 }
 0x406   :  { %v2533_v35 = vadd.f32 %v3508_v20, %v4946_v55  ;;  %v3511_v62 = vadd.f32 %v3510_v34, %v3509_v15  ;;  %v2673_v45 = vpack.c.bf16 %v2649_v44, %v2648_v25 }
 0x408   :  { %v2618_v40 = vadd.f32 %v5024_v37, %v2533_v35  ;;  %v2536_v52 = vadd.f32 %v3511_v62, %v4951_v31  ;;  %3679 = vmatmul.mubr.bf16.gmra.mrb[188].mxu1 %v2673_v45 }
 0x40a   :  { %v2619_v29 = vadd.f32 %v5024_v37, %v2536_v52  ;;  %v3512_v41 = vpop.f32.mrb[148].mxu1  ;;  %v2650_v47 = vmax.f32 %v2618_v40, 0.0 }
 0x40b   :  { %v3513_v43 = vpop.f32.mrb[149].mxu1 }
 0x40c   :  { %v2651_v19 = vmax.f32 %v2619_v29, 0.0  ;;  %v3514_v58 = vadd.f32 %v3513_v43, %v3512_v41  ;;  %v3515_v12 = vpop.f32.mrb[150].mxu1 }
 0x40d   :  { %v3516_v11 = vpop.f32.mrb[151].mxu1 }
 0x40e   :  { %v2541_v26 = vadd.f32 %v4943_v10, %v3514_v58  ;;  %v3517_v13 = vadd.f32 %v3516_v11, %v3515_v12  ;;  %v2674_v55 = vpack.c.bf16 %v2651_v19, %v2650_v47  ;;  %v4120_v19 = vld [vmem:[#allocation14 + $0x30] sm:$0xff]  }
 0x40f   :  { %3710 = vmatprep.subr.bf16.mxu0 %v4120_v19 }
 0x410   :  { %v2620_v39 = vadd.f32 %v5024_v37, %v2541_v26  ;;  %v2544_v60 = vadd.f32 %v4949_v0, %v3517_v13  ;;  %3682 = vmatprep.mubr.bf16.mxu1 %v2674_v55  ;;  %3711 = vmatpush3.bf16.msra.mxu0 %v4120_v19  ;;  %v4121_v13 = vld [vmem:[#allocation14 + $0x38] sm:$0xff]  }
 0x411   :  { %3712 = vmatprep.subr.bf16.mxu0 %v4121_v13 }
 0x412   :  { %v2621_v31 = vadd.f32 %v5024_v37, %v2544_v60  ;;  %v3518_v36 = vpop.f32.mrb[152].mxu1  ;;  %v2652_v3 = vmax.f32 %v2620_v39, 0.0 }
 0x413   :  { %v3519_v42 = vpop.f32.mrb[153].mxu1 }
 0x414   :  { %v2653_v51 = vmax.f32 %v2621_v31, 0.0  ;;  %v3520_v33 = vadd.f32 %v3519_v42, %v3518_v36  ;;  %v3521_v18 = vpop.f32.mrb[154].mxu1  ;;  %3713 = vmatpush3.bf16.msra.mxu0 %v4121_v13 }
 0x415   :  { %v3522_v56 = vpop.f32.mrb[155].mxu1 }
 0x416   :  { %v2549_v46 = vadd.f32 %v3520_v33, %v4958_v59  ;;  %v3523_v2 = vadd.f32 %v3522_v56, %v3521_v18  ;;  %v2675_v10 = vpack.c.bf16 %v2653_v51, %v2652_v3 }
 0x418   :  { %v2622_v32 = vadd.f32 %v5024_v37, %v2549_v46  ;;  %v2552_v53 = vadd.f32 %v3523_v2, %v4963_v6  ;;  %3683 = vmatmul.mubr.bf16.gmra.mrb[192].mxu1 %v2675_v10 }
 0x41a   :  { %v2623_v0 = vadd.f32 %v5024_v37, %v2552_v53  ;;  %v3524_v30 = vpop.f32.mrb[156].mxu1  ;;  %v2654_v49 = vmax.f32 %v2622_v32, 0.0 }
 0x41b   :  { %v3525_v23 = vpop.f32.mrb[157].mxu1 }
 0x41c   :  { %v2655_v1 = vmax.f32 %v2623_v0, 0.0  ;;  %v3526_v28 = vadd.f32 %v3525_v23, %v3524_v30  ;;  %v3527_v7 = vpop.f32.mrb[158].mxu1 }
 0x41d   :  { %v3528_v8 = vpop.f32.mrb[159].mxu1 }
 0x41e   :  { %v2557_v9 = vadd.f32 %v4955_v57, %v3526_v28  ;;  %v3529_v4 = vadd.f32 %v3528_v8, %v3527_v7  ;;  %v2676_v59 = vpack.c.bf16 %v2655_v1, %v2654_v49 }
 0x420   :  { %v2624_v63 = vadd.f32 %v5024_v37, %v2557_v9  ;;  %v2560_v38 = vadd.f32 %v4961_v61, %v3529_v4  ;;  %3686 = vmatprep.mubr.bf16.mxu1 %v2676_v59  ;;  %v5093_v59 = vld [vmem:[%s5189_s10] ss:$0 sm:$0xff] }
 0x422   :  { %v2625_v6 = vadd.f32 %v5024_v37, %v2560_v38  ;;  %v3530_v21 = vpop.f32.mrb[160].mxu1  ;;  %v2656_v24 = vmax.f32 %v2624_v63, 0.0 }
 0x423   :  { %v3531_v17 = vpop.f32.mrb[161].mxu1 }
 0x424   :  { %v2657_v25 = vmax.f32 %v2625_v6, 0.0  ;;  %v3532_v44 = vadd.f32 %v3531_v17, %v3530_v21  ;;  %v3533_v20 = vpop.f32.mrb[162].mxu1 }
 0x425   :  { %v3534_v15 = vpop.f32.mrb[163].mxu1 }
 0x426   :  { %v2565_v34 = vadd.f32 %v3532_v44, %v4970_v54  ;;  %v3535_v35 = vadd.f32 %v3534_v15, %v3533_v20  ;;  %v2677_v57 = vpack.c.bf16 %v2657_v25, %v2656_v24 }
 0x428   :  { %v2626_v62 = vadd.f32 %v5024_v37, %v2565_v34  ;;  %v2568_v45 = vadd.f32 %v3535_v35, %v4975_v50  ;;  %3687 = vmatmul.mubr.bf16.gmra.mrb[196].mxu1 %v2677_v57 }
 0x42a   :  { %v2627_v61 = vadd.f32 %v5024_v37, %v2568_v45  ;;  %v3536_v40 = vpop.f32.mrb[164].mxu1  ;;  %v2658_v29 = vmax.f32 %v2626_v62, 0.0 }
 0x42b   :  { %v3537_v52 = vpop.f32.mrb[165].mxu1 }
 0x42c   :  { %v2659_v41 = vmax.f32 %v2627_v61, 0.0  ;;  %v3538_v43 = vadd.f32 %v3537_v52, %v3536_v40  ;;  %v3539_v47 = vpop.f32.mrb[166].mxu1 }
 0x42d   :  { %v3540_v58 = vpop.f32.mrb[167].mxu1 }
 0x42e   :  { %v2573_v12 = vadd.f32 %v4967_v22, %v3538_v43  ;;  %v3541_v54 = vadd.f32 %v3540_v58, %v3539_v47  ;;  %v2678_v11 = vpack.c.bf16 %v2659_v41, %v2658_v29 }
 0x430   :  { %v2628_v26 = vadd.f32 %v5024_v37, %v2573_v12  ;;  %v2576_v50 = vadd.f32 %v4973_v5, %v3541_v54  ;;  %3690 = vmatprep.mubr.bf16.mxu1 %v2678_v11 }
 0x432   :  { %v2629_v55 = vadd.f32 %v5024_v37, %v2576_v50  ;;  %v3542_v39 = vpop.f32.mrb[168].mxu1  ;;  %v2660_v31 = vmax.f32 %v2628_v26, 0.0 }
 0x433   :  { %v3543_v60 = vpop.f32.mrb[169].mxu1 }
 0x434   :  { %v2661_v36 = vmax.f32 %v2629_v55, 0.0  ;;  %v3544_v42 = vadd.f32 %v3543_v60, %v3542_v39  ;;  %v3545_v22 = vpop.f32.mrb[170].mxu1 }
 0x435   :  { %v3546_v3 = vpop.f32.mrb[171].mxu1 }
 0x436   :  { %v2581_v51 = vadd.f32 %v3544_v42, %v4995_v48  ;;  %v3547_v33 = vadd.f32 %v3546_v3, %v3545_v22  ;;  %v2679_v18 = vpack.c.bf16 %v2661_v36, %v2660_v31 }
 0x438   :  { %v2630_v56 = vadd.f32 %v5024_v37, %v2581_v51  ;;  %v2584_v5 = vadd.f32 %v3547_v33, %v4999_v27  ;;  %3691 = vmatmul.mubr.bf16.gmra.mrb[200].mxu1 %v2679_v18 }
 0x43a   :  { %v2631_v46 = vadd.f32 %v5024_v37, %v2584_v5  ;;  %v3548_v2 = vpop.f32.mrb[172].mxu1  ;;  %v2662_v32 = vmax.f32 %v2630_v56, 0.0 }
 0x43b   :  { %v3549_v10 = vpop.f32.mrb[173].mxu1 }
 0x43c   :  { %v2663_v53 = vmax.f32 %v2631_v46, 0.0  ;;  %v3550_v0 = vadd.f32 %v3549_v10, %v3548_v2  ;;  %v3551_v30 = vpop.f32.mrb[174].mxu1 }
 0x43d   :  { %v3552_v23 = vpop.f32.mrb[175].mxu1 }
 0x43e   :  { %v2589_v49 = vadd.f32 %v4992_v16, %v3550_v0  ;;  %v3553_v1 = vadd.f32 %v3552_v23, %v3551_v30  ;;  %v2680_v48 = vpack.c.bf16 %v2663_v53, %v2662_v32 }
 0x440   :  { %v2632_v28 = vadd.f32 %v5024_v37, %v2589_v49  ;;  %v2592_v7 = vadd.f32 %v4997_v14, %v3553_v1  ;;  %3694 = vmatprep.mubr.bf16.mxu1 %v2680_v48 }
 0x442   :  { %v2633_v27 = vadd.f32 %v5024_v37, %v2592_v7  ;;  %v2664_v8 = vmax.f32 %v2632_v28, 0.0 }
 0x444   :  { %v2665_v9 = vmax.f32 %v2633_v27, 0.0 }
 0x446   :  { %v2681_v4 = vpack.c.bf16 %v2665_v9, %v2664_v8 }
 0x448   :  { %3695 = vmatmul.mubr.bf16.gmra.mrb[204].mxu1 %v2681_v4 }
 0x4ab   :  { %v3668_v63 = vpop.f32.mrb[176].mxu1 }
 0x4ac   :  { %v2796_v16 = vadd.f32 %v3668_v63, %v5093_v59  ;;  %v2787_v38 = vpop.f32.mrb[177].mxu1 }
 0x4ad   :  { %v2788_v6 = vadd.f32 %v5093_v59, %v2787_v38  ;;  %v3669_v21 = vpop.f32.mrb[178].mxu1 }
 0x4ae   :  { %v2799_v14 = vadd.f32 %v3669_v21, %v5093_v59  ;;  %v2790_v17 = vpop.f32.mrb[179].mxu1  ;;  %v2916_v24 = vmax.f32 %v2796_v16, 0.0 }
 0x4af   :  { %v2791_v37 = vadd.f32 %v5093_v59, %v2790_v17  ;;  %v2914_v44 = vmax.f32 %v2788_v6, 0.0 }
 0x4b0   :  { %v2917_v25 = vmax.f32 %v2799_v14, 0.0 }
 0x4b1   :  { %v2915_v20 = vmax.f32 %v2791_v37, 0.0 }
 0x4b2   :  { %v2947_v15 = vpack.c.bf16 %v2917_v25, %v2916_v24 }
 0x4b3   :  { %v2946_v34 = vpack.c.bf16 %v2915_v20, %v2914_v44 }
 0x4b5   :  { %3714 = vmatprep.mubr.bf16.mxu0 %v2946_v34 }
 0x4b6   :  { %3715 = vmatmul.mubr.bf16.vlgmr.msra.gmra.mrb[112].mxu0 %v2947_v15 }
 0x4bb   :  { %v3672_v35 = vpop.f32.mrb[180].mxu1 }
 0x4bc   :  { %v2812_v57 = vadd.f32 %v3672_v35, %v5093_v59  ;;  %v2803_v62 = vpop.f32.mrb[181].mxu1 }
 0x4bd   :  { %v2804_v45 = vadd.f32 %v5093_v59, %v2803_v62  ;;  %v3673_v61 = vpop.f32.mrb[182].mxu1 }
 0x4be   :  { %v2815_v40 = vadd.f32 %v3673_v61, %v5093_v59  ;;  %v2806_v52 = vpop.f32.mrb[183].mxu1  ;;  %v2920_v41 = vmax.f32 %v2812_v57, 0.0 }
 0x4bf   :  { %v2807_v29 = vadd.f32 %v5093_v59, %v2806_v52  ;;  %v2918_v47 = vmax.f32 %v2804_v45, 0.0 }
 0x4c0   :  { %v2921_v43 = vmax.f32 %v2815_v40, 0.0 }
 0x4c1   :  { %v2919_v19 = vmax.f32 %v2807_v29, 0.0 }
 0x4c2   :  { %v2949_v58 = vpack.c.bf16 %v2921_v43, %v2920_v41 }
 0x4c3   :  { %v2948_v12 = vpack.c.bf16 %v2919_v19, %v2918_v47 }
 0x4c5   :  { %3718 = vmatprep.mubr.bf16.mxu0 %v2948_v12 }
 0x4c6   :  { %3719 = vmatmul.mubr.bf16.gmra.mrb[116].mxu0 %v2949_v58 }
 0x4cb   :  { %v3676_v54 = vpop.f32.mrb[184].mxu1 }
 0x4cc   :  { %v2828_v11 = vadd.f32 %v3676_v54, %v5093_v59  ;;  %v2819_v26 = vpop.f32.mrb[185].mxu1 }
 0x4cd   :  { %v2820_v50 = vadd.f32 %v5093_v59, %v2819_v26  ;;  %v3677_v13 = vpop.f32.mrb[186].mxu1 }
 0x4ce   :  { %v2831_v55 = vadd.f32 %v3677_v13, %v5093_v59  ;;  %v2822_v39 = vpop.f32.mrb[187].mxu1  ;;  %v2924_v31 = vmax.f32 %v2828_v11, 0.0 }
 0x4cf   :  { %v2823_v60 = vadd.f32 %v5093_v59, %v2822_v39  ;;  %v2922_v42 = vmax.f32 %v2820_v50, 0.0 }
 0x4d0   :  { %v2925_v36 = vmax.f32 %v2831_v55, 0.0 }
 0x4d1   :  { %v2923_v22 = vmax.f32 %v2823_v60, 0.0 }
 0x4d2   :  { %v2951_v3 = vpack.c.bf16 %v2925_v36, %v2924_v31 }
 0x4d3   :  { %v2950_v51 = vpack.c.bf16 %v2923_v22, %v2922_v42 }
 0x4d5   :  { %3722 = vmatprep.mubr.bf16.mxu0 %v2950_v51 }
 0x4d6   :  { %3723 = vmatmul.mubr.bf16.gmra.mrb[120].mxu0 %v2951_v3 }
 0x4db   :  { %v3680_v33 = vpop.f32.mrb[188].mxu1 }
 0x4dc   :  { %v2844_v18 = vadd.f32 %v3680_v33, %v5093_v59  ;;  %v2835_v56 = vpop.f32.mrb[189].mxu1 }
 0x4dd   :  { %v2836_v5 = vadd.f32 %v5093_v59, %v2835_v56  ;;  %v3681_v46 = vpop.f32.mrb[190].mxu1 }
 0x4de   :  { %v2847_v2 = vadd.f32 %v3681_v46, %v5093_v59  ;;  %v2838_v10 = vpop.f32.mrb[191].mxu1  ;;  %v2928_v53 = vmax.f32 %v2844_v18, 0.0 }
 0x4df   :  { %v2839_v32 = vadd.f32 %v5093_v59, %v2838_v10  ;;  %v2926_v30 = vmax.f32 %v2836_v5, 0.0 }
 0x4e0   :  { %v2929_v0 = vmax.f32 %v2847_v2, 0.0 }
 0x4e1   :  { %v2927_v23 = vmax.f32 %v2839_v32, 0.0  ;;  %v5130_v32 = vld [vmem:[%s5191_s12] ss:$0 sm:$0xff]  ;;  %s4347_s12 = smov [#allocation16]  }
 0x4e2   :  { %v2953_v49 = vpack.c.bf16 %v2929_v0, %v2928_v53  ;;  %s3231_s22 = sshll.u32 %s4347_s12, 4  ;;  %s3232_s22 = int_to_ptr.vmem [resolvable:$true] %s3231_s22 }
 0x4e3   :  { %v2952_v1 = vpack.c.bf16 %v2927_v23, %v2926_v30  ;;  %s4298_s4 = scalar_lea.vmem %s3232_s22, 4096  ;;  %p4303_p9 = scmp.lt.s32.totalorder %s3232_s22, %s3232_s22 }
 0x4e4   :  { %p4299_p8 = scmp.ne.s32.totalorder %s3232_s22, %s4298_s4  ;;  %p4304_p10 = scmp.lt.s32.totalorder %s4298_s4, %s4298_s4 }
 0x4e5   :  { %3726 = vmatprep.mubr.bf16.mxu0 %v2952_v1 }
 0x4e6   :  { %3727 = vmatmul.mubr.bf16.gmra.mrb[124].mxu0 %v2953_v49  ;;  %p4305_p11 = por %p4304_p10, %p4303_p9 }
 0x4e8   :  { %p4306_p12 = pnand %p4305_p11, %p4299_p8 }
 0x4eb   :  { %v3684_v48 = vpop.f32.mrb[192].mxu1 }
 0x4ec   :  { %v2860_v28 = vadd.f32 %v3684_v48, %v5093_v59  ;;  %v2851_v7 = vpop.f32.mrb[193].mxu1 }
 0x4ed   :  { %v2852_v27 = vadd.f32 %v5093_v59, %v2851_v7  ;;  %v3685_v8 = vpop.f32.mrb[194].mxu1 }
 0x4ee   :  { %v2863_v9 = vadd.f32 %v3685_v8, %v5093_v59  ;;  %v2854_v4 = vpop.f32.mrb[195].mxu1  ;;  %v2932_v16 = vmax.f32 %v2860_v28, 0.0 }
 0x4ef   :  { %v2855_v63 = vadd.f32 %v5093_v59, %v2854_v4  ;;  %v2930_v6 = vmax.f32 %v2852_v27, 0.0 }
 0x4f0   :  { %v2933_v38 = vmax.f32 %v2863_v9, 0.0 }
 0x4f1   :  { %v2931_v21 = vmax.f32 %v2855_v63, 0.0 }
 0x4f2   :  { %v2955_v14 = vpack.c.bf16 %v2933_v38, %v2932_v16 }
 0x4f3   :  { %v2954_v17 = vpack.c.bf16 %v2931_v21, %v2930_v6 }
 0x4f5   :  { %3730 = vmatprep.mubr.bf16.mxu0 %v2954_v17 }
 0x4f6   :  { %3731 = vmatmul.mubr.bf16.gmra.mrb[128].mxu0 %v2955_v14 }
 0x4fb   :  { %v3688_v37 = vpop.f32.mrb[196].mxu1 }
 0x4fc   :  { %v2876_v24 = vadd.f32 %v3688_v37, %v5093_v59  ;;  %v2867_v25 = vpop.f32.mrb[197].mxu1 }
 0x4fd   :  { %v2868_v44 = vadd.f32 %v5093_v59, %v2867_v25  ;;  %v3689_v20 = vpop.f32.mrb[198].mxu1 }
 0x4fe   :  { %v2879_v15 = vadd.f32 %v3689_v20, %v5093_v59  ;;  %v2870_v34 = vpop.f32.mrb[199].mxu1  ;;  %v2936_v57 = vmax.f32 %v2876_v24, 0.0 }
 0x4ff   :  { %v2871_v35 = vadd.f32 %v5093_v59, %v2870_v34  ;;  %v2934_v45 = vmax.f32 %v2868_v44, 0.0 }
 0x500   :  { %v2937_v62 = vmax.f32 %v2879_v15, 0.0 }
 0x501   :  { %v2935_v61 = vmax.f32 %v2871_v35, 0.0 }
 0x502   :  { %v2957_v40 = vpack.c.bf16 %v2937_v62, %v2936_v57 }
 0x503   :  { %v2956_v52 = vpack.c.bf16 %v2935_v61, %v2934_v45 }
 0x505   :  { %3734 = vmatprep.mubr.bf16.mxu0 %v2956_v52 }
 0x506   :  { %3735 = vmatmul.mubr.bf16.gmra.mrb[132].mxu0 %v2957_v40 }
 0x50b   :  { %v3692_v29 = vpop.f32.mrb[200].mxu1 }
 0x50c   :  { %v2892_v41 = vadd.f32 %v3692_v29, %v5093_v59  ;;  %v2883_v43 = vpop.f32.mrb[201].mxu1 }
 0x50d   :  { %v2884_v47 = vadd.f32 %v5093_v59, %v2883_v43  ;;  %v3693_v19 = vpop.f32.mrb[202].mxu1 }
 0x50e   :  { %v2895_v58 = vadd.f32 %v3693_v19, %v5093_v59  ;;  %v2886_v12 = vpop.f32.mrb[203].mxu1  ;;  %v2940_v11 = vmax.f32 %v2892_v41, 0.0 }
 0x50f   :  { %v2887_v54 = vadd.f32 %v5093_v59, %v2886_v12  ;;  %v2938_v50 = vmax.f32 %v2884_v47, 0.0 }
 0x510   :  { %v2941_v26 = vmax.f32 %v2895_v58, 0.0 }
 0x511   :  { %v2939_v13 = vmax.f32 %v2887_v54, 0.0 }
 0x512   :  { %v2959_v55 = vpack.c.bf16 %v2941_v26, %v2940_v11 }
 0x513   :  { %v2958_v39 = vpack.c.bf16 %v2939_v13, %v2938_v50 }
 0x515   :  { %3738 = vmatprep.mubr.bf16.mxu0 %v2958_v39 }
 0x516   :  { %3739 = vmatmul.mubr.bf16.gmra.mrb[136].mxu0 %v2959_v55 }
 0x51b   :  { %v3696_v60 = vpop.f32.mrb[204].mxu1 }
 0x51c   :  { %v2908_v31 = vadd.f32 %v3696_v60, %v5093_v59  ;;  %v2899_v36 = vpop.f32.mrb[205].mxu1 }
 0x51d   :  { %v2900_v42 = vadd.f32 %v5093_v59, %v2899_v36  ;;  %v3697_v22 = vpop.f32.mrb[206].mxu1 }
 0x51e   :  { %v2911_v3 = vadd.f32 %v3697_v22, %v5093_v59  ;;  %v2902_v51 = vpop.f32.mrb[207].mxu1  ;;  %v2944_v18 = vmax.f32 %v2908_v31, 0.0 }
 0x51f   :  { %v2903_v33 = vadd.f32 %v5093_v59, %v2902_v51  ;;  %v2942_v5 = vmax.f32 %v2900_v42, 0.0 }
 0x520   :  { %v2945_v56 = vmax.f32 %v2911_v3, 0.0 }
 0x521   :  { %v2943_v46 = vmax.f32 %v2903_v33, 0.0 }
 0x522   :  { %v2961_v2 = vpack.c.bf16 %v2945_v56, %v2944_v18 }
 0x523   :  { %v2960_v10 = vpack.c.bf16 %v2943_v46, %v2942_v5 }
 0x525   :  { %3742 = vmatprep.mubr.bf16.mxu0 %v2960_v10 }
 0x526   :  { %3743 = vmatmul.mubr.bf16.gmra.mrb[140].mxu0 %v2961_v2 }
 0x589   :  { %v3716_v53 = vpop.f32.mrb[112].mxu0 }
 0x58a   :  { %v3076_v0 = vadd.f32 %v3716_v53, %v5130_v32  ;;  %v3067_v30 = vpop.f32.mrb[113].mxu0 }
 0x58b   :  { %v3068_v23 = vadd.f32 %v5130_v32, %v3067_v30  ;;  %v3717_v59 = vpop.f32.mrb[114].mxu0 }
 0x58c   :  { %3196 = vst [vmem:[#allocation16 + $0x10] sm:$0xff] %v3076_v0  ;;  %v3079_v49 = vadd.f32 %v3717_v59, %v5130_v32  ;;  %v3070_v1 = vpop.f32.mrb[115].mxu0 }
 0x58d   :  { %3194 = vst [vmem:[#allocation16] sm:$0xff] %v3068_v23  ;;  %v3071_v48 = vadd.f32 %v5130_v32, %v3070_v1 }
 0x58e   :  { %3197 = vst [vmem:[#allocation16 + $0x18] sm:$0xff] %v3079_v49 }
 0x58f   :  { %3195 = vst [vmem:[#allocation16 + $0x8] sm:$0xff] %v3071_v48 }
 0x599   :  { %v3720_v28 = vpop.f32.mrb[116].mxu0 }
 0x59a   :  { %v3092_v7 = vadd.f32 %v3720_v28, %v5130_v32  ;;  %v3083_v27 = vpop.f32.mrb[117].mxu0 }
 0x59b   :  { %v3084_v8 = vadd.f32 %v5130_v32, %v3083_v27  ;;  %v3721_v9 = vpop.f32.mrb[118].mxu0 }
 0x59c   :  { %3200 = vst [vmem:[#allocation16 + $0x30] sm:$0xff] %v3092_v7  ;;  %v3095_v4 = vadd.f32 %v3721_v9, %v5130_v32  ;;  %v3086_v63 = vpop.f32.mrb[119].mxu0 }
 0x59d   :  { %3198 = vst [vmem:[#allocation16 + $0x20] sm:$0xff] %v3084_v8  ;;  %v3087_v16 = vadd.f32 %v5130_v32, %v3086_v63 }
 0x59e   :  { %3201 = vst [vmem:[#allocation16 + $0x38] sm:$0xff] %v3095_v4 }
 0x59f   :  { %3199 = vst [vmem:[#allocation16 + $0x28] sm:$0xff] %v3087_v16 }
 0x5a9   :  { %v3724_v38 = vpop.f32.mrb[120].mxu0 }
 0x5aa   :  { %v3108_v6 = vadd.f32 %v3724_v38, %v5130_v32  ;;  %v3099_v21 = vpop.f32.mrb[121].mxu0 }
 0x5ab   :  { %v3100_v14 = vadd.f32 %v5130_v32, %v3099_v21  ;;  %v3725_v17 = vpop.f32.mrb[122].mxu0 }
 0x5ac   :  { %3204 = vst [vmem:[#allocation16 + $0x50] sm:$0xff] %v3108_v6  ;;  %v3111_v37 = vadd.f32 %v3725_v17, %v5130_v32  ;;  %v3102_v24 = vpop.f32.mrb[123].mxu0 }
 0x5ad   :  { %3202 = vst [vmem:[#allocation16 + $0x40] sm:$0xff] %v3100_v14  ;;  %v3103_v25 = vadd.f32 %v5130_v32, %v3102_v24 }
 0x5ae   :  { %3205 = vst [vmem:[#allocation16 + $0x58] sm:$0xff] %v3111_v37 }
 0x5af   :  { %3203 = vst [vmem:[#allocation16 + $0x48] sm:$0xff] %v3103_v25 }
 0x5b9   :  { %v3728_v44 = vpop.f32.mrb[124].mxu0 }
 0x5ba   :  { %v3124_v20 = vadd.f32 %v3728_v44, %v5130_v32  ;;  %v3115_v15 = vpop.f32.mrb[125].mxu0 }
 0x5bb   :  { %v3116_v34 = vadd.f32 %v5130_v32, %v3115_v15  ;;  %v3729_v35 = vpop.f32.mrb[126].mxu0 }
 0x5bc   :  { %3208 = vst [vmem:[#allocation16 + $0x70] sm:$0xff] %v3124_v20  ;;  %v3127_v57 = vadd.f32 %v3729_v35, %v5130_v32  ;;  %v3118_v62 = vpop.f32.mrb[127].mxu0 }
 0x5bd   :  { %3206 = vst [vmem:[#allocation16 + $0x60] sm:$0xff] %v3116_v34  ;;  %v3119_v45 = vadd.f32 %v5130_v32, %v3118_v62 }
 0x5be   :  { %3209 = vst [vmem:[#allocation16 + $0x78] sm:$0xff] %v3127_v57 }
 0x5bf   :  { %3207 = vst [vmem:[#allocation16 + $0x68] sm:$0xff] %v3119_v45 }
 0x5c9   :  { %v3732_v61 = vpop.f32.mrb[128].mxu0 }
 0x5ca   :  { %v3140_v40 = vadd.f32 %v3732_v61, %v5130_v32  ;;  %v3131_v52 = vpop.f32.mrb[129].mxu0 }
 0x5cb   :  { %v3132_v29 = vadd.f32 %v5130_v32, %v3131_v52  ;;  %v3733_v41 = vpop.f32.mrb[130].mxu0 }
 0x5cc   :  { %3212 = vst [vmem:[#allocation16 + $0x90] sm:$0xff] %v3140_v40  ;;  %v3143_v43 = vadd.f32 %v3733_v41, %v5130_v32  ;;  %v3134_v47 = vpop.f32.mrb[131].mxu0 }
 0x5cd   :  { %3210 = vst [vmem:[#allocation16 + $0x80] sm:$0xff] %v3132_v29  ;;  %v3135_v19 = vadd.f32 %v5130_v32, %v3134_v47 }
 0x5ce   :  { %3213 = vst [vmem:[#allocation16 + $0x98] sm:$0xff] %v3143_v43 }
 0x5cf   :  { %3211 = vst [vmem:[#allocation16 + $0x88] sm:$0xff] %v3135_v19 }
 0x5d9   :  { %v3736_v58 = vpop.f32.mrb[132].mxu0 }
 0x5da   :  { %v3156_v12 = vadd.f32 %v3736_v58, %v5130_v32  ;;  %v3147_v54 = vpop.f32.mrb[133].mxu0 }
 0x5db   :  { %v3148_v11 = vadd.f32 %v5130_v32, %v3147_v54  ;;  %v3737_v26 = vpop.f32.mrb[134].mxu0 }
 0x5dc   :  { %3216 = vst [vmem:[#allocation16 + $0xb0] sm:$0xff] %v3156_v12  ;;  %v3159_v50 = vadd.f32 %v3737_v26, %v5130_v32  ;;  %v3150_v13 = vpop.f32.mrb[135].mxu0 }
 0x5dd   :  { %3214 = vst [vmem:[#allocation16 + $0xa0] sm:$0xff] %v3148_v11  ;;  %v3151_v55 = vadd.f32 %v5130_v32, %v3150_v13 }
 0x5de   :  { %3217 = vst [vmem:[#allocation16 + $0xb8] sm:$0xff] %v3159_v50 }
 0x5df   :  { %3215 = vst [vmem:[#allocation16 + $0xa8] sm:$0xff] %v3151_v55 }
 0x5e9   :  { %v3740_v39 = vpop.f32.mrb[136].mxu0 }
 0x5ea   :  { %v3172_v60 = vadd.f32 %v3740_v39, %v5130_v32  ;;  %v3163_v31 = vpop.f32.mrb[137].mxu0 }
 0x5eb   :  { %v3164_v36 = vadd.f32 %v5130_v32, %v3163_v31  ;;  %v3741_v42 = vpop.f32.mrb[138].mxu0 }
 0x5ec   :  { %3220 = vst [vmem:[#allocation16 + $0xd0] sm:$0xff] %v3172_v60  ;;  %v3175_v22 = vadd.f32 %v3741_v42, %v5130_v32  ;;  %v3166_v3 = vpop.f32.mrb[139].mxu0 }
 0x5ed   :  { %3218 = vst [vmem:[#allocation16 + $0xc0] sm:$0xff] %v3164_v36  ;;  %v3167_v51 = vadd.f32 %v5130_v32, %v3166_v3 }
 0x5ee   :  { %3221 = vst [vmem:[#allocation16 + $0xd8] sm:$0xff] %v3175_v22 }
 0x5ef   :  { %3219 = vst [vmem:[#allocation16 + $0xc8] sm:$0xff] %v3167_v51 }
 0x5f9   :  { %v3744_v33 = vpop.f32.mrb[140].mxu0 }
 0x5fa   :  { %v3188_v18 = vadd.f32 %v3744_v33, %v5130_v32  ;;  %v3179_v56 = vpop.f32.mrb[141].mxu0 }
 0x5fb   :  { %v3180_v5 = vadd.f32 %v5130_v32, %v3179_v56  ;;  %v3745_v46 = vpop.f32.mrb[142].mxu0 }
 0x5fc   :  { %3224 = vst [vmem:[#allocation16 + $0xf0] sm:$0xff] %v3188_v18  ;;  %v3191_v2 = vadd.f32 %v3745_v46, %v5130_v32  ;;  %v3182_v10 = vpop.f32.mrb[143].mxu0 }
 0x5fd   :  { %3222 = vst [vmem:[#allocation16 + $0xe0] sm:$0xff] %v3180_v5  ;;  %v3183_v53 = vadd.f32 %v5130_v32, %v3182_v10 }
 0x5fe   :  { %3225 = vst [vmem:[#allocation16 + $0xf8] sm:$0xff] %v3191_v2 }
 0x5ff   :  { %3223 = vst [vmem:[#allocation16 + $0xe8] sm:$0xff] %v3183_v53 }
 0x600   :  { %4309 = shalt.err (!%p4306_p12)
}
 0x601   :  { %s4310_s7 = scalar_lea.hbm %s5192_s13, 4096 }
 0x602   :  { %p4311_p13 = scmp.ne.s32.totalorder %s5192_s13, %s4310_s7  ;;  %p4314_p0 = scmp.lt.u32.totalorder %s4310_s7, %s5192_s13 }
 0x604   :  { %p4316_p1 = pnand %p4314_p0, %p4311_p13 }
 0x606   :  { %4319 = shalt.err (!%p4316_p1)
}
 0x607   :  { %3237 = dma.vmem_to_hbm [thread:$0]  %s3232_s22, 4096, %s5192_s13, [#allocation4], %s4336_s1, %s4336_s1, %s4337_s26  }
 0x608   :  { %4330 = dma.done.wait [#allocation4], 4096  }
 0x609   :  { %4331 = vsyncadd [#allocation4], 4294963200 }
 0x60a   :  { %3241 = vsyncpa [#allocation3], 1 }
 0x60b   :  { %3242 = vsyncpa [#allocation6], 1 }
 0x60c   :  { %3243 = vsyncpa [#allocation9], 1 }
 0x60d   :  { %3244 = vsyncpa [#allocation12], 1 }
 0x60e   :  { %3245 = vsyncpa [#allocation15], 1 }
 0x60f   :  { %3246 = vsyncpa [#allocation4], 1 }

</bundles_post_ra>
